<compile_context>
chip_gen: v7x
topology: tpu7x:2x2x1
jax: 0.10.0
libtpu: 0.0.40
codegen_flags: <defaults>
</compile_context>

<pallas_src>
import math

import jax
import jax.numpy as jnp
from jax import lax
from jax.experimental import pallas as pl
from jax.experimental.pallas import tpu as pltpu

LN_EPS = 1e-5
FFN_DIM = 2048  # PyTorch TransformerEncoderLayer default dim_feedforward


# ----------------------------------------------------------------------------
# Fused kernel: one batch element per grid step, everything VMEM-resident.
# ----------------------------------------------------------------------------
def fused_forward_kernel(
        x_ref, emb_w_ref, emb_b_ref,
        wq_ref, bq_ref, wk_ref, bk_ref, wv_ref, bv_ref,
        wo_ref, bo_ref, g1_ref, bt1_ref,
        w1_ref, bf1_ref, w2_ref, bf2_ref, g2_ref, bt2_ref,
        hw1_ref, hb1_ref, hw2_ref, hb2_ref,
        o_ref):
    S = x_ref.shape[1]
    n_layers, n_head, D, hd = wq_ref.shape

    def layernorm(v, g, b):
        mu = jnp.mean(v, axis=-1, keepdims=True)
        var = jnp.mean((v - mu) ** 2, axis=-1, keepdims=True)
        return (v - mu) * lax.rsqrt(var + LN_EPS) * g + b

    # ---- embedding: Linear(1, D) == broadcast multiply-add (VPU) -----------
    x = x_ref[0]                                     # (S, 1)
    h = x * emb_w_ref[...] + emb_b_ref[...]          # (S, D)

    # ---- transformer encoder layers (post-LN, PyTorch default) -------------
    for l in range(n_layers):
        xb = jnp.broadcast_to(h, (n_head, S, D))     # heads as MXU batch dim
        q = jnp.einsum('hsd,hdk->hsk', xb, wq_ref[l],
                       preferred_element_type=jnp.float32) + bq_ref[l]
        k = jnp.einsum('hsd,hdk->hsk', xb, wk_ref[l],
                       preferred_element_type=jnp.float32) + bk_ref[l]
        v = jnp.einsum('hsd,hdk->hsk', xb, wv_ref[l],
                       preferred_element_type=jnp.float32) + bv_ref[l]

        # 1/sqrt(hd) is already folded into wq/bq host-side.
        s = jnp.einsum('hqk,htk->hqt', q, k,
                       preferred_element_type=jnp.float32)      # (H, S, S)
        s = s - jnp.max(s, axis=-1, keepdims=True)
        p = jnp.exp(s)
        p = p / jnp.sum(p, axis=-1, keepdims=True)
        ao = jnp.einsum('hqt,htk->hqk', p, v,
                        preferred_element_type=jnp.float32)     # (H, S, hd)
        proj = jnp.einsum('hsk,hkd->hsd', ao, wo_ref[l],
                          preferred_element_type=jnp.float32)   # (H, S, D)
        attn = jnp.sum(proj, axis=0) + bo_ref[l]                # (S, D)

        x1 = layernorm(h + attn, g1_ref[l], bt1_ref[l])

        hff = jnp.maximum(
            jnp.dot(x1, w1_ref[l], preferred_element_type=jnp.float32)
            + bf1_ref[l], 0.0)                                  # (S, FF)
        y = jnp.dot(hff, w2_ref[l],
                    preferred_element_type=jnp.float32) + bf2_ref[l]
        h = layernorm(x1 + y, g2_ref[l], bt2_ref[l])            # (S, D)

    # ---- output MLP on flattened (S*D) features -----------------------------
    # flatten expressed as sum_s h[s,:] @ W1[s,:,:]  (W1 pre-reshaped host-side)
    hid = hb1_ref[...]                                          # (1, H)
    for si in range(S):
        hid = hid + jnp.dot(h[si:si + 1, :], hw1_ref[si],
                            preferred_element_type=jnp.float32)
    hid = jnp.maximum(hid, 0.0)
    logits = jnp.dot(hid, hw2_ref[...],
                     preferred_element_type=jnp.float32) + hb2_ref[...]
    o_ref[0] = jax.nn.sigmoid(logits)                           # (1, O)


# ----------------------------------------------------------------------------
# Wrapper
# ----------------------------------------------------------------------------
def encoder_model_forward(x, fp):
    """x: (B, input_size) f32, fp: kernel-ready params -> (B, output_size)."""
    B, S = x.shape
    O = fp["hb2"].shape[1]
    x3 = x[:, :, None]                                # torch: x.unsqueeze(-1)

    args = [x3, fp["emb_w"], fp["emb_b"],
            fp["wq"], fp["bq"], fp["wk"], fp["bk"], fp["wv"], fp["bv"],
            fp["wo"], fp["bo"], fp["g1"], fp["bt1"],
            fp["w1"], fp["bf1"], fp["w2"], fp["bf2"], fp["g2"], fp["bt2"],
            fp["hw1"], fp["hb1"], fp["hw2"], fp["hb2"]]

    def const_spec(a):
        # whole array, same block every grid step -> DMAed once
        return pl.BlockSpec(a.shape, lambda b, _n=a.ndim: (0,) * _n)

    in_specs = [pl.BlockSpec((1, S, 1), lambda b: (b, 0, 0))]
    in_specs += [const_spec(a) for a in args[1:]]

    out = pl.pallas_call(
        fused_forward_kernel,
        grid=(B,),
        in_specs=in_specs,
        out_specs=pl.BlockSpec((1, 1, O), lambda b: (b, 0, 0)),
        out_shape=jax.ShapeDtypeStruct((B, 1, O), jnp.float32),
        compiler_params=pltpu.CompilerParams(
            dimension_semantics=("parallel",)),   # batch elems independent
    )(*args)
    return out.reshape(B, O)


# ----------------------------------------------------------------------------
# Host-side weight preparation (transpose / head-split / scale-fold / stack)
# ----------------------------------------------------------------------------
def prepare_fused_params(p, n_head, input_size):
    D = p["emb_w"].shape[1]
    assert D % n_head == 0, "hidden_size must be divisible by n_head"
    hd = D // n_head
    scale = 1.0 / math.sqrt(hd)
    S = input_size

    def split_heads_in(w):          # (out=D, in=D) -> (n_head, in=D, hd)
        return w.T.reshape(D, n_head, hd).transpose(1, 0, 2)

    acc = {k: [] for k in ("wq", "bq", "wk", "bk", "wv", "bv", "wo", "bo",
                           "g1", "bt1", "w1", "bf1", "w2", "bf2", "g2", "bt2")}
    for lp in p["layers"]:
        wqkv, bqkv = lp["wqkv"], lp["bqkv"][0]
        acc["wq"].append(split_heads_in(wqkv[:D]) * scale)
        acc["wk"].append(split_heads_in(wqkv[D:2 * D]))
        acc["wv"].append(split_heads_in(wqkv[2 * D:]))
        acc["bq"].append((bqkv[:D] * scale).reshape(n_head, 1, hd))
        acc["bk"].append(bqkv[D:2 * D].reshape(n_head, 1, hd))
        acc["bv"].append(bqkv[2 * D:].reshape(n_head, 1, hd))
        acc["wo"].append(lp["wo"].T.reshape(n_head, hd, D))
        acc["bo"].append(lp["bo"])
        acc["g1"].append(lp["g1"]);  acc["bt1"].append(lp["bt1"])
        acc["w1"].append(lp["w1"].T); acc["bf1"].append(lp["bf1"])
        acc["w2"].append(lp["w2"].T); acc["bf2"].append(lp["bf2"])
        acc["g2"].append(lp["g2"]);  acc["bt2"].append(lp["bt2"])

    fp = {k: jnp.stack(v, axis=0) for k, v in acc.items()}
    H_out = p["head_w1"].shape[0]
    fp.update(
        emb_w=p["emb_w"], emb_b=p["emb_b"],
        hw1=p["head_w1"].T.reshape(S, D, H_out),     # (S, D, H)
        hb1=p["head_b1"],
        hw2=p["head_w2"].T,                          # (H, O)
        hb2=p["head_b2"],
    )
    return fp


# ----------------------------------------------------------------------------
# Deterministic parameter init (PyTorch (out,in) convention, synthetic values)
# ----------------------------------------------------------------------------
def init_params(key, input_size, hidden_size, output_size, n_layers, ff=FFN_DIM):
    keys = jax.random.split(key, 4 + n_layers)

    def w(k, shape, scale=0.05):
        return (scale * jax.random.normal(k, shape)).astype(jnp.float32)

    p = {
        "emb_w": w(keys[0], (1, hidden_size)),
        "emb_b": w(keys[1], (1, hidden_size)),
        "head_w1": w(keys[2], (hidden_size, input_size * hidden_size)),
        "head_b1": jnp.zeros((1, hidden_size), jnp.float32),
        "head_w2": w(keys[3], (output_size, hidden_size)),
        "head_b2": jnp.zeros((1, output_size), jnp.float32),
        "layers": [],
    }
    for li in range(n_layers):
        lk = jax.random.split(keys[4 + li], 8)
        p["layers"].append(dict(
            wqkv=w(lk[0], (3 * hidden_size, hidden_size)),
            bqkv=w(lk[1], (1, 3 * hidden_size)),
            wo=w(lk[2], (hidden_size, hidden_size)),
            bo=w(lk[3], (1, hidden_size)),
            g1=jnp.ones((1, hidden_size), jnp.float32),
            bt1=jnp.zeros((1, hidden_size), jnp.float32),
            w1=w(lk[4], (ff, hidden_size)),
            bf1=w(lk[5], (1, ff)),
            w2=w(lk[6], (hidden_size, ff)),
            bf2=w(lk[7], (1, hidden_size)),
            g2=jnp.ones((1, hidden_size), jnp.float32),
            bt2=jnp.zeros((1, hidden_size), jnp.float32),
        ))
    return p


# ----------------------------------------------------------------------------
# Pure-JAX reference (mirrors the PyTorch forward, eval mode)
# ----------------------------------------------------------------------------
def reference_forward(x, p, n_head):
    B, S = x.shape
    D = p["emb_w"].shape[1]
    hd = D // n_head
    hi = jax.lax.Precision.HIGHEST

    def dense(v, wgt, b):
        return jnp.einsum("...i,oi->...o", v, wgt, precision=hi) + b.reshape(-1)

    def ln(v, g, b):
        mu = v.mean(-1, keepdims=True)
        var = ((v - mu) ** 2).mean(-1, keepdims=True)
        return (v - mu) / jnp.sqrt(var + LN_EPS) * g.reshape(-1) + b.reshape(-1)

    h = x[:, :, None] * p["emb_w"][None] + p["emb_b"][None]
    for lp in p["layers"]:
        qkv = dense(h, lp["wqkv"], lp["bqkv"])
        q, k, v = jnp.split(qkv, 3, axis=-1)
        qh = q.reshape(B, S, n_head, hd).transpose(0, 2, 1, 3)
        kh = k.reshape(B, S, n_head, hd).transpose(0, 2, 1, 3)
        vh = v.reshape(B, S, n_head, hd).transpose(0, 2, 1, 3)
        s = jnp.einsum("bhqd,bhkd->bhqk", qh, kh, precision=hi) / math.sqrt(hd)
        a = jnp.einsum("bhqk,bhkd->bhqd", jax.nn.softmax(s, -1), vh, precision=hi)
        a = a.transpose(0, 2, 1, 3).reshape(B, S, D)
        a = dense(a, lp["wo"], lp["bo"])
        h1 = ln(h + a, lp["g1"], lp["bt1"])
        ffn = jnp.maximum(dense(h1, lp["w1"], lp["bf1"]), 0.0)
        ffn = dense(ffn, lp["w2"], lp["bf2"])
        h = ln(h1 + ffn, lp["g2"], lp["bt2"])
    xf = h.reshape(B, -1)
    o = jnp.maximum(dense(xf, p["head_w1"], p["head_b1"]), 0.0)
    o = dense(o, p["head_w2"], p["head_b2"])
    return jax.nn.sigmoid(o)


# ----------------------------------------------------------------------------
if __name__ == "__main__":
    input_size, hidden_size, output_size, n_layers, n_head = 8, 32, 4, 2, 4
    B = 2

    key = jax.random.PRNGKey(0)
    kx, kp = jax.random.split(key)
    x = jax.random.normal(kx, (B, input_size), jnp.float32)
    params = init_params(kp, input_size, hidden_size, output_size, n_layers)
    fused_params = prepare_fused_params(params, n_head, input_size)

    out = encoder_model_forward(x, fused_params)
    out = jax.block_until_ready(out)

    assert out.shape == (B, output_size) and out.dtype == jnp.float32
    ref = reference_forward(x, params, n_head)
    assert jnp.allclose(out, ref, atol=5e-3, rtol=5e-3), (out, ref)

    print("KERNEL_OK")
</pallas_src>

<mosaic_0001>
module attributes {stable_mosaic.version = 11 : i64} {
  func.func @fused_forward_kernel(%arg0: i32, %arg1: memref<1x8x1xf32, #tpu.memory_space<vmem>>, %arg2: memref<1x32xf32, #tpu.memory_space<vmem>>, %arg3: memref<1x32xf32, #tpu.memory_space<vmem>>, %arg4: memref<2x4x32x8xf32, #tpu.memory_space<vmem>>, %arg5: memref<2x4x1x8xf32, #tpu.memory_space<vmem>>, %arg6: memref<2x4x32x8xf32, #tpu.memory_space<vmem>>, %arg7: memref<2x4x1x8xf32, #tpu.memory_space<vmem>>, %arg8: memref<2x4x32x8xf32, #tpu.memory_space<vmem>>, %arg9: memref<2x4x1x8xf32, #tpu.memory_space<vmem>>, %arg10: memref<2x4x8x32xf32, #tpu.memory_space<vmem>>, %arg11: memref<2x1x32xf32, #tpu.memory_space<vmem>>, %arg12: memref<2x1x32xf32, #tpu.memory_space<vmem>>, %arg13: memref<2x1x32xf32, #tpu.memory_space<vmem>>, %arg14: memref<2x32x2048xf32, #tpu.memory_space<vmem>>, %arg15: memref<2x1x2048xf32, #tpu.memory_space<vmem>>, %arg16: memref<2x2048x32xf32, #tpu.memory_space<vmem>>, %arg17: memref<2x1x32xf32, #tpu.memory_space<vmem>>, %arg18: memref<2x1x32xf32, #tpu.memory_space<vmem>>, %arg19: memref<2x1x32xf32, #tpu.memory_space<vmem>>, %arg20: memref<8x32x32xf32, #tpu.memory_space<vmem>>, %arg21: memref<1x32xf32, #tpu.memory_space<vmem>>, %arg22: memref<32x4xf32, #tpu.memory_space<vmem>>, %arg23: memref<1x4xf32, #tpu.memory_space<vmem>>, %arg24: memref<1x1x4xf32, #tpu.memory_space<vmem>>) attributes {dimension_semantics = [#tpu.dimension_semantics<parallel>], iteration_bounds = array<i64: 2>, scalar_prefetch = 0 : i64, scratch_operands = 0 : i64, tpu.core_type = #tpu.core_type<tc>, window_params = [{transform_indices = @transform_0, window_bounds = array<i64: 1, 8, 1>}, {pipeline_mode = #tpu.pipeline_mode<synchronous>, transform_indices = @transform_1, window_bounds = array<i64: 1, 32>}, {pipeline_mode = #tpu.pipeline_mode<synchronous>, transform_indices = @transform_2, window_bounds = array<i64: 1, 32>}, {pipeline_mode = #tpu.pipeline_mode<synchronous>, transform_indices = @transform_3, window_bounds = array<i64: 2, 4, 32, 8>}, {pipeline_mode = #tpu.pipeline_mode<synchronous>, transform_indices = @transform_4, window_bounds = array<i64: 2, 4, 1, 8>}, {pipeline_mode = #tpu.pipeline_mode<synchronous>, transform_indices = @transform_5, window_bounds = array<i64: 2, 4, 32, 8>}, {pipeline_mode = #tpu.pipeline_mode<synchronous>, transform_indices = @transform_6, window_bounds = array<i64: 2, 4, 1, 8>}, {pipeline_mode = #tpu.pipeline_mode<synchronous>, transform_indices = @transform_7, window_bounds = array<i64: 2, 4, 32, 8>}, {pipeline_mode = #tpu.pipeline_mode<synchronous>, transform_indices = @transform_8, window_bounds = array<i64: 2, 4, 1, 8>}, {pipeline_mode = #tpu.pipeline_mode<synchronous>, transform_indices = @transform_9, window_bounds = array<i64: 2, 4, 8, 32>}, {pipeline_mode = #tpu.pipeline_mode<synchronous>, transform_indices = @transform_10, window_bounds = array<i64: 2, 1, 32>}, {pipeline_mode = #tpu.pipeline_mode<synchronous>, transform_indices = @transform_11, window_bounds = array<i64: 2, 1, 32>}, {pipeline_mode = #tpu.pipeline_mode<synchronous>, transform_indices = @transform_12, window_bounds = array<i64: 2, 1, 32>}, {pipeline_mode = #tpu.pipeline_mode<synchronous>, transform_indices = @transform_13, window_bounds = array<i64: 2, 32, 2048>}, {pipeline_mode = #tpu.pipeline_mode<synchronous>, transform_indices = @transform_14, window_bounds = array<i64: 2, 1, 2048>}, {pipeline_mode = #tpu.pipeline_mode<synchronous>, transform_indices = @transform_15, window_bounds = array<i64: 2, 2048, 32>}, {pipeline_mode = #tpu.pipeline_mode<synchronous>, transform_indices = @transform_16, window_bounds = array<i64: 2, 1, 32>}, {pipeline_mode = #tpu.pipeline_mode<synchronous>, transform_indices = @transform_17, window_bounds = array<i64: 2, 1, 32>}, {pipeline_mode = #tpu.pipeline_mode<synchronous>, transform_indices = @transform_18, window_bounds = array<i64: 2, 1, 32>}, {pipeline_mode = #tpu.pipeline_mode<synchronous>, transform_indices = @transform_19, window_bounds = array<i64: 8, 32, 32>}, {pipeline_mode = #tpu.pipeline_mode<synchronous>, transform_indices = @transform_20, window_bounds = array<i64: 1, 32>}, {pipeline_mode = #tpu.pipeline_mode<synchronous>, transform_indices = @transform_21, window_bounds = array<i64: 32, 4>}, {pipeline_mode = #tpu.pipeline_mode<synchronous>, transform_indices = @transform_22, window_bounds = array<i64: 1, 4>}, {transform_indices = @transform_23, window_bounds = array<i64: 1, 1, 4>}]} {
    %c0 = arith.constant 0 : index
    %c0_0 = arith.constant 0 : index
    %c0_1 = arith.constant 0 : index
    %0 = vector.load %arg1[%c0, %c0_0, %c0_1] : memref<1x8x1xf32, #tpu.memory_space<vmem>>, vector<1x8x1xf32>
    %1 = vector.shape_cast %0 : vector<1x8x1xf32> to vector<8x1xf32>
    %c0_2 = arith.constant 0 : index
    %c0_3 = arith.constant 0 : index
    %2 = vector.load %arg2[%c0_2, %c0_3] : memref<1x32xf32, #tpu.memory_space<vmem>>, vector<1x32xf32>
    %3 = vector.broadcast %1 : vector<8x1xf32> to vector<8x32xf32>
    %4 = vector.broadcast %2 : vector<1x32xf32> to vector<8x32xf32>
    %5 = arith.mulf %3, %4 : vector<8x32xf32>
    %c0_4 = arith.constant 0 : index
    %c0_5 = arith.constant 0 : index
    %6 = vector.load %arg3[%c0_4, %c0_5] : memref<1x32xf32, #tpu.memory_space<vmem>>, vector<1x32xf32>
    %7 = vector.broadcast %6 : vector<1x32xf32> to vector<8x32xf32>
    %8 = arith.addf %5, %7 : vector<8x32xf32>
    %9 = vector.shape_cast %8 : vector<8x32xf32> to vector<1x8x32xf32>
    %10 = vector.broadcast %9 : vector<1x8x32xf32> to vector<4x8x32xf32>
    %c0_6 = arith.constant 0 : index
    %c0_7 = arith.constant 0 : index
    %c0_8 = arith.constant 0 : index
    %c0_9 = arith.constant 0 : index
    %11 = vector.load %arg4[%c0_6, %c0_7, %c0_8, %c0_9] : memref<2x4x32x8xf32, #tpu.memory_space<vmem>>, vector<1x4x32x8xf32>
    %12 = vector.shape_cast %11 : vector<1x4x32x8xf32> to vector<4x32x8xf32>
    "tpu.trace_start"() <{level = 10 : i32, message = "hsd,hdk->hsk"}> : () -> ()
    %cst = arith.constant dense<0.000000e+00> : vector<4x8x8xf32>
    %13 = tpu.matmul %10, %12, %cst {dimension_numbers = #tpu.dot_dimension_numbers<[2], [1], [1], [2], [0, 0, 0, 1, 1, 2], [0], [0]>} : vector<4x8x32xf32>, vector<4x32x8xf32>, vector<4x8x8xf32> -> vector<4x8x8xf32>
    "tpu.trace_stop"() : () -> ()
    %c0_10 = arith.constant 0 : index
    %c0_11 = arith.constant 0 : index
    %c0_12 = arith.constant 0 : index
    %c0_13 = arith.constant 0 : index
    %14 = vector.load %arg5[%c0_10, %c0_11, %c0_12, %c0_13] : memref<2x4x1x8xf32, #tpu.memory_space<vmem>>, vector<1x4x1x8xf32>
    %15 = vector.shape_cast %14 : vector<1x4x1x8xf32> to vector<4x1x8xf32>
    %16 = vector.broadcast %15 : vector<4x1x8xf32> to vector<4x8x8xf32>
    %17 = arith.addf %13, %16 : vector<4x8x8xf32>
    %c0_14 = arith.constant 0 : index
    %c0_15 = arith.constant 0 : index
    %c0_16 = arith.constant 0 : index
    %c0_17 = arith.constant 0 : index
    %18 = vector.load %arg6[%c0_14, %c0_15, %c0_16, %c0_17] : memref<2x4x32x8xf32, #tpu.memory_space<vmem>>, vector<1x4x32x8xf32>
    %19 = vector.shape_cast %18 : vector<1x4x32x8xf32> to vector<4x32x8xf32>
    "tpu.trace_start"() <{level = 10 : i32, message = "hsd,hdk->hsk"}> : () -> ()
    %cst_18 = arith.constant dense<0.000000e+00> : vector<4x8x8xf32>
    %20 = tpu.matmul %10, %19, %cst_18 {dimension_numbers = #tpu.dot_dimension_numbers<[2], [1], [1], [2], [0, 0, 0, 1, 1, 2], [0], [0]>} : vector<4x8x32xf32>, vector<4x32x8xf32>, vector<4x8x8xf32> -> vector<4x8x8xf32>
    "tpu.trace_stop"() : () -> ()
    %c0_19 = arith.constant 0 : index
    %c0_20 = arith.constant 0 : index
    %c0_21 = arith.constant 0 : index
    %c0_22 = arith.constant 0 : index
    %21 = vector.load %arg7[%c0_19, %c0_20, %c0_21, %c0_22] : memref<2x4x1x8xf32, #tpu.memory_space<vmem>>, vector<1x4x1x8xf32>
    %22 = vector.shape_cast %21 : vector<1x4x1x8xf32> to vector<4x1x8xf32>
    %23 = vector.broadcast %22 : vector<4x1x8xf32> to vector<4x8x8xf32>
    %24 = arith.addf %20, %23 : vector<4x8x8xf32>
    %c0_23 = arith.constant 0 : index
    %c0_24 = arith.constant 0 : index
    %c0_25 = arith.constant 0 : index
    %c0_26 = arith.constant 0 : index
    %25 = vector.load %arg8[%c0_23, %c0_24, %c0_25, %c0_26] : memref<2x4x32x8xf32, #tpu.memory_space<vmem>>, vector<1x4x32x8xf32>
    %26 = vector.shape_cast %25 : vector<1x4x32x8xf32> to vector<4x32x8xf32>
    "tpu.trace_start"() <{level = 10 : i32, message = "hsd,hdk->hsk"}> : () -> ()
    %cst_27 = arith.constant dense<0.000000e+00> : vector<4x8x8xf32>
    %27 = tpu.matmul %10, %26, %cst_27 {dimension_numbers = #tpu.dot_dimension_numbers<[2], [1], [1], [2], [0, 0, 0, 1, 1, 2], [0], [0]>} : vector<4x8x32xf32>, vector<4x32x8xf32>, vector<4x8x8xf32> -> vector<4x8x8xf32>
    "tpu.trace_stop"() : () -> ()
    %c0_28 = arith.constant 0 : index
    %c0_29 = arith.constant 0 : index
    %c0_30 = arith.constant 0 : index
    %c0_31 = arith.constant 0 : index
    %28 = vector.load %arg9[%c0_28, %c0_29, %c0_30, %c0_31] : memref<2x4x1x8xf32, #tpu.memory_space<vmem>>, vector<1x4x1x8xf32>
    %29 = vector.shape_cast %28 : vector<1x4x1x8xf32> to vector<4x1x8xf32>
    %30 = vector.broadcast %29 : vector<4x1x8xf32> to vector<4x8x8xf32>
    %31 = arith.addf %27, %30 : vector<4x8x8xf32>
    "tpu.trace_start"() <{level = 10 : i32, message = "hqk,htk->hqt"}> : () -> ()
    %cst_32 = arith.constant dense<0.000000e+00> : vector<4x8x8xf32>
    %32 = tpu.matmul %17, %24, %cst_32 {dimension_numbers = #tpu.dot_dimension_numbers<[2], [2], [1], [1], [0, 0, 0, 1, 1, 1], [0], [0]>} : vector<4x8x8xf32>, vector<4x8x8xf32>, vector<4x8x8xf32> -> vector<4x8x8xf32>
    "tpu.trace_stop"() : () -> ()
    %cst_33 = arith.constant dense<0xFF800000> : vector<4x8xf32>
    %33 = vector.multi_reduction <maximumf>, %32, %cst_33 [2] : vector<4x8x8xf32> to vector<4x8xf32>
    %34 = vector.shape_cast %33 : vector<4x8xf32> to vector<4x8x1xf32>
    %35 = vector.broadcast %34 : vector<4x8x1xf32> to vector<4x8x8xf32>
    %36 = arith.subf %32, %35 : vector<4x8x8xf32>
    %37 = math.exp %36 : vector<4x8x8xf32>
    %cst_34 = arith.constant dense<0.000000e+00> : vector<4x8xf32>
    %38 = vector.multi_reduction <add>, %37, %cst_34 [2] : vector<4x8x8xf32> to vector<4x8xf32>
    %39 = vector.shape_cast %38 : vector<4x8xf32> to vector<4x8x1xf32>
    %40 = vector.broadcast %39 : vector<4x8x1xf32> to vector<4x8x8xf32>
    %41 = arith.divf %37, %40 : vector<4x8x8xf32>
    "tpu.trace_start"() <{level = 10 : i32, message = "hqt,htk->hqk"}> : () -> ()
    %cst_35 = arith.constant dense<0.000000e+00> : vector<4x8x8xf32>
    %42 = tpu.matmul %41, %31, %cst_35 {dimension_numbers = #tpu.dot_dimension_numbers<[2], [1], [1], [2], [0, 0, 0, 1, 1, 2], [0], [0]>} : vector<4x8x8xf32>, vector<4x8x8xf32>, vector<4x8x8xf32> -> vector<4x8x8xf32>
    "tpu.trace_stop"() : () -> ()
    %c0_36 = arith.constant 0 : index
    %c0_37 = arith.constant 0 : index
    %c0_38 = arith.constant 0 : index
    %c0_39 = arith.constant 0 : index
    %43 = vector.load %arg10[%c0_36, %c0_37, %c0_38, %c0_39] : memref<2x4x8x32xf32, #tpu.memory_space<vmem>>, vector<1x4x8x32xf32>
    %44 = vector.shape_cast %43 : vector<1x4x8x32xf32> to vector<4x8x32xf32>
    "tpu.trace_start"() <{level = 10 : i32, message = "hsk,hkd->hsd"}> : () -> ()
    %cst_40 = arith.constant dense<0.000000e+00> : vector<4x8x32xf32>
    %45 = tpu.matmul %42, %44, %cst_40 {dimension_numbers = #tpu.dot_dimension_numbers<[2], [1], [1], [2], [0, 0, 0, 1, 1, 2], [0], [0]>} : vector<4x8x8xf32>, vector<4x8x32xf32>, vector<4x8x32xf32> -> vector<4x8x32xf32>
    "tpu.trace_stop"() : () -> ()
    %cst_41 = arith.constant dense<0.000000e+00> : vector<8x32xf32>
    %46 = vector.multi_reduction <add>, %45, %cst_41 [0] : vector<4x8x32xf32> to vector<8x32xf32>
    %c0_42 = arith.constant 0 : index
    %c0_43 = arith.constant 0 : index
    %c0_44 = arith.constant 0 : index
    %47 = vector.load %arg11[%c0_42, %c0_43, %c0_44] : memref<2x1x32xf32, #tpu.memory_space<vmem>>, vector<1x1x32xf32>
    %48 = vector.shape_cast %47 : vector<1x1x32xf32> to vector<1x32xf32>
    %49 = vector.broadcast %48 : vector<1x32xf32> to vector<8x32xf32>
    %50 = arith.addf %46, %49 : vector<8x32xf32>
    %51 = arith.addf %8, %50 : vector<8x32xf32>
    %c0_45 = arith.constant 0 : index
    %c0_46 = arith.constant 0 : index
    %c0_47 = arith.constant 0 : index
    %52 = vector.load %arg12[%c0_45, %c0_46, %c0_47] : memref<2x1x32xf32, #tpu.memory_space<vmem>>, vector<1x1x32xf32>
    %53 = vector.shape_cast %52 : vector<1x1x32xf32> to vector<1x32xf32>
    %c0_48 = arith.constant 0 : index
    %c0_49 = arith.constant 0 : index
    %c0_50 = arith.constant 0 : index
    %54 = vector.load %arg13[%c0_48, %c0_49, %c0_50] : memref<2x1x32xf32, #tpu.memory_space<vmem>>, vector<1x1x32xf32>
    %55 = vector.shape_cast %54 : vector<1x1x32xf32> to vector<1x32xf32>
    %cst_51 = arith.constant dense<0.000000e+00> : vector<8xf32>
    %56 = vector.multi_reduction <add>, %51, %cst_51 [1] : vector<8x32xf32> to vector<8xf32>
    %57 = vector.shape_cast %56 : vector<8xf32> to vector<8x1xf32>
    %cst_52 = arith.constant 3.200000e+01 : f32
    %58 = vector.broadcast %cst_52 : f32 to vector<8x1xf32>
    %59 = arith.divf %57, %58 : vector<8x1xf32>
    %60 = vector.broadcast %59 : vector<8x1xf32> to vector<8x32xf32>
    %61 = arith.subf %51, %60 : vector<8x32xf32>
    %62 = arith.mulf %61, %61 : vector<8x32xf32>
    %cst_53 = arith.constant dense<0.000000e+00> : vector<8xf32>
    %63 = vector.multi_reduction <add>, %62, %cst_53 [1] : vector<8x32xf32> to vector<8xf32>
    %64 = vector.shape_cast %63 : vector<8xf32> to vector<8x1xf32>
    %cst_54 = arith.constant 3.200000e+01 : f32
    %65 = vector.broadcast %cst_54 : f32 to vector<8x1xf32>
    %66 = arith.divf %64, %65 : vector<8x1xf32>
    %67 = vector.broadcast %59 : vector<8x1xf32> to vector<8x32xf32>
    %68 = arith.subf %51, %67 : vector<8x32xf32>
    %cst_55 = arith.constant 9.99999974E-6 : f32
    %69 = vector.broadcast %cst_55 : f32 to vector<8x1xf32>
    %70 = arith.addf %66, %69 : vector<8x1xf32>
    %71 = math.rsqrt %70 : vector<8x1xf32>
    %72 = vector.broadcast %71 : vector<8x1xf32> to vector<8x32xf32>
    %73 = arith.mulf %68, %72 : vector<8x32xf32>
    %74 = vector.broadcast %53 : vector<1x32xf32> to vector<8x32xf32>
    %75 = arith.mulf %73, %74 : vector<8x32xf32>
    %76 = vector.broadcast %55 : vector<1x32xf32> to vector<8x32xf32>
    %77 = arith.addf %75, %76 : vector<8x32xf32>
    %c0_56 = arith.constant 0 : index
    %c0_57 = arith.constant 0 : index
    %c0_58 = arith.constant 0 : index
    %78 = vector.load %arg14[%c0_56, %c0_57, %c0_58] : memref<2x32x2048xf32, #tpu.memory_space<vmem>>, vector<1x32x2048xf32>
    %79 = vector.shape_cast %78 : vector<1x32x2048xf32> to vector<32x2048xf32>
    %cst_59 = arith.constant dense<0.000000e+00> : vector<8x2048xf32>
    %80 = tpu.matmul %77, %79, %cst_59 {dimension_numbers = #tpu.dot_dimension_numbers<[1], [0], [0], [1], [0, 0, 1, 1], [], []>} : vector<8x32xf32>, vector<32x2048xf32>, vector<8x2048xf32> -> vector<8x2048xf32>
    %c0_60 = arith.constant 0 : index
    %c0_61 = arith.constant 0 : index
    %c0_62 = arith.constant 0 : index
    %81 = vector.load %arg15[%c0_60, %c0_61, %c0_62] : memref<2x1x2048xf32, #tpu.memory_space<vmem>>, vector<1x1x2048xf32>
    %82 = vector.shape_cast %81 : vector<1x1x2048xf32> to vector<1x2048xf32>
    %83 = vector.broadcast %82 : vector<1x2048xf32> to vector<8x2048xf32>
    %84 = arith.addf %80, %83 : vector<8x2048xf32>
    %cst_63 = arith.constant 0.000000e+00 : f32
    %85 = vector.broadcast %cst_63 : f32 to vector<8x2048xf32>
    %86 = arith.maximumf %84, %85 : vector<8x2048xf32>
    %c0_64 = arith.constant 0 : index
    %c0_65 = arith.constant 0 : index
    %c0_66 = arith.constant 0 : index
    %87 = vector.load %arg16[%c0_64, %c0_65, %c0_66] : memref<2x2048x32xf32, #tpu.memory_space<vmem>>, vector<1x2048x32xf32>
    %88 = vector.shape_cast %87 : vector<1x2048x32xf32> to vector<2048x32xf32>
    %cst_67 = arith.constant dense<0.000000e+00> : vector<8x32xf32>
    %89 = tpu.matmul %86, %88, %cst_67 {dimension_numbers = #tpu.dot_dimension_numbers<[1], [0], [0], [1], [0, 0, 1, 1], [], []>} : vector<8x2048xf32>, vector<2048x32xf32>, vector<8x32xf32> -> vector<8x32xf32>
    %c0_68 = arith.constant 0 : index
    %c0_69 = arith.constant 0 : index
    %c0_70 = arith.constant 0 : index
    %90 = vector.load %arg17[%c0_68, %c0_69, %c0_70] : memref<2x1x32xf32, #tpu.memory_space<vmem>>, vector<1x1x32xf32>
    %91 = vector.shape_cast %90 : vector<1x1x32xf32> to vector<1x32xf32>
    %92 = vector.broadcast %91 : vector<1x32xf32> to vector<8x32xf32>
    %93 = arith.addf %89, %92 : vector<8x32xf32>
    %94 = arith.addf %77, %93 : vector<8x32xf32>
    %c0_71 = arith.constant 0 : index
    %c0_72 = arith.constant 0 : index
    %c0_73 = arith.constant 0 : index
    %95 = vector.load %arg18[%c0_71, %c0_72, %c0_73] : memref<2x1x32xf32, #tpu.memory_space<vmem>>, vector<1x1x32xf32>
    %96 = vector.shape_cast %95 : vector<1x1x32xf32> to vector<1x32xf32>
    %c0_74 = arith.constant 0 : index
    %c0_75 = arith.constant 0 : index
    %c0_76 = arith.constant 0 : index
    %97 = vector.load %arg19[%c0_74, %c0_75, %c0_76] : memref<2x1x32xf32, #tpu.memory_space<vmem>>, vector<1x1x32xf32>
    %98 = vector.shape_cast %97 : vector<1x1x32xf32> to vector<1x32xf32>
    %cst_77 = arith.constant dense<0.000000e+00> : vector<8xf32>
    %99 = vector.multi_reduction <add>, %94, %cst_77 [1] : vector<8x32xf32> to vector<8xf32>
    %100 = vector.shape_cast %99 : vector<8xf32> to vector<8x1xf32>
    %cst_78 = arith.constant 3.200000e+01 : f32
    %101 = vector.broadcast %cst_78 : f32 to vector<8x1xf32>
    %102 = arith.divf %100, %101 : vector<8x1xf32>
    %103 = vector.broadcast %102 : vector<8x1xf32> to vector<8x32xf32>
    %104 = arith.subf %94, %103 : vector<8x32xf32>
    %105 = arith.mulf %104, %104 : vector<8x32xf32>
    %cst_79 = arith.constant dense<0.000000e+00> : vector<8xf32>
    %106 = vector.multi_reduction <add>, %105, %cst_79 [1] : vector<8x32xf32> to vector<8xf32>
    %107 = vector.shape_cast %106 : vector<8xf32> to vector<8x1xf32>
    %cst_80 = arith.constant 3.200000e+01 : f32
    %108 = vector.broadcast %cst_80 : f32 to vector<8x1xf32>
    %109 = arith.divf %107, %108 : vector<8x1xf32>
    %110 = vector.broadcast %102 : vector<8x1xf32> to vector<8x32xf32>
    %111 = arith.subf %94, %110 : vector<8x32xf32>
    %cst_81 = arith.constant 9.99999974E-6 : f32
    %112 = vector.broadcast %cst_81 : f32 to vector<8x1xf32>
    %113 = arith.addf %109, %112 : vector<8x1xf32>
    %114 = math.rsqrt %113 : vector<8x1xf32>
    %115 = vector.broadcast %114 : vector<8x1xf32> to vector<8x32xf32>
    %116 = arith.mulf %111, %115 : vector<8x32xf32>
    %117 = vector.broadcast %96 : vector<1x32xf32> to vector<8x32xf32>
    %118 = arith.mulf %116, %117 : vector<8x32xf32>
    %119 = vector.broadcast %98 : vector<1x32xf32> to vector<8x32xf32>
    %120 = arith.addf %118, %119 : vector<8x32xf32>
    %121 = vector.shape_cast %120 : vector<8x32xf32> to vector<1x8x32xf32>
    %122 = vector.broadcast %121 : vector<1x8x32xf32> to vector<4x8x32xf32>
    %c1 = arith.constant 1 : index
    %c0_82 = arith.constant 0 : index
    %c0_83 = arith.constant 0 : index
    %c0_84 = arith.constant 0 : index
    %123 = vector.load %arg4[%c1, %c0_82, %c0_83, %c0_84] : memref<2x4x32x8xf32, #tpu.memory_space<vmem>>, vector<1x4x32x8xf32>
    %124 = vector.shape_cast %123 : vector<1x4x32x8xf32> to vector<4x32x8xf32>
    "tpu.trace_start"() <{level = 10 : i32, message = "hsd,hdk->hsk"}> : () -> ()
    %cst_85 = arith.constant dense<0.000000e+00> : vector<4x8x8xf32>
    %125 = tpu.matmul %122, %124, %cst_85 {dimension_numbers = #tpu.dot_dimension_numbers<[2], [1], [1], [2], [0, 0, 0, 1, 1, 2], [0], [0]>} : vector<4x8x32xf32>, vector<4x32x8xf32>, vector<4x8x8xf32> -> vector<4x8x8xf32>
    "tpu.trace_stop"() : () -> ()
    %c1_86 = arith.constant 1 : index
    %c0_87 = arith.constant 0 : index
    %c0_88 = arith.constant 0 : index
    %c0_89 = arith.constant 0 : index
    %126 = vector.load %arg5[%c1_86, %c0_87, %c0_88, %c0_89] : memref<2x4x1x8xf32, #tpu.memory_space<vmem>>, vector<1x4x1x8xf32>
    %127 = vector.shape_cast %126 : vector<1x4x1x8xf32> to vector<4x1x8xf32>
    %128 = vector.broadcast %127 : vector<4x1x8xf32> to vector<4x8x8xf32>
    %129 = arith.addf %125, %128 : vector<4x8x8xf32>
    %c1_90 = arith.constant 1 : index
    %c0_91 = arith.constant 0 : index
    %c0_92 = arith.constant 0 : index
    %c0_93 = arith.constant 0 : index
    %130 = vector.load %arg6[%c1_90, %c0_91, %c0_92, %c0_93] : memref<2x4x32x8xf32, #tpu.memory_space<vmem>>, vector<1x4x32x8xf32>
    %131 = vector.shape_cast %130 : vector<1x4x32x8xf32> to vector<4x32x8xf32>
    "tpu.trace_start"() <{level = 10 : i32, message = "hsd,hdk->hsk"}> : () -> ()
    %cst_94 = arith.constant dense<0.000000e+00> : vector<4x8x8xf32>
    %132 = tpu.matmul %122, %131, %cst_94 {dimension_numbers = #tpu.dot_dimension_numbers<[2], [1], [1], [2], [0, 0, 0, 1, 1, 2], [0], [0]>} : vector<4x8x32xf32>, vector<4x32x8xf32>, vector<4x8x8xf32> -> vector<4x8x8xf32>
    "tpu.trace_stop"() : () -> ()
    %c1_95 = arith.constant 1 : index
    %c0_96 = arith.constant 0 : index
    %c0_97 = arith.constant 0 : index
    %c0_98 = arith.constant 0 : index
    %133 = vector.load %arg7[%c1_95, %c0_96, %c0_97, %c0_98] : memref<2x4x1x8xf32, #tpu.memory_space<vmem>>, vector<1x4x1x8xf32>
    %134 = vector.shape_cast %133 : vector<1x4x1x8xf32> to vector<4x1x8xf32>
    %135 = vector.broadcast %134 : vector<4x1x8xf32> to vector<4x8x8xf32>
    %136 = arith.addf %132, %135 : vector<4x8x8xf32>
    %c1_99 = arith.constant 1 : index
    %c0_100 = arith.constant 0 : index
    %c0_101 = arith.constant 0 : index
    %c0_102 = arith.constant 0 : index
    %137 = vector.load %arg8[%c1_99, %c0_100, %c0_101, %c0_102] : memref<2x4x32x8xf32, #tpu.memory_space<vmem>>, vector<1x4x32x8xf32>
    %138 = vector.shape_cast %137 : vector<1x4x32x8xf32> to vector<4x32x8xf32>
    "tpu.trace_start"() <{level = 10 : i32, message = "hsd,hdk->hsk"}> : () -> ()
    %cst_103 = arith.constant dense<0.000000e+00> : vector<4x8x8xf32>
    %139 = tpu.matmul %122, %138, %cst_103 {dimension_numbers = #tpu.dot_dimension_numbers<[2], [1], [1], [2], [0, 0, 0, 1, 1, 2], [0], [0]>} : vector<4x8x32xf32>, vector<4x32x8xf32>, vector<4x8x8xf32> -> vector<4x8x8xf32>
    "tpu.trace_stop"() : () -> ()
    %c1_104 = arith.constant 1 : index
    %c0_105 = arith.constant 0 : index
    %c0_106 = arith.constant 0 : index
    %c0_107 = arith.constant 0 : index
    %140 = vector.load %arg9[%c1_104, %c0_105, %c0_106, %c0_107] : memref<2x4x1x8xf32, #tpu.memory_space<vmem>>, vector<1x4x1x8xf32>
    %141 = vector.shape_cast %140 : vector<1x4x1x8xf32> to vector<4x1x8xf32>
    %142 = vector.broadcast %141 : vector<4x1x8xf32> to vector<4x8x8xf32>
    %143 = arith.addf %139, %142 : vector<4x8x8xf32>
    "tpu.trace_start"() <{level = 10 : i32, message = "hqk,htk->hqt"}> : () -> ()
    %cst_108 = arith.constant dense<0.000000e+00> : vector<4x8x8xf32>
    %144 = tpu.matmul %129, %136, %cst_108 {dimension_numbers = #tpu.dot_dimension_numbers<[2], [2], [1], [1], [0, 0, 0, 1, 1, 1], [0], [0]>} : vector<4x8x8xf32>, vector<4x8x8xf32>, vector<4x8x8xf32> -> vector<4x8x8xf32>
    "tpu.trace_stop"() : () -> ()
    %cst_109 = arith.constant dense<0xFF800000> : vector<4x8xf32>
    %145 = vector.multi_reduction <maximumf>, %144, %cst_109 [2] : vector<4x8x8xf32> to vector<4x8xf32>
    %146 = vector.shape_cast %145 : vector<4x8xf32> to vector<4x8x1xf32>
    %147 = vector.broadcast %146 : vector<4x8x1xf32> to vector<4x8x8xf32>
    %148 = arith.subf %144, %147 : vector<4x8x8xf32>
    %149 = math.exp %148 : vector<4x8x8xf32>
    %cst_110 = arith.constant dense<0.000000e+00> : vector<4x8xf32>
    %150 = vector.multi_reduction <add>, %149, %cst_110 [2] : vector<4x8x8xf32> to vector<4x8xf32>
    %151 = vector.shape_cast %150 : vector<4x8xf32> to vector<4x8x1xf32>
    %152 = vector.broadcast %151 : vector<4x8x1xf32> to vector<4x8x8xf32>
    %153 = arith.divf %149, %152 : vector<4x8x8xf32>
    "tpu.trace_start"() <{level = 10 : i32, message = "hqt,htk->hqk"}> : () -> ()
    %cst_111 = arith.constant dense<0.000000e+00> : vector<4x8x8xf32>
    %154 = tpu.matmul %153, %143, %cst_111 {dimension_numbers = #tpu.dot_dimension_numbers<[2], [1], [1], [2], [0, 0, 0, 1, 1, 2], [0], [0]>} : vector<4x8x8xf32>, vector<4x8x8xf32>, vector<4x8x8xf32> -> vector<4x8x8xf32>
    "tpu.trace_stop"() : () -> ()
    %c1_112 = arith.constant 1 : index
    %c0_113 = arith.constant 0 : index
    %c0_114 = arith.constant 0 : index
    %c0_115 = arith.constant 0 : index
    %155 = vector.load %arg10[%c1_112, %c0_113, %c0_114, %c0_115] : memref<2x4x8x32xf32, #tpu.memory_space<vmem>>, vector<1x4x8x32xf32>
    %156 = vector.shape_cast %155 : vector<1x4x8x32xf32> to vector<4x8x32xf32>
    "tpu.trace_start"() <{level = 10 : i32, message = "hsk,hkd->hsd"}> : () -> ()
    %cst_116 = arith.constant dense<0.000000e+00> : vector<4x8x32xf32>
    %157 = tpu.matmul %154, %156, %cst_116 {dimension_numbers = #tpu.dot_dimension_numbers<[2], [1], [1], [2], [0, 0, 0, 1, 1, 2], [0], [0]>} : vector<4x8x8xf32>, vector<4x8x32xf32>, vector<4x8x32xf32> -> vector<4x8x32xf32>
    "tpu.trace_stop"() : () -> ()
    %cst_117 = arith.constant dense<0.000000e+00> : vector<8x32xf32>
    %158 = vector.multi_reduction <add>, %157, %cst_117 [0] : vector<4x8x32xf32> to vector<8x32xf32>
    %c1_118 = arith.constant 1 : index
    %c0_119 = arith.constant 0 : index
    %c0_120 = arith.constant 0 : index
    %159 = vector.load %arg11[%c1_118, %c0_119, %c0_120] : memref<2x1x32xf32, #tpu.memory_space<vmem>>, vector<1x1x32xf32>
    %160 = vector.shape_cast %159 : vector<1x1x32xf32> to vector<1x32xf32>
    %161 = vector.broadcast %160 : vector<1x32xf32> to vector<8x32xf32>
    %162 = arith.addf %158, %161 : vector<8x32xf32>
    %163 = arith.addf %120, %162 : vector<8x32xf32>
    %c1_121 = arith.constant 1 : index
    %c0_122 = arith.constant 0 : index
    %c0_123 = arith.constant 0 : index
    %164 = vector.load %arg12[%c1_121, %c0_122, %c0_123] : memref<2x1x32xf32, #tpu.memory_space<vmem>>, vector<1x1x32xf32>
    %165 = vector.shape_cast %164 : vector<1x1x32xf32> to vector<1x32xf32>
    %c1_124 = arith.constant 1 : index
    %c0_125 = arith.constant 0 : index
    %c0_126 = arith.constant 0 : index
    %166 = vector.load %arg13[%c1_124, %c0_125, %c0_126] : memref<2x1x32xf32, #tpu.memory_space<vmem>>, vector<1x1x32xf32>
    %167 = vector.shape_cast %166 : vector<1x1x32xf32> to vector<1x32xf32>
    %cst_127 = arith.constant dense<0.000000e+00> : vector<8xf32>
    %168 = vector.multi_reduction <add>, %163, %cst_127 [1] : vector<8x32xf32> to vector<8xf32>
    %169 = vector.shape_cast %168 : vector<8xf32> to vector<8x1xf32>
    %cst_128 = arith.constant 3.200000e+01 : f32
    %170 = vector.broadcast %cst_128 : f32 to vector<8x1xf32>
    %171 = arith.divf %169, %170 : vector<8x1xf32>
    %172 = vector.broadcast %171 : vector<8x1xf32> to vector<8x32xf32>
    %173 = arith.subf %163, %172 : vector<8x32xf32>
    %174 = arith.mulf %173, %173 : vector<8x32xf32>
    %cst_129 = arith.constant dense<0.000000e+00> : vector<8xf32>
    %175 = vector.multi_reduction <add>, %174, %cst_129 [1] : vector<8x32xf32> to vector<8xf32>
    %176 = vector.shape_cast %175 : vector<8xf32> to vector<8x1xf32>
    %cst_130 = arith.constant 3.200000e+01 : f32
    %177 = vector.broadcast %cst_130 : f32 to vector<8x1xf32>
    %178 = arith.divf %176, %177 : vector<8x1xf32>
    %179 = vector.broadcast %171 : vector<8x1xf32> to vector<8x32xf32>
    %180 = arith.subf %163, %179 : vector<8x32xf32>
    %cst_131 = arith.constant 9.99999974E-6 : f32
    %181 = vector.broadcast %cst_131 : f32 to vector<8x1xf32>
    %182 = arith.addf %178, %181 : vector<8x1xf32>
    %183 = math.rsqrt %182 : vector<8x1xf32>
    %184 = vector.broadcast %183 : vector<8x1xf32> to vector<8x32xf32>
    %185 = arith.mulf %180, %184 : vector<8x32xf32>
    %186 = vector.broadcast %165 : vector<1x32xf32> to vector<8x32xf32>
    %187 = arith.mulf %185, %186 : vector<8x32xf32>
    %188 = vector.broadcast %167 : vector<1x32xf32> to vector<8x32xf32>
    %189 = arith.addf %187, %188 : vector<8x32xf32>
    %c1_132 = arith.constant 1 : index
    %c0_133 = arith.constant 0 : index
    %c0_134 = arith.constant 0 : index
    %190 = vector.load %arg14[%c1_132, %c0_133, %c0_134] : memref<2x32x2048xf32, #tpu.memory_space<vmem>>, vector<1x32x2048xf32>
    %191 = vector.shape_cast %190 : vector<1x32x2048xf32> to vector<32x2048xf32>
    %cst_135 = arith.constant dense<0.000000e+00> : vector<8x2048xf32>
    %192 = tpu.matmul %189, %191, %cst_135 {dimension_numbers = #tpu.dot_dimension_numbers<[1], [0], [0], [1], [0, 0, 1, 1], [], []>} : vector<8x32xf32>, vector<32x2048xf32>, vector<8x2048xf32> -> vector<8x2048xf32>
    %c1_136 = arith.constant 1 : index
    %c0_137 = arith.constant 0 : index
    %c0_138 = arith.constant 0 : index
    %193 = vector.load %arg15[%c1_136, %c0_137, %c0_138] : memref<2x1x2048xf32, #tpu.memory_space<vmem>>, vector<1x1x2048xf32>
    %194 = vector.shape_cast %193 : vector<1x1x2048xf32> to vector<1x2048xf32>
    %195 = vector.broadcast %194 : vector<1x2048xf32> to vector<8x2048xf32>
    %196 = arith.addf %192, %195 : vector<8x2048xf32>
    %cst_139 = arith.constant 0.000000e+00 : f32
    %197 = vector.broadcast %cst_139 : f32 to vector<8x2048xf32>
    %198 = arith.maximumf %196, %197 : vector<8x2048xf32>
    %c1_140 = arith.constant 1 : index
    %c0_141 = arith.constant 0 : index
    %c0_142 = arith.constant 0 : index
    %199 = vector.load %arg16[%c1_140, %c0_141, %c0_142] : memref<2x2048x32xf32, #tpu.memory_space<vmem>>, vector<1x2048x32xf32>
    %200 = vector.shape_cast %199 : vector<1x2048x32xf32> to vector<2048x32xf32>
    %cst_143 = arith.constant dense<0.000000e+00> : vector<8x32xf32>
    %201 = tpu.matmul %198, %200, %cst_143 {dimension_numbers = #tpu.dot_dimension_numbers<[1], [0], [0], [1], [0, 0, 1, 1], [], []>} : vector<8x2048xf32>, vector<2048x32xf32>, vector<8x32xf32> -> vector<8x32xf32>
    %c1_144 = arith.constant 1 : index
    %c0_145 = arith.constant 0 : index
    %c0_146 = arith.constant 0 : index
    %202 = vector.load %arg17[%c1_144, %c0_145, %c0_146] : memref<2x1x32xf32, #tpu.memory_space<vmem>>, vector<1x1x32xf32>
    %203 = vector.shape_cast %202 : vector<1x1x32xf32> to vector<1x32xf32>
    %204 = vector.broadcast %203 : vector<1x32xf32> to vector<8x32xf32>
    %205 = arith.addf %201, %204 : vector<8x32xf32>
    %206 = arith.addf %189, %205 : vector<8x32xf32>
    %c1_147 = arith.constant 1 : index
    %c0_148 = arith.constant 0 : index
    %c0_149 = arith.constant 0 : index
    %207 = vector.load %arg18[%c1_147, %c0_148, %c0_149] : memref<2x1x32xf32, #tpu.memory_space<vmem>>, vector<1x1x32xf32>
    %208 = vector.shape_cast %207 : vector<1x1x32xf32> to vector<1x32xf32>
    %c1_150 = arith.constant 1 : index
    %c0_151 = arith.constant 0 : index
    %c0_152 = arith.constant 0 : index
    %209 = vector.load %arg19[%c1_150, %c0_151, %c0_152] : memref<2x1x32xf32, #tpu.memory_space<vmem>>, vector<1x1x32xf32>
    %210 = vector.shape_cast %209 : vector<1x1x32xf32> to vector<1x32xf32>
    %cst_153 = arith.constant dense<0.000000e+00> : vector<8xf32>
    %211 = vector.multi_reduction <add>, %206, %cst_153 [1] : vector<8x32xf32> to vector<8xf32>
    %212 = vector.shape_cast %211 : vector<8xf32> to vector<8x1xf32>
    %cst_154 = arith.constant 3.200000e+01 : f32
    %213 = vector.broadcast %cst_154 : f32 to vector<8x1xf32>
    %214 = arith.divf %212, %213 : vector<8x1xf32>
    %215 = vector.broadcast %214 : vector<8x1xf32> to vector<8x32xf32>
    %216 = arith.subf %206, %215 : vector<8x32xf32>
    %217 = arith.mulf %216, %216 : vector<8x32xf32>
    %cst_155 = arith.constant dense<0.000000e+00> : vector<8xf32>
    %218 = vector.multi_reduction <add>, %217, %cst_155 [1] : vector<8x32xf32> to vector<8xf32>
    %219 = vector.shape_cast %218 : vector<8xf32> to vector<8x1xf32>
    %cst_156 = arith.constant 3.200000e+01 : f32
    %220 = vector.broadcast %cst_156 : f32 to vector<8x1xf32>
    %221 = arith.divf %219, %220 : vector<8x1xf32>
    %222 = vector.broadcast %214 : vector<8x1xf32> to vector<8x32xf32>
    %223 = arith.subf %206, %222 : vector<8x32xf32>
    %cst_157 = arith.constant 9.99999974E-6 : f32
    %224 = vector.broadcast %cst_157 : f32 to vector<8x1xf32>
    %225 = arith.addf %221, %224 : vector<8x1xf32>
    %226 = math.rsqrt %225 : vector<8x1xf32>
    %227 = vector.broadcast %226 : vector<8x1xf32> to vector<8x32xf32>
    %228 = arith.mulf %223, %227 : vector<8x32xf32>
    %229 = vector.broadcast %208 : vector<1x32xf32> to vector<8x32xf32>
    %230 = arith.mulf %228, %229 : vector<8x32xf32>
    %231 = vector.broadcast %210 : vector<1x32xf32> to vector<8x32xf32>
    %232 = arith.addf %230, %231 : vector<8x32xf32>
    %c0_158 = arith.constant 0 : index
    %c0_159 = arith.constant 0 : index
    %233 = vector.load %arg21[%c0_158, %c0_159] : memref<1x32xf32, #tpu.memory_space<vmem>>, vector<1x32xf32>
    %234 = vector.extract_strided_slice %232 {offsets = [0, 0], sizes = [1, 32], strides = [1, 1]} : vector<8x32xf32> to vector<1x32xf32>
    %c0_160 = arith.constant 0 : index
    %c0_161 = arith.constant 0 : index
    %c0_162 = arith.constant 0 : index
    %235 = vector.load %arg20[%c0_160, %c0_161, %c0_162] : memref<8x32x32xf32, #tpu.memory_space<vmem>>, vector<1x32x32xf32>
    %236 = vector.shape_cast %235 : vector<1x32x32xf32> to vector<32x32xf32>
    %cst_163 = arith.constant dense<0.000000e+00> : vector<1x32xf32>
    %237 = tpu.matmul %234, %236, %cst_163 {dimension_numbers = #tpu.dot_dimension_numbers<[1], [0], [0], [1], [0, 0, 1, 1], [], []>} : vector<1x32xf32>, vector<32x32xf32>, vector<1x32xf32> -> vector<1x32xf32>
    %238 = arith.addf %233, %237 : vector<1x32xf32>
    %239 = vector.extract_strided_slice %232 {offsets = [1, 0], sizes = [1, 32], strides = [1, 1]} : vector<8x32xf32> to vector<1x32xf32>
    %c1_164 = arith.constant 1 : index
    %c0_165 = arith.constant 0 : index
    %c0_166 = arith.constant 0 : index
    %240 = vector.load %arg20[%c1_164, %c0_165, %c0_166] : memref<8x32x32xf32, #tpu.memory_space<vmem>>, vector<1x32x32xf32>
    %241 = vector.shape_cast %240 : vector<1x32x32xf32> to vector<32x32xf32>
    %cst_167 = arith.constant dense<0.000000e+00> : vector<1x32xf32>
    %242 = tpu.matmul %239, %241, %cst_167 {dimension_numbers = #tpu.dot_dimension_numbers<[1], [0], [0], [1], [0, 0, 1, 1], [], []>} : vector<1x32xf32>, vector<32x32xf32>, vector<1x32xf32> -> vector<1x32xf32>
    %243 = arith.addf %238, %242 : vector<1x32xf32>
    %244 = vector.extract_strided_slice %232 {offsets = [2, 0], sizes = [1, 32], strides = [1, 1]} : vector<8x32xf32> to vector<1x32xf32>
    %c2 = arith.constant 2 : index
    %c0_168 = arith.constant 0 : index
    %c0_169 = arith.constant 0 : index
    %245 = vector.load %arg20[%c2, %c0_168, %c0_169] : memref<8x32x32xf32, #tpu.memory_space<vmem>>, vector<1x32x32xf32>
    %246 = vector.shape_cast %245 : vector<1x32x32xf32> to vector<32x32xf32>
    %cst_170 = arith.constant dense<0.000000e+00> : vector<1x32xf32>
    %247 = tpu.matmul %244, %246, %cst_170 {dimension_numbers = #tpu.dot_dimension_numbers<[1], [0], [0], [1], [0, 0, 1, 1], [], []>} : vector<1x32xf32>, vector<32x32xf32>, vector<1x32xf32> -> vector<1x32xf32>
    %248 = arith.addf %243, %247 : vector<1x32xf32>
    %249 = vector.extract_strided_slice %232 {offsets = [3, 0], sizes = [1, 32], strides = [1, 1]} : vector<8x32xf32> to vector<1x32xf32>
    %c3 = arith.constant 3 : index
    %c0_171 = arith.constant 0 : index
    %c0_172 = arith.constant 0 : index
    %250 = vector.load %arg20[%c3, %c0_171, %c0_172] : memref<8x32x32xf32, #tpu.memory_space<vmem>>, vector<1x32x32xf32>
    %251 = vector.shape_cast %250 : vector<1x32x32xf32> to vector<32x32xf32>
    %cst_173 = arith.constant dense<0.000000e+00> : vector<1x32xf32>
    %252 = tpu.matmul %249, %251, %cst_173 {dimension_numbers = #tpu.dot_dimension_numbers<[1], [0], [0], [1], [0, 0, 1, 1], [], []>} : vector<1x32xf32>, vector<32x32xf32>, vector<1x32xf32> -> vector<1x32xf32>
    %253 = arith.addf %248, %252 : vector<1x32xf32>
    %254 = vector.extract_strided_slice %232 {offsets = [4, 0], sizes = [1, 32], strides = [1, 1]} : vector<8x32xf32> to vector<1x32xf32>
    %c4 = arith.constant 4 : index
    %c0_174 = arith.constant 0 : index
    %c0_175 = arith.constant 0 : index
    %255 = vector.load %arg20[%c4, %c0_174, %c0_175] : memref<8x32x32xf32, #tpu.memory_space<vmem>>, vector<1x32x32xf32>
    %256 = vector.shape_cast %255 : vector<1x32x32xf32> to vector<32x32xf32>
    %cst_176 = arith.constant dense<0.000000e+00> : vector<1x32xf32>
    %257 = tpu.matmul %254, %256, %cst_176 {dimension_numbers = #tpu.dot_dimension_numbers<[1], [0], [0], [1], [0, 0, 1, 1], [], []>} : vector<1x32xf32>, vector<32x32xf32>, vector<1x32xf32> -> vector<1x32xf32>
    %258 = arith.addf %253, %257 : vector<1x32xf32>
    %259 = vector.extract_strided_slice %232 {offsets = [5, 0], sizes = [1, 32], strides = [1, 1]} : vector<8x32xf32> to vector<1x32xf32>
    %c5 = arith.constant 5 : index
    %c0_177 = arith.constant 0 : index
    %c0_178 = arith.constant 0 : index
    %260 = vector.load %arg20[%c5, %c0_177, %c0_178] : memref<8x32x32xf32, #tpu.memory_space<vmem>>, vector<1x32x32xf32>
    %261 = vector.shape_cast %260 : vector<1x32x32xf32> to vector<32x32xf32>
    %cst_179 = arith.constant dense<0.000000e+00> : vector<1x32xf32>
    %262 = tpu.matmul %259, %261, %cst_179 {dimension_numbers = #tpu.dot_dimension_numbers<[1], [0], [0], [1], [0, 0, 1, 1], [], []>} : vector<1x32xf32>, vector<32x32xf32>, vector<1x32xf32> -> vector<1x32xf32>
    %263 = arith.addf %258, %262 : vector<1x32xf32>
    %264 = vector.extract_strided_slice %232 {offsets = [6, 0], sizes = [1, 32], strides = [1, 1]} : vector<8x32xf32> to vector<1x32xf32>
    %c6 = arith.constant 6 : index
    %c0_180 = arith.constant 0 : index
    %c0_181 = arith.constant 0 : index
    %265 = vector.load %arg20[%c6, %c0_180, %c0_181] : memref<8x32x32xf32, #tpu.memory_space<vmem>>, vector<1x32x32xf32>
    %266 = vector.shape_cast %265 : vector<1x32x32xf32> to vector<32x32xf32>
    %cst_182 = arith.constant dense<0.000000e+00> : vector<1x32xf32>
    %267 = tpu.matmul %264, %266, %cst_182 {dimension_numbers = #tpu.dot_dimension_numbers<[1], [0], [0], [1], [0, 0, 1, 1], [], []>} : vector<1x32xf32>, vector<32x32xf32>, vector<1x32xf32> -> vector<1x32xf32>
    %268 = arith.addf %263, %267 : vector<1x32xf32>
    %269 = vector.extract_strided_slice %232 {offsets = [7, 0], sizes = [1, 32], strides = [1, 1]} : vector<8x32xf32> to vector<1x32xf32>
    %c7 = arith.constant 7 : index
    %c0_183 = arith.constant 0 : index
    %c0_184 = arith.constant 0 : index
    %270 = vector.load %arg20[%c7, %c0_183, %c0_184] : memref<8x32x32xf32, #tpu.memory_space<vmem>>, vector<1x32x32xf32>
    %271 = vector.shape_cast %270 : vector<1x32x32xf32> to vector<32x32xf32>
    %cst_185 = arith.constant dense<0.000000e+00> : vector<1x32xf32>
    %272 = tpu.matmul %269, %271, %cst_185 {dimension_numbers = #tpu.dot_dimension_numbers<[1], [0], [0], [1], [0, 0, 1, 1], [], []>} : vector<1x32xf32>, vector<32x32xf32>, vector<1x32xf32> -> vector<1x32xf32>
    %273 = arith.addf %268, %272 : vector<1x32xf32>
    %cst_186 = arith.constant 0.000000e+00 : f32
    %274 = vector.broadcast %cst_186 : f32 to vector<1x32xf32>
    %275 = arith.maximumf %273, %274 : vector<1x32xf32>
    %c0_187 = arith.constant 0 : index
    %c0_188 = arith.constant 0 : index
    %276 = vector.load %arg22[%c0_187, %c0_188] : memref<32x4xf32, #tpu.memory_space<vmem>>, vector<32x4xf32>
    %cst_189 = arith.constant dense<0.000000e+00> : vector<1x4xf32>
    %277 = tpu.matmul %275, %276, %cst_189 {dimension_numbers = #tpu.dot_dimension_numbers<[1], [0], [0], [1], [0, 0, 1, 1], [], []>} : vector<1x32xf32>, vector<32x4xf32>, vector<1x4xf32> -> vector<1x4xf32>
    %c0_190 = arith.constant 0 : index
    %c0_191 = arith.constant 0 : index
    %278 = vector.load %arg23[%c0_190, %c0_191] : memref<1x4xf32, #tpu.memory_space<vmem>>, vector<1x4xf32>
    %279 = arith.addf %277, %278 : vector<1x4xf32>
    %280 = arith.negf %279 : vector<1x4xf32>
    %281 = math.exp %280 : vector<1x4xf32>
    %cst_192 = arith.constant 1.000000e+00 : f32
    %282 = vector.broadcast %cst_192 : f32 to vector<1x4xf32>
    %283 = arith.addf %282, %281 : vector<1x4xf32>
    %284 = arith.divf %282, %283 : vector<1x4xf32>
    %c0_193 = arith.constant 0 : index
    %c0_194 = arith.constant 0 : index
    %c0_195 = arith.constant 0 : index
    %285 = vector.load %arg24[%c0_193, %c0_194, %c0_195] : memref<1x1x4xf32, #tpu.memory_space<vmem>>, vector<1x1x4xf32>
    %286 = vector.shape_cast %285 : vector<1x1x4xf32> to vector<1x4xf32>
    %287 = vector.shape_cast %284 : vector<1x4xf32> to vector<1x1x4xf32>
    tpu.vector_store %arg24[%c0_193, %c0_194, %c0_195], %287 {strides = array<i32>} : memref<1x1x4xf32, #tpu.memory_space<vmem>>, vector<1x1x4xf32>,
    return
  }
  func.func @transform_0(%arg0: i32) -> (i32, i32, i32) {
    %c0_i32 = arith.constant 0 : i32
    %c0_i32_0 = arith.constant 0 : i32
    %c0_i32_1 = arith.constant 0 : i32
    return %arg0, %c0_i32, %c0_i32_0 : i32, i32, i32
  }
  func.func @transform_1(%arg0: i32) -> (i32, i32) {
    %c0_i32 = arith.constant 0 : i32
    %c0_i32_0 = arith.constant 0 : i32
    %c0_i32_1 = arith.constant 0 : i32
    return %c0_i32, %c0_i32_0 : i32, i32
  }
  func.func @transform_2(%arg0: i32) -> (i32, i32) {
    %c0_i32 = arith.constant 0 : i32
    %c0_i32_0 = arith.constant 0 : i32
    %c0_i32_1 = arith.constant 0 : i32
    return %c0_i32, %c0_i32_0 : i32, i32
  }
  func.func @transform_3(%arg0: i32) -> (i32, i32, i32, i32) {
    %c0_i32 = arith.constant 0 : i32
    %c0_i32_0 = arith.constant 0 : i32
    %c0_i32_1 = arith.constant 0 : i32
    %c0_i32_2 = arith.constant 0 : i32
    %c0_i32_3 = arith.constant 0 : i32
    return %c0_i32, %c0_i32_0, %c0_i32_1, %c0_i32_2 : i32, i32, i32, i32
  }
  func.func @transform_4(%arg0: i32) -> (i32, i32, i32, i32) {
    %c0_i32 = arith.constant 0 : i32
    %c0_i32_0 = arith.constant 0 : i32
    %c0_i32_1 = arith.constant 0 : i32
    %c0_i32_2 = arith.constant 0 : i32
    %c0_i32_3 = arith.constant 0 : i32
    return %c0_i32, %c0_i32_0, %c0_i32_1, %c0_i32_2 : i32, i32, i32, i32
  }
  func.func @transform_5(%arg0: i32) -> (i32, i32, i32, i32) {
    %c0_i32 = arith.constant 0 : i32
    %c0_i32_0 = arith.constant 0 : i32
    %c0_i32_1 = arith.constant 0 : i32
    %c0_i32_2 = arith.constant 0 : i32
    %c0_i32_3 = arith.constant 0 : i32
    return %c0_i32, %c0_i32_0, %c0_i32_1, %c0_i32_2 : i32, i32, i32, i32
  }
  func.func @transform_6(%arg0: i32) -> (i32, i32, i32, i32) {
    %c0_i32 = arith.constant 0 : i32
    %c0_i32_0 = arith.constant 0 : i32
    %c0_i32_1 = arith.constant 0 : i32
    %c0_i32_2 = arith.constant 0 : i32
    %c0_i32_3 = arith.constant 0 : i32
    return %c0_i32, %c0_i32_0, %c0_i32_1, %c0_i32_2 : i32, i32, i32, i32
  }
  func.func @transform_7(%arg0: i32) -> (i32, i32, i32, i32) {
    %c0_i32 = arith.constant 0 : i32
    %c0_i32_0 = arith.constant 0 : i32
    %c0_i32_1 = arith.constant 0 : i32
    %c0_i32_2 = arith.constant 0 : i32
    %c0_i32_3 = arith.constant 0 : i32
    return %c0_i32, %c0_i32_0, %c0_i32_1, %c0_i32_2 : i32, i32, i32, i32
  }
  func.func @transform_8(%arg0: i32) -> (i32, i32, i32, i32) {
    %c0_i32 = arith.constant 0 : i32
    %c0_i32_0 = arith.constant 0 : i32
    %c0_i32_1 = arith.constant 0 : i32
    %c0_i32_2 = arith.constant 0 : i32
    %c0_i32_3 = arith.constant 0 : i32
    return %c0_i32, %c0_i32_0, %c0_i32_1, %c0_i32_2 : i32, i32, i32, i32
  }
  func.func @transform_9(%arg0: i32) -> (i32, i32, i32, i32) {
    %c0_i32 = arith.constant 0 : i32
    %c0_i32_0 = arith.constant 0 : i32
    %c0_i32_1 = arith.constant 0 : i32
    %c0_i32_2 = arith.constant 0 : i32
    %c0_i32_3 = arith.constant 0 : i32
    return %c0_i32, %c0_i32_0, %c0_i32_1, %c0_i32_2 : i32, i32, i32, i32
  }
  func.func @transform_10(%arg0: i32) -> (i32, i32, i32) {
    %c0_i32 = arith.constant 0 : i32
    %c0_i32_0 = arith.constant 0 : i32
    %c0_i32_1 = arith.constant 0 : i32
    %c0_i32_2 = arith.constant 0 : i32
    return %c0_i32, %c0_i32_0, %c0_i32_1 : i32, i32, i32
  }
  func.func @transform_11(%arg0: i32) -> (i32, i32, i32) {
    %c0_i32 = arith.constant 0 : i32
    %c0_i32_0 = arith.constant 0 : i32
    %c0_i32_1 = arith.constant 0 : i32
    %c0_i32_2 = arith.constant 0 : i32
    return %c0_i32, %c0_i32_0, %c0_i32_1 : i32, i32, i32
  }
  func.func @transform_12(%arg0: i32) -> (i32, i32, i32) {
    %c0_i32 = arith.constant 0 : i32
    %c0_i32_0 = arith.constant 0 : i32
    %c0_i32_1 = arith.constant 0 : i32
    %c0_i32_2 = arith.constant 0 : i32
    return %c0_i32, %c0_i32_0, %c0_i32_1 : i32, i32, i32
  }
  func.func @transform_13(%arg0: i32) -> (i32, i32, i32) {
    %c0_i32 = arith.constant 0 : i32
    %c0_i32_0 = arith.constant 0 : i32
    %c0_i32_1 = arith.constant 0 : i32
    %c0_i32_2 = arith.constant 0 : i32
    return %c0_i32, %c0_i32_0, %c0_i32_1 : i32, i32, i32
  }
  func.func @transform_14(%arg0: i32) -> (i32, i32, i32) {
    %c0_i32 = arith.constant 0 : i32
    %c0_i32_0 = arith.constant 0 : i32
    %c0_i32_1 = arith.constant 0 : i32
    %c0_i32_2 = arith.constant 0 : i32
    return %c0_i32, %c0_i32_0, %c0_i32_1 : i32, i32, i32
  }
  func.func @transform_15(%arg0: i32) -> (i32, i32, i32) {
    %c0_i32 = arith.constant 0 : i32
    %c0_i32_0 = arith.constant 0 : i32
    %c0_i32_1 = arith.constant 0 : i32
    %c0_i32_2 = arith.constant 0 : i32
    return %c0_i32, %c0_i32_0, %c0_i32_1 : i32, i32, i32
  }
  func.func @transform_16(%arg0: i32) -> (i32, i32, i32) {
    %c0_i32 = arith.constant 0 : i32
    %c0_i32_0 = arith.constant 0 : i32
    %c0_i32_1 = arith.constant 0 : i32
    %c0_i32_2 = arith.constant 0 : i32
    return %c0_i32, %c0_i32_0, %c0_i32_1 : i32, i32, i32
  }
  func.func @transform_17(%arg0: i32) -> (i32, i32, i32) {
    %c0_i32 = arith.constant 0 : i32
    %c0_i32_0 = arith.constant 0 : i32
    %c0_i32_1 = arith.constant 0 : i32
    %c0_i32_2 = arith.constant 0 : i32
    return %c0_i32, %c0_i32_0, %c0_i32_1 : i32, i32, i32
  }
  func.func @transform_18(%arg0: i32) -> (i32, i32, i32) {
    %c0_i32 = arith.constant 0 : i32
    %c0_i32_0 = arith.constant 0 : i32
    %c0_i32_1 = arith.constant 0 : i32
    %c0_i32_2 = arith.constant 0 : i32
    return %c0_i32, %c0_i32_0, %c0_i32_1 : i32, i32, i32
  }
  func.func @transform_19(%arg0: i32) -> (i32, i32, i32) {
    %c0_i32 = arith.constant 0 : i32
    %c0_i32_0 = arith.constant 0 : i32
    %c0_i32_1 = arith.constant 0 : i32
    %c0_i32_2 = arith.constant 0 : i32
    return %c0_i32, %c0_i32_0, %c0_i32_1 : i32, i32, i32
  }
  func.func @transform_20(%arg0: i32) -> (i32, i32) {
    %c0_i32 = arith.constant 0 : i32
    %c0_i32_0 = arith.constant 0 : i32
    %c0_i32_1 = arith.constant 0 : i32
    return %c0_i32, %c0_i32_0 : i32, i32
  }
  func.func @transform_21(%arg0: i32) -> (i32, i32) {
    %c0_i32 = arith.constant 0 : i32
    %c0_i32_0 = arith.constant 0 : i32
    %c0_i32_1 = arith.constant 0 : i32
    return %c0_i32, %c0_i32_0 : i32, i32
  }
  func.func @transform_22(%arg0: i32) -> (i32, i32) {
    %c0_i32 = arith.constant 0 : i32
    %c0_i32_0 = arith.constant 0 : i32
    %c0_i32_1 = arith.constant 0 : i32
    return %c0_i32, %c0_i32_0 : i32, i32
  }
  func.func @transform_23(%arg0: i32) -> (i32, i32, i32) {
    %c0_i32 = arith.constant 0 : i32
    %c0_i32_0 = arith.constant 0 : i32
    %c0_i32_1 = arith.constant 0 : i32
    return %arg0, %c0_i32, %c0_i32_0 : i32, i32, i32
  }
}

</mosaic_0001>

<bundles_post_ra>
// kernel: tpu_custom_call.1
= control target key start
LH: loop header
LB: loop body
LE: loop exit
PB: predicated region body
PF: predicated region fallthrough
CT: control target
= control target key end

     0   :  { %s14686_s0 = inlined_call_operand.vmem [shape: f32[2,8,1], index: 0, kind: input, shape index: {}]   ;;  %s14687_s1 = inlined_call_operand.vmem [shape: f32[1,32], index: 1, kind: input, shape index: {}]   ;;  %s14688_s2 = inlined_call_operand.vmem [shape: f32[1,32], index: 2, kind: input, shape index: {}]   ;;  %s14689_s3 = inlined_call_operand.vmem [shape: f32[2,4,32,8], index: 3, kind: input, shape index: {}]   ;;  %s14690_s4 = inlined_call_operand.vmem [shape: f32[2,4,1,8], index: 4, kind: input, shape index: {}]   ;;  %s14691_s5 = inlined_call_operand.vmem [shape: f32[2,4,32,8], index: 5, kind: input, shape index: {}]   ;;  %s14692_s6 = inlined_call_operand.vmem [shape: f32[2,4,1,8], index: 6, kind: input, shape index: {}]   ;;  %s14693_s7 = inlined_call_operand.vmem [shape: f32[2,4,32,8], index: 7, kind: input, shape index: {}]   ;;  %s14694_s8 = inlined_call_operand.vmem [shape: f32[2,4,1,8], index: 8, kind: input, shape index: {}]   ;;  %s14695_s9 = inlined_call_operand.vmem [shape: f32[2,4,8,32], index: 9, kind: input, shape index: {}]   ;;  %s14696_s10 = inlined_call_operand.vmem [shape: f32[2,1,32], index: 10, kind: input, shape index: {}]   ;;  %s14697_s11 = inlined_call_operand.vmem [shape: f32[2,1,32], index: 11, kind: input, shape index: {}]   ;;  %s14698_s12 = inlined_call_operand.vmem [shape: f32[2,1,32], index: 12, kind: input, shape index: {}]   ;;  %s14699_s13 = inlined_call_operand.vmem [shape: f32[2,32,2048], index: 13, kind: input, shape index: {}]   ;;  %s14700_s14 = inlined_call_operand.vmem [shape: f32[2,1,2048], index: 14, kind: input, shape index: {}]   ;;  %s14701_s15 = inlined_call_operand.vmem [shape: f32[2,2048,32], index: 15, kind: input, shape index: {}]   ;;  %s14702_s16 = inlined_call_operand.vmem [shape: f32[2,1,32], index: 16, kind: input, shape index: {}]   ;;  %s14703_s17 = inlined_call_operand.vmem [shape: f32[2,1,32], index: 17, kind: input, shape index: {}]   ;;  %s14704_s18 = inlined_call_operand.vmem [shape: f32[2,1,32], index: 18, kind: input, shape index: {}]   ;;  %s14705_s19 = inlined_call_operand.vmem [shape: f32[8,32,32], index: 19, kind: input, shape index: {}]   ;;  %s14706_s20 = inlined_call_operand.vmem [shape: f32[1,32], index: 20, kind: input, shape index: {}]   ;;  %s14707_s21 = inlined_call_operand.vmem [shape: f32[32,4], index: 21, kind: input, shape index: {}]   ;;  %s14708_s22 = inlined_call_operand.vmem [shape: f32[1,4], index: 22, kind: input, shape index: {}]   ;;  %s14709_s23 = inlined_call_operand.hbm [shape: f32[2,1,4], index: 23, kind: output, shape index: {}]  }
   0x1   :  { %14728 = sst [smem:[#allocation14_spill]] %s14686_s0 }
   0x2   :  { %14729 = sst [smem:[#allocation15_spill]] %s14687_s1 }
   0x3   :  { %14730 = sst [smem:[#allocation16_spill]] %s14688_s2 }
   0x4   :  { %14731 = sst [smem:[#allocation17_spill]] %s14689_s3 }
   0x5   :  { %14732 = sst [smem:[#allocation18_spill]] %s14690_s4 }
   0x6   :  { %14733 = sst [smem:[#allocation19_spill]] %s14691_s5 }
   0x7   :  { %14734 = sst [smem:[#allocation20_spill]] %s14692_s6 }
   0x8   :  { %14735 = sst [smem:[#allocation21_spill]] %s14693_s7 }
   0x9   :  { %14736 = sst [smem:[#allocation22_spill]] %s14708_s22 }
   0xa   :  { %14737 = sst [smem:[#allocation23_spill]] %s14709_s23 }
   0xb   :  { %28 = vsyncpa [#allocation3], 0 }
   0xc   :  { %30 = vsyncpa [#allocation3 + $0x1], 0  ;;  %s11555_s4 = smov 0   ;;  %s11557_s30 = smov 0  }
   0xd   :  { %s11559_s24 = smov 0   ;;  %s11561_s25 = smov 0  }
   0xe LB: > { %14738 = sst [smem:[#allocation5_spill]] %s11416_s4  ;;  %s11576_s5 = sadd.s32 4294967295, %s11428_s25   ;;  %s11428_s25 = sphi %s11561_s25, %s14766_s25   ;;  %s11424_s24 = sphi %s11559_s24, %s14769_s24   ;;  %s11420_s30 = sphi %s11557_s30, %s14768_s30   ;;  %s11416_s4 = sphi %s11555_s4, %s14767_s4  }
   0xf   : > { %14739 = sst [smem:[#allocation6_spill]] %s11420_s30  ;;  %s8621_s1 = sadd.s32 4294967294, %s11428_s25  }
  0x10   : > { %14740 = sst [smem:[#allocation7_spill]] %s11424_s24  ;;  %s11580_s26 = sadd.s32 1, %s11428_s25  }
  0x11   : > { %14741 = sst [smem:[#allocation8_spill]] %s11428_s25  ;;  %s531_s2 = sadd.s32 1, %s11424_s24 }
  0x12   : > { %14742 = sst [smem:[#allocation9_spill]] %s11576_s5  ;;  %s528_s6 = ssub.s32 %s11428_s25, %s11580_s26 }
  0x13   : > { %14743 = sst [smem:[#allocation10_spill]] %s11580_s26  ;;  %p541_p0 = scmp.ne.s32.totalorder %s11424_s24, %s11420_s30 }
  0x14   : > { %p529_p1 = scmp.eq.s32.totalorder %s528_s6, 0  ;;  %p542_p2 = scmp.eq.s32.totalorder %s11576_s5, 1 }
  0x15   : > { %p547_p3 = scmp.ne.s32.totalorder %s11420_s30, %s11416_s4  ;;  %p548_p4 = scmp.eq.s32.totalorder %s8621_s1, 1 }
  0x16   : > { %s11591_s27 = scalar_select %p529_p1, %s11424_s24, %s531_s2  }
  0x17   : > { %p11593_p5 = por %p542_p2, %p541_p0  ;;  %p11597_p6 = por %p548_p4, %p547_p3 }
  0x18   : > { %14744 = sst [smem:[#allocation11_spill]] %s11591_s27  ;;  %p8624_p7 = scmp.ge.s32.totalorder %s11428_s25, 1 }
  0x19   : > { %s14745_s7 = scalar_select %p11593_p5, 1, 0 }
  0x1a   : > { %s14747_s28 = scalar_select %p11597_p6, 1, 0 }
  0x1b   : > { %14746 = sst [smem:[#allocation12_spill]] %s14745_s7  ;;  %p639_p8 = scmp.lt.s32.totalorder %s11428_s25, 3 }
  0x1c   : > { %14748 = sst [smem:[#allocation13_spill]] %s14747_s28 }
  0x1d   : > { %p640_p9 = pnand %p8624_p7, %p639_p8 }
  0x1e   : > { %p701_p10 = scmp.lt.s32.totalorder (!%p640_p9), %s11576_s5, 1  ;;  %s14749_s0 = sld [smem:[#allocation17_spill]] (!%p640_p9)  ;;  %v11430_v3 = vmov (!%p640_p9), 0   ;;  %v11431_v4 = vmov (!%p640_p9), 0.0|0.0   ;;  %vm11432_vm0 = vmmov (!%p640_p9), 0   ;;  %v11433_v15 = vmov (!%p640_p9), 0.0  }
  0x1f   : > { %643 = sbr.rel (%p640_p9) target bundleno = 5457 (0x1551), region = 112  ;;  %11321 = vset.pattern.permute.xlu0 (!%p640_p9), %v11430_v3  ;;  %10425 = vmatprep.subr.bf16.mxu0 (!%p640_p9), %v11431_v4  ;;  %s14750_s25 = sld [smem:[#allocation14_spill]] (!%p640_p9)  ;;  %vm771_vm1 = vcmask (!%p640_p9), 261120   ;;  %vm1703_vm2 = vcmask (!%p640_p9), 64512   ;;  %vm8551_vm3 = vcmask (!%p640_p9), 24576  }
  0x20   : > { %10431 = vmatprep.subr.bf16.mxu1 (!%p640_p9), %v11431_v4  ;;  %9950 = vmatprep.mubr.msk.f32.mxu0 (!%p640_p9), %vm11432_vm0, %v11433_v15  ;;  %s14751_s7 = sld [smem:[#allocation15_spill]] (!%p640_p9)  ;;  %s14752_s4 = sld [smem:[#allocation16_spill]] (!%p640_p9) }
  0x21   : > { %9961 = vmatprep.mubr.msk.f32.mxu1 (!%p640_p9), %vm11432_vm0, %v11433_v15  ;;  %s14753_s26 = sld [smem:[#allocation19_spill]] (!%p640_p9)  ;;  %s14754_s1 = sld [smem:[#allocation21_spill]] (!%p640_p9) }
  0x22   : > { %s14755_s27 = sld [smem:[#allocation20_spill]] (!%p640_p9)  ;;  %s14756_s24 = sld [smem:[#allocation18_spill]] (!%p640_p9) }
  0x23   : > { %s14758_s6 = sld [smem:[#allocation6_spill]] (!%p640_p9)  ;;  %s14759_s22 = sld [smem:[#allocation9_spill]] (!%p640_p9) }
  0x24   : > { %v727_v0 = vld [vmem:[%s14749_s0] sm:$0xff] (!%p640_p9)  ;;  %v728_v1 = vld [vmem:[%s14749_s0 + $0x8] sm:$0xff] (!%p640_p9)  ;;  %v729_v8 = vld [vmem:[%s14749_s0 + $0x10] sm:$0xff] (!%p640_p9) }
  0x25   : > { %v731_v2 = vld [vmem:[%s14749_s0 + $0x20] sm:$0xff] (!%p640_p9)  ;;  %v10426_v5 = vpack.c.bf16 (!%p640_p9), %v728_v1, %v727_v0  ;;  %v732_v6 = vld [vmem:[%s14749_s0 + $0x28] sm:$0xff] (!%p640_p9)  ;;  %v730_v9 = vld [vmem:[%s14749_s0 + $0x18] sm:$0xff] (!%p640_p9) }
  0x26   : > { %s702_s29 = scalar_select %p701_p10, %s11576_s5, 1  ;;  %v10432_v7 = vpack.c.bf16 %v732_v6, %v731_v2  ;;  %v733_v10 = vld [vmem:[%s14749_s0 + $0x30] sm:$0xff]  ;;  %v10429_v11 = vpack.c.bf16 %v730_v9, %v729_v8  ;;  %v734_v12 = vld [vmem:[%s14749_s0 + $0x38] sm:$0xff]  ;;  %v8626_v16 = vld [vmem:[%s14751_s7] ss:$0 sm:$0xff] }
  0x27   : > { %10427 = vmatpush3.bf16.msra.mxu0 %v10426_v5  ;;  %v10435_v14 = vpack.c.bf16 %v734_v12, %v733_v10  ;;  %v735_v17 = vld [vmem:[%s14749_s0 + $0x40] sm:$0xff]  ;;  %v736_v18 = vld [vmem:[%s14749_s0 + $0x48] sm:$0xff]  ;;  %v737_v26 = vld [vmem:[%s14749_s0 + $0x50] sm:$0xff] }
  0x28   : > { %s8625_s3 = sshll.u32 %s702_s29, 3  ;;  %10433 = vmatpush3.bf16.msra.mxu1 %v10432_v7  ;;  %10428 = vmatprep.subr.bf16.mxu0 %v11431_v4  ;;  %v739_v19 = vld [vmem:[%s14749_s0 + $0x60] sm:$0xff]  ;;  %v740_v20 = vld [vmem:[%s14749_s0 + $0x68] sm:$0xff]  ;;  %v10438_v24 = vpack.c.bf16 %v736_v18, %v735_v17  ;;  %v738_v28 = vld [vmem:[%s14749_s0 + $0x58] sm:$0xff]  ;;  %s14757_s29 = smov %s14756_s24 }
  0x29   : > { %s704_s23 = scalar_lea.vmem %s14750_s25, %s8625_s3  ;;  %10434 = vmatprep.subr.bf16.mxu1 %v11431_v4  ;;  %v8627_v21 = vld [vmem:[%s14752_s4] ss:$0 sm:$0xff]  ;;  %v10444_v25 = vpack.c.bf16 %v740_v20, %v739_v19  ;;  %v741_v29 = vld [vmem:[%s14749_s0 + $0x70] sm:$0xff]  ;;  %v742_v30 = vld [vmem:[%s14749_s0 + $0x78] sm:$0xff]  ;;  %v10441_v31 = vpack.c.bf16 %v738_v28, %v737_v26  ;;  %s14760_s4 = sld [smem:[#allocation22_spill]] }
  0x2a   : > { %v705_v13 = vld [vmem:[%s704_s23] sm:$0xff]  ;;  %v10447_v32 = vpack.c.bf16 %v742_v30, %v741_v29  ;;  %v1056_v34 = vld [vmem:[%s14753_s26 + $0x8] sm:$0xff]  ;;  %v1057_v39 = vld [vmem:[%s14753_s26 + $0x10] sm:$0xff]  ;;  %s699_s30 = sand.u32 1, %s14758_s6   ;;  %s9166_s7 = sshll.u32 %s14759_s22, 4 }
  0x2b   : > { %709 = vperm.xlu0 %11321, %v705_v13   ;;  %10430 = vmatpush3.bf16.msra.mxu0 %v10429_v11  ;;  %v1055_v33 = vld [vmem:[%s14753_s26] sm:$0xff]  ;;  %v1060_v36 = vld [vmem:[%s14753_s26 + $0x28] sm:$0xff]  ;;  %v1058_v40 = vld [vmem:[%s14753_s26 + $0x18] sm:$0xff]  ;;  %s700_s23 = scalar_lea.vmem [#allocation2], %s699_s30  ;;  %s11434_s6 = smov [#allocation2]  }
  0x2c   : > { %10436 = vmatpush3.bf16.msra.mxu1 %v10435_v14  ;;  %10437 = vmatprep.subr.bf16.mxu0 %v11431_v4  ;;  %v1059_v35 = vld [vmem:[%s14753_s26 + $0x20] sm:$0xff]  ;;  %v10450_v37 = vpack.c.bf16 %v1056_v34, %v1055_v33  ;;  %v1061_v41 = vld [vmem:[%s14753_s26 + $0x30] sm:$0xff]  ;;  %v1062_v42 = vld [vmem:[%s14753_s26 + $0x38] sm:$0xff]  ;;  %v10453_v43 = vpack.c.bf16 %v1058_v40, %v1057_v39  ;;  %s8566_s28 = sshll.u32 %s700_s23, 4  ;;  %s11370_s22 = sshll.u32 %s11434_s6, 4  ;;  %s14646_s28 = int_to_ptr.vmem [resolvable:$true] %s8566_s28  ;;  %s11371_s22 = int_to_ptr.vmem [resolvable:$false] %s11370_s22 }
  0x2d   : > { %10443 = vmatprep.subr.bf16.mxu1 %v11431_v4  ;;  %v10456_v38 = vpack.c.bf16 %v1060_v36, %v1059_v35  ;;  %v10459_v44 = vpack.c.bf16 %v1062_v42, %v1061_v41  ;;  %v1063_v45 = vld [vmem:[%s14753_s26 + $0x40] sm:$0xff]  ;;  %v1064_v46 = vld [vmem:[%s14753_s26 + $0x48] sm:$0xff]  ;;  %v1065_v51 = vld [vmem:[%s14753_s26 + $0x50] sm:$0xff]  ;;  %s11366_s5 = scalar_lea.vmem %s14646_s28, 16  ;;  %p11373_p0 = scmp.lt.s32.totalorder %s14646_s28, %s11371_s22 }
  0x2e   : > { %v1067_v47 = vld [vmem:[%s14753_s26 + $0x60] sm:$0xff]  ;;  %v1068_v48 = vld [vmem:[%s14753_s26 + $0x68] sm:$0xff]  ;;  %v10462_v49 = vpack.c.bf16 %v1064_v46, %v1063_v45  ;;  %v1066_v52 = vld [vmem:[%s14753_s26 + $0x58] sm:$0xff]  ;;  %p11367_p11 = scmp.ne.s32.totalorder %s14646_s28, %s11366_s5 }
  0x2f   : > { %v10468_v50 = vpack.c.bf16 %v1068_v48, %v1067_v47  ;;  %v1069_v53 = vld [vmem:[%s14753_s26 + $0x70] sm:$0xff]  ;;  %v1070_v54 = vld [vmem:[%s14753_s26 + $0x78] sm:$0xff]  ;;  %v10465_v55 = vpack.c.bf16 %v1066_v52, %v1065_v51  ;;  %v1379_v57 = vld [vmem:[%s14754_s1] sm:$0xff] }
  0x30   : > { %v10471_v56 = vpack.c.bf16 %v1070_v54, %v1069_v53  ;;  %v1380_v58 = vld [vmem:[%s14754_s1 + $0x8] sm:$0xff]  ;;  %v1383_v59 = vld [vmem:[%s14754_s1 + $0x20] sm:$0xff]  ;;  %v1381_v63 = vld [vmem:[%s14754_s1 + $0x10] sm:$0xff]  ;;  %p11368_p12 = pnand %p11367_p11, %p11593_p5 }
  0x31   : > { %v1384_v60 = vld [vmem:[%s14754_s1 + $0x28] sm:$0xff]  ;;  %v10474_v61 = vpack.c.bf16 %v1380_v58, %v1379_v57  ;;  %v1382_v0 = vld [vmem:[%s14754_s1 + $0x18] sm:$0xff]  ;;  %v1385_v1 = vld [vmem:[%s14754_s1 + $0x30] sm:$0xff] }
  0x32   : > { %v10480_v62 = vpack.c.bf16 %v1384_v60, %v1383_v59  ;;  %v1386_v2 = vld [vmem:[%s14754_s1 + $0x38] sm:$0xff]  ;;  %v10477_v3 = vpack.c.bf16 %v1382_v0, %v1381_v63  ;;  %v1387_v6 = vld [vmem:[%s14754_s1 + $0x40] sm:$0xff]  ;;  %v1388_v7 = vld [vmem:[%s14754_s1 + $0x48] sm:$0xff]  ;;  %p11369_p13 = pneg %p11368_p12 }
  0x33   : > { %v10483_v5 = vpack.c.bf16 %v1386_v2, %v1385_v1  ;;  %v1391_v8 = vld [vmem:[%s14754_s1 + $0x60] sm:$0xff]  ;;  %v1392_v9 = vld [vmem:[%s14754_s1 + $0x68] sm:$0xff]  ;;  %v10486_v10 = vpack.c.bf16 %v1388_v7, %v1387_v6  ;;  %v1389_v12 = vld [vmem:[%s14754_s1 + $0x50] sm:$0xff] }
  0x34   : > { %v10492_v11 = vpack.c.bf16 %v1392_v9, %v1391_v8  ;;  %v1390_v13 = vld [vmem:[%s14754_s1 + $0x58] sm:$0xff]  ;;  %v1393_v14 = vld [vmem:[%s14754_s1 + $0x70] sm:$0xff]  ;;  %v8636_v28 = vld [vmem:[%s14755_s27] ss:$0 sm:$0xff] }
  0x35   : > { %v10489_v17 = vpack.c.bf16 %v1390_v13, %v1389_v12  ;;  %v8637_v35 = vld [vmem:[%s14755_s27 + $0x1] ss:$0 sm:$0xff]  ;;  %v8638_v39 = vld [vmem:[%s14755_s27 + $0x2] ss:$0 sm:$0xff]  ;;  %v8639_v40 = vld [vmem:[%s14755_s27 + $0x3] ss:$0 sm:$0xff] }
  0x36   : > { %v8631_v45 = vld [vmem:[%s14757_s29 + $0x3] ss:$0 sm:$0xff]  ;;  %v8644_v52 = vld [vmem:[%s14694_s8] ss:$0 sm:$0xff]  ;;  %v8645_v53 = vld [vmem:[%s14694_s8 + $0x1] ss:$0 sm:$0xff] }
  0xaa   : > { %v710_v22 = vpop.permute.xlu0 %709 }
  0xab   : > { %v718_v23 = vmul.f32 %v8626_v16, %v710_v22  ;;  %v1394_v16 = vld [vmem:[%s14754_s1 + $0x78] sm:$0xff] }
  0xac   : > { %v10495_v18 = vpack.c.bf16 %v1394_v16, %v1393_v14 }
  0xad   : > { %v11663_v27 = vadd.f32 %v8627_v21, %v718_v23 }
  0xaf   : > { %9951 = vmatmul.mubr.msk.f32.vlgmr.msra.gmra.mrb[0].mxu0 %vm771_vm1, %v11663_v27  ;;  %9962 = vmatmul.mubr.msk.f32.vlgmr.msra.gmra.mrb[0].mxu1 %vm771_vm1, %v11663_v27 }
  0xb0   : > { %10439 = vmatpush3.bf16.msra.mxu0 %v10438_v24  ;;  %10445 = vmatpush3.bf16.msra.mxu1 %v10444_v25 }
  0xb1   : > { %10440 = vmatprep.subr.bf16.mxu0 %v11431_v4  ;;  %10446 = vmatprep.subr.bf16.mxu1 %v11431_v4 }
  0xb2   : > { %9972 = vmatprep.mubr.msk.f32.mxu0 %vm11432_vm0, %v11433_v15  ;;  %9983 = vmatprep.mubr.msk.f32.mxu1 %vm11432_vm0, %v11433_v15 }
  0xb4   : > { %10442 = vmatpush3.bf16.msra.mxu0 %v10441_v31  ;;  %10448 = vmatpush3.bf16.msra.mxu1 %v10447_v32  ;;  %v8628_v31 = vld [vmem:[%s14756_s24] ss:$0 sm:$0xff]  ;;  %s8554_s24 = scalar_lea.sflag [#allocation3], %s699_s30 }
  0xb5   : > { %10449 = vmatprep.subr.bf16.mxu0 %v11431_v4  ;;  %10455 = vmatprep.subr.bf16.mxu1 %v11431_v4 }
  0xb7   : > { %9973 = vmatmul.mubr.msk.f32.vlgmr.msra.gmra.mrb[2].mxu0 %vm771_vm1, %v11663_v27  ;;  %9984 = vmatmul.mubr.msk.f32.vlgmr.msra.gmra.mrb[2].mxu1 %vm771_vm1, %v11663_v27 }
  0xb8   : > { %10451 = vmatpush3.bf16.msra.mxu0 %v10450_v37  ;;  %10457 = vmatpush3.bf16.msra.mxu1 %v10456_v38  ;;  %v8629_v37 = vld [vmem:[%s14757_s29 + $0x1] ss:$0 sm:$0xff] }
  0xb9   : > { %10452 = vmatprep.subr.bf16.mxu0 %v11431_v4  ;;  %10458 = vmatprep.subr.bf16.mxu1 %v11431_v4 }
  0xba   : > { %9994 = vmatprep.mubr.msk.f32.mxu0 %vm11432_vm0, %v11433_v15  ;;  %10005 = vmatprep.mubr.msk.f32.mxu1 %vm11432_vm0, %v11433_v15 }
  0xbc   : > { %10454 = vmatpush3.bf16.msra.mxu0 %v10453_v43  ;;  %10460 = vmatpush3.bf16.msra.mxu1 %v10459_v44  ;;  %v8630_v44 = vld [vmem:[%s14757_s29 + $0x2] ss:$0 sm:$0xff] }
  0xbd   : > { %10461 = vmatprep.subr.bf16.mxu0 %v11431_v4  ;;  %10467 = vmatprep.subr.bf16.mxu1 %v11431_v4 }
  0xbf   : > { %9995 = vmatmul.mubr.msk.f32.vlgmr.msra.gmra.mrb[4].mxu0 %vm771_vm1, %v11663_v27  ;;  %10006 = vmatmul.mubr.msk.f32.vlgmr.msra.gmra.mrb[4].mxu1 %vm771_vm1, %v11663_v27 }
  0xc0   : > { %10463 = vmatpush3.bf16.msra.mxu0 %v10462_v49  ;;  %10469 = vmatpush3.bf16.msra.mxu1 %v10468_v50 }
  0xc1   : > { %10464 = vmatprep.subr.bf16.mxu0 %v11431_v4  ;;  %10470 = vmatprep.subr.bf16.mxu1 %v11431_v4 }
  0xc2   : > { %10016 = vmatprep.mubr.msk.f32.mxu0 %vm11432_vm0, %v11433_v15  ;;  %10027 = vmatprep.mubr.msk.f32.mxu1 %vm11432_vm0, %v11433_v15 }
  0xc4   : > { %10466 = vmatpush3.bf16.msra.mxu0 %v10465_v55  ;;  %10472 = vmatpush3.bf16.msra.mxu1 %v10471_v56 }
  0xc5   : > { %10473 = vmatprep.subr.bf16.mxu0 %v11431_v4  ;;  %10479 = vmatprep.subr.bf16.mxu1 %v11431_v4 }
  0xc7   : > { %10017 = vmatmul.mubr.msk.f32.vlgmr.msra.gmra.mrb[6].mxu0 %vm771_vm1, %v11663_v27  ;;  %10028 = vmatmul.mubr.msk.f32.vlgmr.msra.gmra.mrb[6].mxu1 %vm771_vm1, %v11663_v27 }
  0xc8   : > { %10475 = vmatpush3.bf16.msra.mxu0 %v10474_v61  ;;  %10481 = vmatpush3.bf16.msra.mxu1 %v10480_v62 }
  0xc9   : > { %10476 = vmatprep.subr.bf16.mxu0 %v11431_v4  ;;  %10482 = vmatprep.subr.bf16.mxu1 %v11431_v4 }
  0xca   : > { %10038 = vmatprep.mubr.msk.f32.mxu0 %vm11432_vm0, %v11433_v15  ;;  %10049 = vmatprep.mubr.msk.f32.mxu1 %vm11432_vm0, %v11433_v15 }
  0xcc   : > { %10478 = vmatpush3.bf16.msra.mxu0 %v10477_v3  ;;  %10484 = vmatpush3.bf16.msra.mxu1 %v10483_v5 }
  0xcd   : > { %10485 = vmatprep.subr.bf16.mxu0 %v11431_v4  ;;  %10491 = vmatprep.subr.bf16.mxu1 %v11431_v4 }
  0xcf   : > { %10039 = vmatmul.mubr.msk.f32.vlgmr.msra.gmra.mrb[8].mxu0 %vm771_vm1, %v11663_v27  ;;  %10050 = vmatmul.mubr.msk.f32.vlgmr.msra.gmra.mrb[8].mxu1 %vm771_vm1, %v11663_v27 }
  0xd0   : > { %10487 = vmatpush3.bf16.msra.mxu0 %v10486_v10  ;;  %10493 = vmatpush3.bf16.msra.mxu1 %v10492_v11 }
  0xd1   : > { %10488 = vmatprep.subr.bf16.mxu0 %v11431_v4  ;;  %10494 = vmatprep.subr.bf16.mxu1 %v11431_v4 }
  0xd2   : > { %10060 = vmatprep.mubr.msk.f32.mxu0 %vm11432_vm0, %v11433_v15  ;;  %10071 = vmatprep.mubr.msk.f32.mxu1 %vm11432_vm0, %v11433_v15 }
  0xd4   : > { %10490 = vmatpush3.bf16.msra.mxu0 %v10489_v17  ;;  %10496 = vmatpush3.bf16.msra.mxu1 %v10495_v18 }
  0xd5   : > { %10074 = vmatprep.subr.mxu0 %v11433_v15  ;;  %10089 = vmatprep.subr.mxu1 %v11433_v15 }
  0xd7   : > { %10061 = vmatmul.mubr.msk.f32.vlgmr.msra.gmra.mrb[10].mxu0 %vm771_vm1, %v11663_v27  ;;  %10072 = vmatmul.mubr.msk.f32.vlgmr.msra.gmra.mrb[10].mxu1 %vm771_vm1, %v11663_v27 }
  0xd8   : > { %10076 = vmatprep.mubr.msk.f32.mxu0 %vm11432_vm0, %v11433_v15  ;;  %10091 = vmatprep.mubr.msk.f32.mxu1 %vm11432_vm0, %v11433_v15 }
 0x182   : > { %v841_v19 = vpop.f32.mrb[0].mxu0  ;;  %v911_v20 = vpop.f32.mrb[0].mxu1 }
 0x183   : > { %v9952_v21 = vpop.f32.mrb[1].mxu0  ;;  %v9963_v22 = vpop.f32.mrb[1].mxu1  ;;  %v842_v36 = vadd.f32 %v8628_v31, %v841_v19  ;;  %v912_v41 = vadd.f32 %v8629_v37, %v911_v20 }
 0x18a   : > { %v981_v23 = vpop.f32.mrb[2].mxu0  ;;  %v1051_v24 = vpop.f32.mrb[2].mxu1 }
 0x18b   : > { %v9974_v25 = vpop.f32.mrb[3].mxu0  ;;  %v9985_v26 = vpop.f32.mrb[3].mxu1  ;;  %v982_v50 = vadd.f32 %v8630_v44, %v981_v23  ;;  %v1052_v51 = vadd.f32 %v8631_v45, %v1051_v24 }
 0x192   : > { %v1165_v29 = vpop.f32.mrb[4].mxu0  ;;  %v1235_v30 = vpop.f32.mrb[4].mxu1 }
 0x193   : > { %v1166_v32 = vadd.f32 %v8636_v28, %v1165_v29  ;;  %v9996_v33 = vpop.f32.mrb[5].mxu0  ;;  %v10007_v34 = vpop.f32.mrb[5].mxu1  ;;  %v1236_v38 = vadd.f32 %v8637_v35, %v1235_v30 }
 0x195   : > { %10075 = vmatpush3.xpose.msk.msra.mxu0 %vm1703_vm2, %v1166_v32 }
 0x196   : > { %10079 = vmatprep.subr.mxu0 %v11433_v15 }
 0x198   : > { %10077 = vmatmul.mubr.msk.f32.vlgmr.msra.gmra.mrb[12].mxu0 %vm1703_vm2, %v842_v36 }
 0x199   : > { %10080 = vmatpush3.xpose.msk.msra.mxu0 %vm1703_vm2, %v1236_v38  ;;  %10081 = vmatprep.mubr.msk.f32.mxu0 %vm11432_vm0, %v11433_v15  ;;  %v8646_v38 = vld [vmem:[%s14694_s8 + $0x2] ss:$0 sm:$0xff] }
 0x19a   : > { %v1305_v42 = vpop.f32.mrb[6].mxu0  ;;  %v1375_v43 = vpop.f32.mrb[6].mxu1  ;;  %10084 = vmatprep.subr.mxu0 %v11433_v15 }
 0x19b   : > { %v1306_v46 = vadd.f32 %v8638_v39, %v1305_v42  ;;  %v1376_v47 = vadd.f32 %v8639_v40, %v1375_v43  ;;  %v10018_v48 = vpop.f32.mrb[7].mxu0  ;;  %v10029_v49 = vpop.f32.mrb[7].mxu1  ;;  %v8647_v43 = vld [vmem:[%s14694_s8 + $0x3] ss:$0 sm:$0xff] }
 0x19c   : > { %10082 = vmatmul.mubr.msk.f32.vlgmr.msra.gmra.mrb[14].mxu0 %vm1703_vm2, %v912_v41 }
 0x19d   : > { %10085 = vmatpush3.xpose.msk.msra.mxu0 %vm1703_vm2, %v1306_v46  ;;  %10090 = vmatpush3.xpose.msk.msra.mxu1 %vm1703_vm2, %v1376_v47 }
 0x19e   : > { %10086 = vmatprep.mubr.msk.f32.mxu0 %vm11432_vm0, %v11433_v15  ;;  %10094 = vmatprep.subr.mxu0 %v11433_v15 }
 0x19f   : > { %10099 = vmatprep.subr.mxu1 %v11433_v15 }
 0x1a0   : > { %10087 = vmatmul.mubr.msk.f32.vlgmr.msra.gmra.mrb[16].mxu0 %vm1703_vm2, %v982_v50  ;;  %10092 = vmatmul.mubr.msk.f32.vlgmr.msra.gmra.mrb[12].mxu1 %vm1703_vm2, %v1052_v51  ;;  %v2344_v51 = vld [vmem:[%s14695_s9] sm:$0xff] }
 0x1a1   : > { %10096 = vmatprep.mubr.msk.f32.mxu0 %vm11432_vm0, %v11433_v15  ;;  %10101 = vmatprep.mubr.msk.f32.mxu1 %vm11432_vm0, %v11433_v15 }
 0x1a2   : > { %v1489_v54 = vpop.f32.mrb[8].mxu0  ;;  %v1559_v55 = vpop.f32.mrb[8].mxu1 }
 0x1a3   : > { %v1490_v56 = vadd.f32 %v8644_v52, %v1489_v54  ;;  %v1560_v57 = vadd.f32 %v8645_v53, %v1559_v55  ;;  %v10040_v58 = vpop.f32.mrb[9].mxu0  ;;  %v10051_v59 = vpop.f32.mrb[9].mxu1  ;;  %v2345_v52 = vld [vmem:[%s14695_s9 + $0x8] sm:$0xff]  ;;  %v2346_v53 = vld [vmem:[%s14695_s9 + $0x10] sm:$0xff] }
 0x1a5   : > { %10095 = vmatpush3.msra.mxu0 %v1490_v56  ;;  %10100 = vmatpush3.msra.mxu1 %v1560_v57  ;;  %v2347_v56 = vld [vmem:[%s14695_s9 + $0x18] sm:$0xff] }
 0x1a6   : > { %10104 = vmatprep.subr.mxu0 %v11433_v15  ;;  %10109 = vmatprep.subr.mxu1 %v11433_v15 }
 0x1aa   : > { %v1629_v60 = vpop.f32.mrb[10].mxu0  ;;  %v11890_v61 = vpop.f32.mrb[10].mxu1 }
 0x1ab   : > { %v10062_v62 = vpop.f32.mrb[11].mxu0  ;;  %v10073_v63 = vpop.f32.mrb[11].mxu1  ;;  %v1630_v42 = vadd.f32 %v8646_v38, %v1629_v60  ;;  %v1700_v46 = vadd.f32 %v8647_v43, %v11890_v61  ;;  %v2735_v38 = vld [vmem:[%s14699_s13 + $0x188] sm:$0xff]  ;;  %v2734_v43 = vld [vmem:[%s14699_s13 + $0x180] sm:$0xff] }
 0x26b   : > { %v1776_v0 = vpop.f32.mrb[12].mxu0 }
 0x26c   : > { %v10078_v1 = vpop.f32.mrb[13].mxu0  ;;  %v2008_v2 = vsel %vm1703_vm2, %v1776_v0, -inf }
 0x26d   : > { %2009 = vmax.xlane.f32.xlu0 %v2008_v2 }
 0x26f   : > { %v1852_v3 = vpop.f32.mrb[14].mxu0 }
 0x270   : > { %v10083_v5 = vpop.f32.mrb[15].mxu0  ;;  %v2011_v6 = vsel %vm1703_vm2, %v1852_v3, -inf }
 0x271   : > { %2012 = vmax.xlane.f32.xlu1 %v2011_v6 }
 0x273   : > { %v1928_v7 = vpop.f32.mrb[16].mxu0  ;;  %v2004_v8 = vpop.f32.mrb[12].mxu1 }
 0x274   : > { %v10088_v9 = vpop.f32.mrb[17].mxu0  ;;  %v10093_v10 = vpop.f32.mrb[13].mxu1  ;;  %v2014_v11 = vsel %vm1703_vm2, %v1928_v7, -inf  ;;  %v2017_v12 = vsel %vm1703_vm2, %v2004_v8, -inf }
 0x275   : > { %2015 = vmax.xlane.f32.xlu1 %v2014_v11 }
 0x279   : > { %2018 = vmax.xlane.f32.xlu1 %v2017_v12 }
 0x2fa   : > { %v2010_v13 = vpop.xlane.xlu0 %2009 }
 0x2fb   : > { %v2020_v14 = vsub.f32 %v1776_v0, %v2010_v13  ;;  %v8668_v13 = vld [vmem:[%s14696_s10] ss:$0 sm:$0xff] }
 0x2fd   : > { %v2024_v16 = vmul.f32 1.442695, %v2020_v14 }
 0x2fe   : > { %v2013_v17 = vpop.xlane.xlu1 %2012 }
 0x2ff   : > { %11322 = vpow2.f32 %v2024_v16  ;;  %v2021_v18 = vsub.f32 %v1852_v3, %v2013_v17 }
 0x301   : > { %v2026_v19 = vmul.f32 1.442695, %v2021_v18 }
 0x302   : > { %v2016_v20 = vpop.xlane.xlu1 %2015 }
 0x303   : > { %11324 = vpow2.f32 %v2026_v19  ;;  %v2022_v21 = vsub.f32 %v1928_v7, %v2016_v20 }
 0x305   : > { %v2028_v22 = vmul.f32 1.442695, %v2022_v21 }
 0x306   : > { %v2019_v23 = vpop.xlane.xlu1 %2018 }
 0x307   : > { %11326 = vpow2.f32 %v2028_v22  ;;  %v2023_v24 = vsub.f32 %v2004_v8, %v2019_v23 }
 0x309   : > { %v11323_v25 = vpop.eup %11322  ;;  %v2030_v26 = vmul.f32 1.442695, %v2023_v24 }
 0x30a   : > { %v2032_v28 = vsel %vm1703_vm2, %v11323_v25, 0.0 }
 0x30b   : > { %11328 = vpow2.f32 %v2030_v26  ;;  %2033 = vadd.xlane.f32.xlu1 %v2032_v28  ;;  %v2703_v26 = vld [vmem:[%s14699_s13 + $0x88] sm:$0xff] }
 0x30d   : > { %v11325_v29 = vpop.eup %11324 }
 0x30e   : > { %v2035_v30 = vsel %vm1703_vm2, %v11325_v29, 0.0 }
 0x30f   : > { %2036 = vadd.xlane.f32.xlu1 %v2035_v30  ;;  %v2686_v30 = vld [vmem:[%s14699_s13] sm:$0xff] }
 0x311   : > { %v11327_v31 = vpop.eup %11326 }
 0x312   : > { %v2038_v32 = vsel %vm1703_vm2, %v11327_v31, 0.0 }
 0x313   : > { %2039 = vadd.xlane.f32.xlu1 %v2038_v32 }
 0x315   : > { %v11329_v33 = vpop.eup %11328 }
 0x316   : > { %v2041_v34 = vsel %vm1703_vm2, %v11329_v33, 0.0 }
 0x317   : > { %2042 = vadd.xlane.f32.xlu1 %v2041_v34  ;;  %v2688_v34 = vld [vmem:[%s14699_s13 + $0x10] sm:$0xff] }
 0x398   : > { %v2034_v35 = vpop.xlane.xlu1 %2033 }
 0x399   : > { %11330 = vrcp.f32 %v2034_v35  ;;  %v2704_v35 = vld [vmem:[%s14699_s13 + $0x90] sm:$0xff] }
 0x39c   : > { %v2037_v36 = vpop.xlane.xlu1 %2036 }
 0x39d   : > { %11332 = vrcp.f32 %v2037_v36  ;;  %v10507_v36 = vpack.c.bf16 %v2704_v35, %v2688_v34 }
 0x3a0   : > { %v2040_v37 = vpop.xlane.xlu1 %2039 }
 0x3a1   : > { %11334 = vrcp.f32 %v2040_v37  ;;  %v2719_v37 = vld [vmem:[%s14699_s13 + $0x108] sm:$0xff] }
 0x3a3   : > { %v11331_v39 = vpop.eup %11330 }
 0x3a4   : > { %v2045_v40 = vmul.f32 %v11331_v39, %v11323_v25  ;;  %v2043_v41 = vpop.xlane.xlu1 %2042  ;;  %v2687_v25 = vld [vmem:[%s14699_s13 + $0x8] sm:$0xff]  ;;  %v2721_v39 = vld [vmem:[%s14699_s13 + $0x118] sm:$0xff] }
 0x3a5   : > { %11336 = vrcp.f32 %v2043_v41  ;;  %v10497_v28 = vpack.c.bf16 %v2703_v26, %v2687_v25  ;;  %v2737_v41 = vld [vmem:[%s14699_s13 + $0x198] sm:$0xff]  ;;  %v2710_v25 = vld [vmem:[%s14699_s13 + $0xc0] sm:$0xff] }
 0x3a6   : > { %10097 = vmatmul.mubr.msk.f32.vlgmr.msra.gmra.mrb[18].mxu0 %vm1703_vm2, %v2045_v40  ;;  %v10501_v40 = vpack.c.bf16 %v2735_v38, %v2719_v37  ;;  %v2742_v37 = vld [vmem:[%s14699_s13 + $0x1c0] sm:$0xff] }
 0x3a7   : > { %v11333_v44 = vpop.eup %11332  ;;  %10105 = vmatpush3.msra.mxu0 %v1630_v42  ;;  %10106 = vmatprep.mubr.msk.f32.mxu0 %vm11432_vm0, %v11433_v15  ;;  %v2718_v42 = vld [vmem:[%s14699_s13 + $0x100] sm:$0xff] }
 0x3a8   : > { %v2047_v45 = vmul.f32 %v11333_v44, %v11325_v29  ;;  %10114 = vmatprep.subr.mxu0 %v11433_v15  ;;  %v2705_v29 = vld [vmem:[%s14699_s13 + $0x98] sm:$0xff]  ;;  %v10509_v44 = vpack.c.bf16 %v2737_v41, %v2721_v39  ;;  %v2744_v41 = vld [vmem:[%s14699_s13 + $0x1d0] sm:$0xff] }
 0x3aa   : > { %10102 = vmatmul.mubr.msk.f32.vlgmr.msra.gmra.mrb[14].mxu1 %vm1703_vm2, %v2047_v45  ;;  %v10503_v45 = vpack.c.bf16 %v2734_v43, %v2718_v42  ;;  %v2699_v42 = vld [vmem:[%s14699_s13 + $0x68] sm:$0xff] }
 0x3ab   : > { %v11335_v47 = vpop.eup %11334  ;;  %10110 = vmatpush3.msra.mxu1 %v1700_v46  ;;  %10111 = vmatprep.mubr.msk.f32.mxu1 %vm11432_vm0, %v11433_v15  ;;  %v2720_v46 = vld [vmem:[%s14699_s13 + $0x110] sm:$0xff]  ;;  %v2715_v43 = vld [vmem:[%s14699_s13 + $0xe8] sm:$0xff] }
 0x3ac   : > { %v2049_v48 = vmul.f32 %v11335_v47, %v11327_v31  ;;  %10119 = vmatprep.subr.mxu1 %v11433_v15  ;;  %v2702_v31 = vld [vmem:[%s14699_s13 + $0x80] sm:$0xff]  ;;  %v2736_v47 = vld [vmem:[%s14699_s13 + $0x190] sm:$0xff] }
 0x3ae   : > { %10107 = vmatmul.mubr.msk.f32.vlgmr.msra.gmra.mrb[20].mxu0 %vm1703_vm2, %v2049_v48  ;;  %v10511_v48 = vpack.c.bf16 %v2736_v47, %v2720_v46 }
 0x3af   : > { %v11337_v49 = vpop.eup %11336  ;;  %10116 = vmatprep.mubr.msk.f32.mxu0 %vm11432_vm0, %v11433_v15  ;;  %10115 = vmatpush3.msra.mxu0 %v2344_v51  ;;  %v2693_v51 = vld [vmem:[%s14699_s13 + $0x38] sm:$0xff] }
 0x3b0   : > { %v2051_v50 = vmul.f32 %v11337_v49, %v11329_v33  ;;  %10124 = vmatprep.subr.mxu0 %v11433_v15  ;;  %v10499_v33 = vpack.c.bf16 %v2702_v31, %v2686_v30  ;;  %v2691_v49 = vld [vmem:[%s14699_s13 + $0x28] sm:$0xff] }
 0x3b1   : > { %v2727_v30 = vld [vmem:[%s14699_s13 + $0x148] sm:$0xff] }
 0x3b2   : > { %10112 = vmatmul.mubr.msk.f32.vlgmr.msra.gmra.mrb[16].mxu1 %vm1703_vm2, %v2051_v50  ;;  %v2707_v50 = vld [vmem:[%s14699_s13 + $0xa8] sm:$0xff] }
 0x3b3   : > { %10121 = vmatprep.mubr.msk.f32.mxu1 %vm11432_vm0, %v11433_v15  ;;  %10120 = vmatpush3.msra.mxu1 %v2345_v52  ;;  %v10513_v52 = vpack.c.bf16 %v2707_v50, %v2691_v49  ;;  %v2743_v31 = vld [vmem:[%s14699_s13 + $0x1c8] sm:$0xff]  ;;  %v2714_v49 = vld [vmem:[%s14699_s13 + $0xe0] sm:$0xff]  ;;  %v10545_v50 = vpack.c.bf16 %v2715_v43, %v2699_v42  ;;  %v3444_v42 = vld [vmem:[%s14701_s15 + $0xb8] sm:$0xff] }
 0x3b4   : > { %10129 = vmatprep.subr.mxu1 %v11433_v15  ;;  %v10533_v38 = vpack.c.bf16 %v2743_v31, %v2727_v30  ;;  %v3442_v30 = vld [vmem:[%s14701_s15 + $0xa8] sm:$0xff]  ;;  %v3505_v31 = vld [vmem:[%s14701_s15 + $0x2a0] sm:$0xff]  ;;  %v3507_v43 = vld [vmem:[%s14701_s15 + $0x2b0] sm:$0xff] }
 0x479   : > { %v2121_v54 = vpop.f32.mrb[18].mxu0 }
 0x47a   : > { %v10098_v55 = vpop.f32.mrb[19].mxu0  ;;  %10117 = vmatmul.mubr.msk.f32.vlgmr.msra.gmra.mrb[22].mxu0 %vm1703_vm2, %v2121_v54 }
 0x47b   : > { %10125 = vmatpush3.msra.mxu0 %v2346_v53  ;;  %10126 = vmatprep.mubr.msk.f32.mxu0 %vm11432_vm0, %v11433_v15  ;;  %v2709_v53 = vld [vmem:[%s14699_s13 + $0xb8] sm:$0xff] }
 0x47c   : > { %10498 = vmatprep.subr.bf16.mxu0 %v10497_v28  ;;  %v10521_v54 = vpack.c.bf16 %v2709_v53, %v2693_v51  ;;  %v2696_v28 = vld [vmem:[%s14699_s13 + $0x50] sm:$0xff] }
 0x47d   : > { %v2194_v57 = vpop.f32.mrb[14].mxu1  ;;  %v2716_v53 = vld [vmem:[%s14699_s13 + $0xf0] sm:$0xff] }
 0x47e   : > { %v10103_v58 = vpop.f32.mrb[15].mxu1  ;;  %10122 = vmatmul.mubr.msk.f32.vlgmr.msra.gmra.mrb[18].mxu1 %vm1703_vm2, %v2194_v57 }
 0x47f   : > { %10130 = vmatpush3.msra.mxu1 %v2347_v56  ;;  %10131 = vmatprep.mubr.msk.f32.mxu1 %vm11432_vm0, %v11433_v15  ;;  %v8669_v58 = vld [vmem:[%s14697_s11] ss:$0 sm:$0xff] }
 0x481   : > { %v2267_v59 = vpop.f32.mrb[20].mxu0 }
 0x482   : > { %v10108_v60 = vpop.f32.mrb[21].mxu0  ;;  %10127 = vmatmul.mubr.msk.f32.vlgmr.msra.gmra.mrb[24].mxu0 %vm1703_vm2, %v2267_v59 }
 0x483   : > { %2901 = vmatprep.mubr.f32.mxu0 %v11433_v15  ;;  %10500 = vmatpush1.bf16.msra.mxu0 %v10499_v33  ;;  %v8670_v60 = vld [vmem:[%s14698_s12] ss:$0 sm:$0xff]  ;;  %v2745_v33 = vld [vmem:[%s14699_s13 + $0x1d8] sm:$0xff] }
 0x484   : > { %10502 = vmatprep.subr.bf16.mxu0 %v10501_v40  ;;  %v2728_v40 = vld [vmem:[%s14699_s13 + $0x150] sm:$0xff] }
 0x485   : > { %v2340_v61 = vpop.f32.mrb[16].mxu1  ;;  %v10543_v47 = vpack.c.bf16 %v2744_v41, %v2728_v40  ;;  %v3489_v40 = vld [vmem:[%s14701_s15 + $0x220] sm:$0xff]  ;;  %v3490_v41 = vld [vmem:[%s14701_s15 + $0x228] sm:$0xff] }
 0x486   : > { %v10113_v62 = vpop.f32.mrb[17].mxu1  ;;  %10132 = vmatmul.mubr.msk.f32.vlgmr.msra.gmra.mrb[20].mxu1 %vm1703_vm2, %v2340_v61  ;;  %v2690_v61 = vld [vmem:[%s14699_s13 + $0x20] sm:$0xff] }
 0x487   : > { %2972 = vmatprep.mubr.f32.mxu1 %v11433_v15  ;;  %10504 = vmatpush1.bf16.msra.mxu0 %v10503_v45  ;;  %v2706_v62 = vld [vmem:[%s14699_s13 + $0xa0] sm:$0xff]  ;;  %v2717_v45 = vld [vmem:[%s14699_s13 + $0xf8] sm:$0xff] }
 0x488   : > { %10514 = vmatprep.subr.bf16.mxu0 %v10513_v52  ;;  %v2700_v52 = vld [vmem:[%s14699_s13 + $0x70] sm:$0xff] }
 0x54d   : > { %v2417_v63 = vpop.f32.mrb[22].mxu0 }
 0x54e   : > { %v10118_v0 = vpop.f32.mrb[23].mxu0  ;;  %v2640_v2 = vsel %vm771_vm1, %v2417_v63, 0.0 }
 0x54f   : > { %v2692_v0 = vld [vmem:[%s14699_s13 + $0x30] sm:$0xff] }
 0x551   : > { %v2490_v1 = vpop.f32.mrb[18].mxu1 }
 0x552   : > { %v2641_v3 = vsel %vm771_vm1, %v2490_v1, 0.0  ;;  %v10123_v5 = vpop.f32.mrb[19].mxu1  ;;  %v2708_v1 = vld [vmem:[%s14699_s13 + $0xb0] sm:$0xff] }
 0x553   : > { %v2642_v6 = vadd.f32 %v2641_v3, %v2640_v2  ;;  %v2723_v2 = vld [vmem:[%s14699_s13 + $0x128] sm:$0xff]  ;;  %v2725_v5 = vld [vmem:[%s14699_s13 + $0x138] sm:$0xff] }
 0x554   : > { %v2739_v3 = vld [vmem:[%s14699_s13 + $0x1a8] sm:$0xff] }
 0x555   : > { %v2563_v7 = vpop.f32.mrb[24].mxu0 }
 0x556   : > { %v2643_v8 = vsel %vm771_vm1, %v2563_v7, 0.0  ;;  %v10128_v9 = vpop.f32.mrb[25].mxu0 }
 0x557   : > { %v2644_v10 = vadd.f32 %v2643_v8, %v2642_v6  ;;  %v2741_v6 = vld [vmem:[%s14699_s13 + $0x1b8] sm:$0xff]  ;;  %v10515_v8 = vpack.c.bf16 %v2706_v62, %v2690_v61  ;;  %v10523_v9 = vpack.c.bf16 %v2708_v1, %v2692_v0  ;;  %v2746_v61 = vld [vmem:[%s14699_s13 + $0x1e0] sm:$0xff]  ;;  %v2732_v0 = vld [vmem:[%s14699_s13 + $0x170] sm:$0xff] }
 0x558   : > { %v2748_v1 = vld [vmem:[%s14699_s13 + $0x1f0] sm:$0xff] }
 0x559   : > { %v2636_v11 = vpop.f32.mrb[20].mxu1 }
 0x55a   : > { %v2645_v12 = vsel %vm771_vm1, %v2636_v11, 0.0  ;;  %v10133_v14 = vpop.f32.mrb[21].mxu1  ;;  %v2738_v11 = vld [vmem:[%s14699_s13 + $0x1a0] sm:$0xff] }
 0x55b   : > { %v2646_v16 = vadd.f32 %v2645_v12, %v2644_v10  ;;  %v2722_v10 = vld [vmem:[%s14699_s13 + $0x120] sm:$0xff]  ;;  %v10525_v14 = vpack.c.bf16 %v2741_v6, %v2725_v5  ;;  %v3502_v6 = vld [vmem:[%s14701_s15 + $0x288] sm:$0xff] }
 0x55c   : > { %v3501_v5 = vld [vmem:[%s14701_s15 + $0x280] sm:$0xff] }
 0x55d   : > { %v2654_v17 = vadd.f32 %v8668_v13, %v2646_v16  ;;  %v10517_v13 = vpack.c.bf16 %v2739_v3, %v2723_v2  ;;  %v2724_v16 = vld [vmem:[%s14699_s13 + $0x130] sm:$0xff]  ;;  %v3437_v2 = vld [vmem:[%s14701_s15 + $0x80] sm:$0xff]  ;;  %v3438_v3 = vld [vmem:[%s14701_s15 + $0x88] sm:$0xff] }
 0x55f   : > { %v2655_v18 = vadd.f32 %v2654_v17, %v11663_v27  ;;  %v2689_v27 = vld [vmem:[%s14699_s13 + $0x18] sm:$0xff]  ;;  %v2740_v17 = vld [vmem:[%s14699_s13 + $0x1b0] sm:$0xff] }
 0x560   : > { %v10505_v32 = vpack.c.bf16 %v2705_v29, %v2689_v27  ;;  %v2712_v29 = vld [vmem:[%s14699_s13 + $0xd0] sm:$0xff] }
 0x561   : > { %v2658_v19 = vsel %vm771_vm1, %v2655_v18, 0.0  ;;  %v10539_v35 = vpack.c.bf16 %v2712_v29, %v2696_v28  ;;  %v3487_v28 = vld [vmem:[%s14701_s15 + $0x210] sm:$0xff]  ;;  %v3488_v29 = vld [vmem:[%s14701_s15 + $0x218] sm:$0xff] }
 0x562   : > { %2659 = vadd.xlane.f32.xlu1 %v2658_v19  ;;  %10506 = vmatprep.subr.bf16.mxu1 %v10505_v32  ;;  %v2711_v19 = vld [vmem:[%s14699_s13 + $0xc8] sm:$0xff]  ;;  %v2729_v32 = vld [vmem:[%s14699_s13 + $0x158] sm:$0xff] }
 0x563   : > { %10508 = vmatpush1.bf16.msra.mxu1 %v10507_v36  ;;  %v2726_v36 = vld [vmem:[%s14699_s13 + $0x140] sm:$0xff]  ;;  %v10541_v39 = vpack.c.bf16 %v2745_v33, %v2729_v32  ;;  %v3506_v32 = vld [vmem:[%s14701_s15 + $0x2a8] sm:$0xff] }
 0x564   : > { %10510 = vmatprep.subr.bf16.mxu1 %v10509_v44  ;;  %v2701_v44 = vld [vmem:[%s14699_s13 + $0x78] sm:$0xff]  ;;  %v10535_v46 = vpack.c.bf16 %v2742_v37, %v2726_v36  ;;  %v10631_v36 = vpack.c.bf16 %v3488_v29, %v3487_v28 }
 0x565   : > { %v10553_v51 = vpack.c.bf16 %v2717_v45, %v2701_v44  ;;  %v3508_v44 = vld [vmem:[%s14701_s15 + $0x2b8] sm:$0xff] }
 0x567   : > { %10512 = vmatpush1.bf16.msra.mxu1 %v10511_v48  ;;  %v2698_v48 = vld [vmem:[%s14699_s13 + $0x60] sm:$0xff] }
 0x568   : > { %10522 = vmatprep.subr.bf16.mxu1 %v10521_v54  ;;  %v2731_v54 = vld [vmem:[%s14699_s13 + $0x168] sm:$0xff] }
 0x5ef   : > { %v2660_v20 = vpop.xlane.xlu1 %2659 }
 0x5f0   : > { %v2662_v21 = vmul.f32 0.03125, %v2660_v20  ;;  %v2697_v20 = vld [vmem:[%s14699_s13 + $0x58] sm:$0xff] }
 0x5f2   : > { %v2663_v22 = vsub.f32 %v2655_v18, %v2662_v21  ;;  %v2695_v18 = vld [vmem:[%s14699_s13 + $0x48] sm:$0xff]  ;;  %v2713_v21 = vld [vmem:[%s14699_s13 + $0xd8] sm:$0xff] }
 0x5f3   : > { %v10529_v26 = vpack.c.bf16 %v2711_v19, %v2695_v18  ;;  %v10537_v27 = vpack.c.bf16 %v2713_v21, %v2697_v20  ;;  %v3440_v18 = vld [vmem:[%s14701_s15 + $0x98] sm:$0xff]  ;;  %v3503_v19 = vld [vmem:[%s14701_s15 + $0x290] sm:$0xff] }
 0x5f4   : > { %v2664_v23 = vmul.f32 %v2663_v22, %v2663_v22  ;;  %v3504_v20 = vld [vmem:[%s14701_s15 + $0x298] sm:$0xff] }
 0x5f6   : > { %v2665_v24 = vsel %vm771_vm1, %v2664_v23, 0.0  ;;  %v10527_v23 = vpack.c.bf16 %v2740_v17, %v2724_v16  ;;  %v3485_v16 = vld [vmem:[%s14701_s15 + $0x200] sm:$0xff]  ;;  %v3486_v17 = vld [vmem:[%s14701_s15 + $0x208] sm:$0xff] }
 0x5f7   : > { %2666 = vadd.xlane.f32.xlu1 %v2665_v24  ;;  %v2694_v24 = vld [vmem:[%s14699_s13 + $0x40] sm:$0xff] }
 0x5f8   : > { %v10531_v34 = vpack.c.bf16 %v2710_v25, %v2694_v24  ;;  %v10627_v24 = vpack.c.bf16 %v3486_v17, %v3485_v16  ;;  %v3434_v16 = vld [vmem:[%s14701_s15 + $0x68] sm:$0xff] }
 0x684   : > { %v2667_v55 = vpop.xlane.xlu1 %2666 }
 0x685   : > { %v2668_v56 = vmul.f32 0.03125, %v2667_v55  ;;  %v2747_v55 = vld [vmem:[%s14699_s13 + $0x1e8] sm:$0xff] }
 0x686   : > { %v10549_v62 = vpack.c.bf16 %v2747_v55, %v2731_v54  ;;  %v3446_v54 = vld [vmem:[%s14701_s15 + $0xc8] sm:$0xff]  ;;  %v3509_v55 = vld [vmem:[%s14701_s15 + $0x2c0] sm:$0xff] }
 0x687   : > { %v2669_v57 = vadd.f32 1e-05, %v2668_v56  ;;  %v2733_v56 = vld [vmem:[%s14699_s13 + $0x178] sm:$0xff] }
 0x689   : > { %11338 = vrsqrt.f32 %v2669_v57  ;;  %v2749_v57 = vld [vmem:[%s14699_s13 + $0x1f8] sm:$0xff] }
 0x693   : > { %v11339_v59 = vpop.eup %11338 }
 0x694   : > { %v2671_v63 = vmul.f32 %v11339_v59, %v2663_v22  ;;  %v10519_v22 = vpack.c.bf16 %v2738_v11, %v2722_v10  ;;  %v10555_v59 = vpack.c.bf16 %v2716_v53, %v2700_v52  ;;  %v3422_v10 = vld [vmem:[%s14701_s15 + $0x8] sm:$0xff]  ;;  %v10561_v11 = vpack.c.bf16 %v3438_v3, %v3437_v2  ;;  %v3491_v52 = vld [vmem:[%s14701_s15 + $0x230] sm:$0xff]  ;;  %v3492_v53 = vld [vmem:[%s14701_s15 + $0x238] sm:$0xff] }
 0x695   : > { %v3448_v2 = vld [vmem:[%s14701_s15 + $0xd8] sm:$0xff] }
 0x696   : > { %v2678_v7 = vmul.f32 %v8669_v58, %v2671_v63  ;;  %v10547_v58 = vpack.c.bf16 %v2714_v49, %v2698_v48  ;;  %v10557_v63 = vpack.c.bf16 %v2749_v57, %v2733_v56  ;;  %v10635_v48 = vpack.c.bf16 %v3490_v41, %v3489_v40  ;;  %v3510_v56 = vld [vmem:[%s14701_s15 + $0x2c8] sm:$0xff]  ;;  %v3516_v40 = vld [vmem:[%s14701_s15 + $0x2f8] sm:$0xff] }
 0x698   : > { %v12051_v12 = vadd.f32 %v8670_v60, %v2678_v7  ;;  %v2730_v60 = vld [vmem:[%s14699_s13 + $0x160] sm:$0xff] }
 0x699   : > { %v10551_v7 = vpack.c.bf16 %v2746_v61, %v2730_v60  ;;  %v3430_v61 = vld [vmem:[%s14701_s15 + $0x48] sm:$0xff] }
 0x69a   : > { %8671 = vmatmul.mubr.msk.f32.vlgmr.msra.gmra.mrb[26].mxu0 %vm771_vm1, %v12051_v12  ;;  %8672 = vmatmul.mubr.msk.f32.vlgmr.msra.gmra.mrb[22].mxu1 %vm771_vm1, %v12051_v12 }
 0x69b   : > { %10516 = vmatpush1.bf16.msra.mxu0 %v10515_v8  ;;  %10524 = vmatpush1.bf16.msra.mxu1 %v10523_v9  ;;  %v10559_v8 = vpack.c.bf16 %v2748_v1, %v2732_v0  ;;  %v3421_v9 = vld [vmem:[%s14701_s15] sm:$0xff]  ;;  %v3494_v0 = vld [vmem:[%s14701_s15 + $0x248] sm:$0xff]  ;;  %v3447_v1 = vld [vmem:[%s14701_s15 + $0xd0] sm:$0xff] }
 0x69c   : > { %10518 = vmatprep.subr.bf16.mxu0 %v10517_v13  ;;  %10526 = vmatprep.subr.bf16.mxu1 %v10525_v14  ;;  %v3439_v13 = vld [vmem:[%s14701_s15 + $0x90] sm:$0xff]  ;;  %v10625_v14 = vpack.c.bf16 %v3502_v6, %v3501_v5  ;;  %v10563_v21 = vpack.c.bf16 %v3422_v10, %v3421_v9  ;;  %v10581_v6 = vpack.c.bf16 %v3448_v2, %v3447_v1  ;;  %v3449_v9 = vld [vmem:[%s14701_s15 + $0xe0] sm:$0xff]  ;;  %v3450_v10 = vld [vmem:[%s14701_s15 + $0xe8] sm:$0xff] }
 0x69d   : > { %3043 = vmatprep.mubr.f32.mxu0 %v11433_v15  ;;  %3114 = vmatprep.mubr.f32.mxu1 %v11433_v15  ;;  %v10565_v25 = vpack.c.bf16 %v3440_v18, %v3439_v13  ;;  %v10585_v13 = vpack.c.bf16 %v3450_v10, %v3449_v9  ;;  %v3511_v18 = vld [vmem:[%s14701_s15 + $0x2d0] sm:$0xff] }
 0x69f   : > { %10520 = vmatpush1.bf16.msra.mxu0 %v10519_v22  ;;  %10528 = vmatpush1.bf16.msra.mxu1 %v10527_v23  ;;  %v3423_v22 = vld [vmem:[%s14701_s15 + $0x10] sm:$0xff]  ;;  %v3424_v23 = vld [vmem:[%s14701_s15 + $0x18] sm:$0xff] }
 0x6a0   : > { %10530 = vmatprep.subr.bf16.mxu0 %v10529_v26  ;;  %10538 = vmatprep.subr.bf16.mxu1 %v10537_v27  ;;  %v3441_v26 = vld [vmem:[%s14701_s15 + $0xa0] sm:$0xff]  ;;  %v10629_v27 = vpack.c.bf16 %v3504_v20, %v3503_v19  ;;  %v10567_v33 = vpack.c.bf16 %v3424_v23, %v3423_v22  ;;  %v3512_v19 = vld [vmem:[%s14701_s15 + $0x2d8] sm:$0xff]  ;;  %v3495_v23 = vld [vmem:[%s14701_s15 + $0x250] sm:$0xff] }
 0x6a1   : > { %v10569_v37 = vpack.c.bf16 %v3442_v30, %v3441_v26  ;;  %v10645_v20 = vpack.c.bf16 %v3512_v19, %v3511_v18  ;;  %v3452_v22 = vld [vmem:[%s14701_s15 + $0xf8] sm:$0xff]  ;;  %v3435_v26 = vld [vmem:[%s14701_s15 + $0x70] sm:$0xff]  ;;  %v3513_v30 = vld [vmem:[%s14701_s15 + $0x2e0] sm:$0xff] }
 0x6a2   : > { %8673 = vmatmul.mubr.msk.f32.vlgmr.msra.gmra.mrb[28].mxu0 %vm771_vm1, %v12051_v12  ;;  %8674 = vmatmul.mubr.msk.f32.vlgmr.msra.gmra.mrb[24].mxu1 %vm771_vm1, %v12051_v12  ;;  %v3473_v18 = vld [vmem:[%s14701_s15 + $0x1a0] sm:$0xff]  ;;  %v3474_v19 = vld [vmem:[%s14701_s15 + $0x1a8] sm:$0xff] }
 0x6a3   : > { %10532 = vmatpush1.bf16.msra.mxu0 %v10531_v34  ;;  %10540 = vmatpush1.bf16.msra.mxu1 %v10539_v35  ;;  %v3425_v34 = vld [vmem:[%s14701_s15 + $0x20] sm:$0xff]  ;;  %v3426_v35 = vld [vmem:[%s14701_s15 + $0x28] sm:$0xff] }
 0x6a4   : > { %10534 = vmatprep.subr.bf16.mxu0 %v10533_v38  ;;  %10542 = vmatprep.subr.bf16.mxu1 %v10541_v39  ;;  %v3443_v38 = vld [vmem:[%s14701_s15 + $0xb0] sm:$0xff]  ;;  %v10633_v39 = vpack.c.bf16 %v3506_v32, %v3505_v31  ;;  %v10571_v45 = vpack.c.bf16 %v3426_v35, %v3425_v34  ;;  %v3514_v31 = vld [vmem:[%s14701_s15 + $0x2e8] sm:$0xff]  ;;  %v3497_v35 = vld [vmem:[%s14701_s15 + $0x260] sm:$0xff] }
 0x6a5   : > { %3185 = vmatprep.mubr.f32.mxu0 %v11433_v15  ;;  %3256 = vmatprep.mubr.f32.mxu1 %v11433_v15  ;;  %v10573_v49 = vpack.c.bf16 %v3444_v42, %v3443_v38  ;;  %v10649_v32 = vpack.c.bf16 %v3514_v31, %v3513_v30  ;;  %v3470_v34 = vld [vmem:[%s14701_s15 + $0x188] sm:$0xff]  ;;  %v3499_v42 = vld [vmem:[%s14701_s15 + $0x270] sm:$0xff] }
 0x6a6   : > { %v12455_v30 = vld [vmem:[%s14700_s14 + $0x8] sm:$0xff] }
 0x6a7   : > { %10536 = vmatpush1.bf16.msra.mxu0 %v10535_v46  ;;  %10544 = vmatpush1.bf16.msra.mxu1 %v10543_v47  ;;  %v3427_v46 = vld [vmem:[%s14701_s15 + $0x30] sm:$0xff]  ;;  %v3428_v47 = vld [vmem:[%s14701_s15 + $0x38] sm:$0xff]  ;;  %v3458_v31 = vld [vmem:[%s14701_s15 + $0x128] sm:$0xff] }
 0x6a8   : > { %10546 = vmatprep.subr.bf16.mxu0 %v10545_v50  ;;  %10554 = vmatprep.subr.bf16.mxu1 %v10553_v51  ;;  %v3445_v50 = vld [vmem:[%s14701_s15 + $0xc0] sm:$0xff]  ;;  %v10637_v51 = vpack.c.bf16 %v3508_v44, %v3507_v43  ;;  %v10575_v57 = vpack.c.bf16 %v3428_v47, %v3427_v46  ;;  %v3500_v43 = vld [vmem:[%s14701_s15 + $0x278] sm:$0xff]  ;;  %v3566_v46 = vld [vmem:[%s14701_s15 + $0x488] sm:$0xff] }
 0x6a9   : > { %v10577_v60 = vpack.c.bf16 %v3446_v54, %v3445_v50  ;;  %v10655_v44 = vpack.c.bf16 %v3500_v43, %v3499_v42  ;;  %v3552_v42 = vld [vmem:[%s14701_s15 + $0x418] sm:$0xff] }
 0x6aa   : > { %8675 = vmatmul.mubr.msk.f32.vlgmr.msra.gmra.mrb[30].mxu0 %vm771_vm1, %v12051_v12  ;;  %8676 = vmatmul.mubr.msk.f32.vlgmr.msra.gmra.mrb[26].mxu1 %vm771_vm1, %v12051_v12 }
 0x6ab   : > { %10548 = vmatpush1.bf16.msra.mxu0 %v10547_v58  ;;  %10556 = vmatpush1.bf16.msra.mxu1 %v10555_v59  ;;  %v3429_v58 = vld [vmem:[%s14701_s15 + $0x40] sm:$0xff]  ;;  %v10639_v59 = vpack.c.bf16 %v3492_v53, %v3491_v52 }
 0x6ac   : > { %10550 = vmatprep.subr.bf16.mxu0 %v10549_v62  ;;  %10558 = vmatprep.subr.bf16.mxu1 %v10557_v63  ;;  %v10641_v62 = vpack.c.bf16 %v3510_v56, %v3509_v55  ;;  %v3493_v63 = vld [vmem:[%s14701_s15 + $0x240] sm:$0xff]  ;;  %v10579_v3 = vpack.c.bf16 %v3430_v61, %v3429_v58 }
 0x6ad   : > { %3327 = vmatprep.mubr.f32.mxu0 %v11433_v15  ;;  %3398 = vmatprep.mubr.f32.mxu1 %v11433_v15  ;;  %v10643_v5 = vpack.c.bf16 %v3494_v0, %v3493_v63  ;;  %v3453_v63 = vld [vmem:[%s14701_s15 + $0x100] sm:$0xff]  ;;  %v3454_v0 = vld [vmem:[%s14701_s15 + $0x108] sm:$0xff] }
 0x6af   : > { %10552 = vmatpush1.bf16.msra.mxu0 %v10551_v7  ;;  %10560 = vmatpush1.bf16.msra.mxu1 %v10559_v8  ;;  %v3431_v7 = vld [vmem:[%s14701_s15 + $0x50] sm:$0xff]  ;;  %v3432_v8 = vld [vmem:[%s14701_s15 + $0x58] sm:$0xff] }
 0x6b0   : > { %10562 = vmatprep.subr.bf16.mxu1 %v10561_v11  ;;  %10626 = vmatprep.subr.bf16.mxu0 %v10625_v14  ;;  %v10583_v11 = vpack.c.bf16 %v3432_v8, %v3431_v7  ;;  %v3433_v14 = vld [vmem:[%s14701_s15 + $0x60] sm:$0xff]  ;;  %v10595_v8 = vpack.c.bf16 %v3454_v0, %v3453_v63 }
 0x6b1   : > { %v10587_v17 = vpack.c.bf16 %v3434_v16, %v3433_v14  ;;  %v3456_v14 = vld [vmem:[%s14701_s15 + $0x118] sm:$0xff] }
 0x6b2   : > { %8677 = vmatmul.mubr.msk.f32.vlgmr.msra.gmra.mrb[32].mxu0 %vm771_vm1, %v12051_v12  ;;  %8678 = vmatmul.mubr.msk.f32.vlgmr.msra.gmra.mrb[28].mxu1 %vm771_vm1, %v12051_v12 }
 0x6b3   : > { %10564 = vmatpush3.bf16.msra.mxu1 %v10563_v21  ;;  %10628 = vmatpush3.bf16.msra.mxu0 %v10627_v24  ;;  %v3451_v21 = vld [vmem:[%s14701_s15 + $0xf0] sm:$0xff] }
 0x6b4   : > { %10566 = vmatprep.subr.bf16.mxu1 %v10565_v25  ;;  %10630 = vmatprep.subr.bf16.mxu0 %v10629_v27  ;;  %v10589_v24 = vpack.c.bf16 %v3452_v22, %v3451_v21  ;;  %v3496_v25 = vld [vmem:[%s14701_s15 + $0x258] sm:$0xff] }
 0x6b5   : > { %v3436_v27 = vld [vmem:[%s14701_s15 + $0x78] sm:$0xff]  ;;  %v10647_v28 = vpack.c.bf16 %v3496_v25, %v3495_v23  ;;  %v3549_v23 = vld [vmem:[%s14701_s15 + $0x400] sm:$0xff] }
 0x6b6   : > { %v10591_v29 = vpack.c.bf16 %v3436_v27, %v3435_v26  ;;  %v3457_v25 = vld [vmem:[%s14701_s15 + $0x120] sm:$0xff] }
 0x6b7   : > { %10568 = vmatpush3.bf16.msra.mxu1 %v10567_v33  ;;  %10632 = vmatpush3.bf16.msra.mxu0 %v10631_v36  ;;  %v3469_v33 = vld [vmem:[%s14701_s15 + $0x180] sm:$0xff] }
 0x6b8   : > { %10570 = vmatprep.subr.bf16.mxu1 %v10569_v37  ;;  %10634 = vmatprep.subr.bf16.mxu0 %v10633_v39  ;;  %v10593_v36 = vpack.c.bf16 %v3470_v34, %v3469_v33  ;;  %v3498_v37 = vld [vmem:[%s14701_s15 + $0x268] sm:$0xff]  ;;  %v3515_v39 = vld [vmem:[%s14701_s15 + $0x2f0] sm:$0xff]  ;;  %v3568_v34 = vld [vmem:[%s14701_s15 + $0x498] sm:$0xff] }
 0x6b9   : > { %v10651_v38 = vpack.c.bf16 %v3498_v37, %v3497_v35  ;;  %v10653_v41 = vpack.c.bf16 %v3516_v40, %v3515_v39  ;;  %v3475_v35 = vld [vmem:[%s14701_s15 + $0x1b0] sm:$0xff]  ;;  %v10603_v40 = vpack.c.bf16 %v3458_v31, %v3457_v25 }
 0x6ba   : > { %v3555_v25 = vld [vmem:[%s14701_s15 + $0x430] sm:$0xff] }
 0x6bb   : > { %10572 = vmatpush3.bf16.msra.mxu1 %v10571_v45  ;;  %10636 = vmatpush3.bf16.msra.mxu0 %v10635_v48  ;;  %v3565_v45 = vld [vmem:[%s14701_s15 + $0x480] sm:$0xff]  ;;  %v2754_v48 = vlaneseq  ;;  %v3463_v31 = vld [vmem:[%s14701_s15 + $0x150] sm:$0xff] }
 0x6bc   : > { %10574 = vmatprep.subr.bf16.mxu1 %v10573_v49  ;;  %10638 = vmatprep.subr.bf16.mxu0 %v10637_v51  ;;  %v10689_v47 = vpack.c.bf16 %v3566_v46, %v3565_v45  ;;  %v12389_v51 = vld [vmem:[%s14700_s14] sm:$0xff] }
 0x6bd   : > { %v12381_v49 = vshrl.u32 %v2754_v48, 7  ;;  %v3460_v48 = vld [vmem:[%s14701_s15 + $0x138] sm:$0xff] }
 0x6bf   : > { %10576 = vmatpush3.bf16.msra.mxu1 %v10575_v57  ;;  %10640 = vmatpush3.bf16.msra.mxu0 %v10639_v59  ;;  %v12384_v50 = vsub.s32 0, %v12381_v49  ;;  %v12392_v52 = vsub.s32 1, %v12381_v49  ;;  %v12395_v53 = vsub.s32 3, %v12381_v49  ;;  %v12473_v37 = vsub.s32 2, %v12381_v49 }
 0x6c0   : > { %10578 = vmatprep.subr.bf16.mxu1 %v10577_v60  ;;  %10642 = vmatprep.subr.bf16.mxu0 %v10641_v62  ;;  %v12406_v62 = vsub.s32 4, %v12381_v49 }
 0x6c1   : > { %v2757_v54 = vrot.slane %v12389_v51, %v12384_v50  ;;  %v2761_v55 = vrot.slane %v12389_v51, %v12392_v52  ;;  %v2769_v56 = vrot.slane %v12389_v51, %v12395_v53 }
 0x6c2   : > { %v2773_v10 = vrot.slane %v12389_v51, %v12406_v62 }
 0x6c3   : > { %10580 = vmatpush3.bf16.msra.mxu1 %v10579_v3  ;;  %10644 = vmatpush3.bf16.msra.mxu0 %v10643_v5  ;;  %v12415_v3 = vsub.s32 5, %v12381_v49  ;;  %v3471_v5 = vld [vmem:[%s14701_s15 + $0x190] sm:$0xff] }
 0x6c4   : > { %10582 = vmatprep.subr.bf16.mxu1 %v10581_v6  ;;  %10646 = vmatprep.subr.bf16.mxu0 %v10645_v20  ;;  %v3472_v6 = vld [vmem:[%s14701_s15 + $0x198] sm:$0xff] }
 0x6c7   : > { %10584 = vmatpush3.bf16.msra.mxu1 %v10583_v11  ;;  %10648 = vmatpush3.bf16.msra.mxu0 %v10647_v28  ;;  %v10597_v11 = vpack.c.bf16 %v3472_v6, %v3471_v5 }
 0x6c8   : > { %10586 = vmatprep.subr.bf16.mxu1 %v10585_v13  ;;  %10650 = vmatprep.subr.bf16.mxu0 %v10649_v32  ;;  %v3455_v13 = vld [vmem:[%s14701_s15 + $0x110] sm:$0xff] }
 0x6c9   : > { %v10599_v22 = vpack.c.bf16 %v3456_v14, %v3455_v13  ;;  %v3567_v32 = vld [vmem:[%s14701_s15 + $0x490] sm:$0xff] }
 0x6ca   : > { %v10693_v45 = vpack.c.bf16 %v3568_v34, %v3567_v32  ;;  %v3571_v13 = vld [vmem:[%s14701_s15 + $0x4b0] sm:$0xff]  ;;  %v3464_v32 = vld [vmem:[%s14701_s15 + $0x158] sm:$0xff] }
 0x6cb   : > { %10588 = vmatpush3.bf16.msra.mxu1 %v10587_v17  ;;  %10652 = vmatpush3.bf16.msra.mxu0 %v10651_v38  ;;  %v2777_v17 = vrot.slane %v12389_v51, %v12415_v3 }
 0x6cc   : > { %10590 = vmatprep.subr.bf16.mxu1 %v10589_v24  ;;  %10654 = vmatprep.subr.bf16.mxu0 %v10653_v41  ;;  %v3550_v24 = vld [vmem:[%s14701_s15 + $0x408] sm:$0xff]  ;;  %v3551_v41 = vld [vmem:[%s14701_s15 + $0x410] sm:$0xff] }
 0x6cd   : > { %v10691_v39 = vpack.c.bf16 %v3550_v24, %v3549_v23  ;;  %v10695_v63 = vpack.c.bf16 %v3552_v42, %v3551_v41  ;;  %v10615_v42 = vpack.c.bf16 %v3464_v32, %v3463_v31  ;;  %v3562_v31 = vld [vmem:[%s14701_s15 + $0x468] sm:$0xff]  ;;  %v3517_v32 = vld [vmem:[%s14701_s15 + $0x300] sm:$0xff] }
 0x6cf   : > { %10592 = vmatpush3.bf16.msra.mxu1 %v10591_v29  ;;  %10656 = vmatpush3.bf16.msra.mxu0 %v10655_v44  ;;  %v10601_v29 = vpack.c.bf16 %v3474_v19, %v3473_v18  ;;  %v2797_v44 = vrot.slane %v12455_v30, %v12473_v37  ;;  %v3480_v18 = vld [vmem:[%s14701_s15 + $0x1d8] sm:$0xff]  ;;  %v12534_v19 = vsub.s32 6, %v12381_v49 }
 0x6d0   : > { %10594 = vmatprep.subr.bf16.mxu1 %v10593_v36  ;;  %10690 = vmatprep.subr.bf16.mxu0 %v10689_v47  ;;  %v3476_v36 = vld [vmem:[%s14701_s15 + $0x1b8] sm:$0xff]  ;;  %v3459_v47 = vld [vmem:[%s14701_s15 + $0x130] sm:$0xff] }
 0x6d1   : > { %v10605_v46 = vpack.c.bf16 %v3476_v36, %v3475_v35  ;;  %v10607_v0 = vpack.c.bf16 %v3460_v48, %v3459_v47  ;;  %v3574_v35 = vld [vmem:[%s14701_s15 + $0x4c8] sm:$0xff]  ;;  %v3481_v36 = vld [vmem:[%s14701_s15 + $0x1e0] sm:$0xff] }
 0x76d   : > { %v2903_v57 = vpop.f32.mrb[26].mxu0  ;;  %v12403_v58 = vpop.f32.mrb[22].mxu1 }
 0x76e   : > { %v2904_v59 = vadd.f32 %v2903_v57, %v2757_v54  ;;  %v2905_v60 = vpop.f32.mrb[27].mxu0  ;;  %v2976_v61 = vpop.f32.mrb[23].mxu1  ;;  %v3569_v54 = vld [vmem:[%s14701_s15 + $0x4a0] sm:$0xff] }
 0x76f   : > { %v2906_v1 = vadd.f32 %v2905_v60, %v2761_v55  ;;  %v2977_v2 = vadd.f32 %v2976_v61, %v2769_v56  ;;  %v2793_v55 = vrot.slane %v12455_v30, %v12392_v52  ;;  %v3570_v56 = vld [vmem:[%s14701_s15 + $0x4a8] sm:$0xff]  ;;  %v3477_v57 = vld [vmem:[%s14701_s15 + $0x1c0] sm:$0xff] }
 0x770   : > { %v3405_v9 = vmax.f32 %v2904_v59, 0.0  ;;  %v3478_v59 = vld [vmem:[%s14701_s15 + $0x1c8] sm:$0xff] }
 0x771   : > { %v3406_v7 = vmax.f32 %v2906_v1, 0.0  ;;  %v3408_v16 = vmax.f32 %v2977_v2, 0.0  ;;  %v3553_v1 = vld [vmem:[%s14701_s15 + $0x420] sm:$0xff]  ;;  %v3554_v2 = vld [vmem:[%s14701_s15 + $0x428] sm:$0xff] }
 0x772   : > { %v10699_v23 = vpack.c.bf16 %v3554_v2, %v3553_v1 }
 0x773   : > { %3748 = vmatprep.mubr.f32.mxu1 %v3406_v7 }
 0x774   : > { %3749 = vmatmul.mubr.f32.vlgmr.msra.gmra.mrb[30].mxu1 %v3405_v9  ;;  %v10609_v9 = vpack.c.bf16 %v3478_v59, %v3477_v57  ;;  %v3575_v57 = vld [vmem:[%s14701_s15 + $0x4d0] sm:$0xff] }
 0x775   : > { %v3045_v20 = vpop.f32.mrb[28].mxu0  ;;  %v12439_v21 = vpop.f32.mrb[24].mxu1  ;;  %10596 = vmatpush3.bf16.msra.mxu1 %v10595_v8  ;;  %3818 = vmatprep.mubr.f32.mxu1 %v3408_v16  ;;  %v10697_v8 = vpack.c.bf16 %v3570_v56, %v3569_v54  ;;  %v3572_v16 = vld [vmem:[%s14701_s15 + $0x4b8] sm:$0xff]  ;;  %v3466_v56 = vld [vmem:[%s14701_s15 + $0x168] sm:$0xff] }
 0x776   : > { %v3046_v26 = vadd.f32 %v3045_v20, %v2773_v10  ;;  %v3047_v27 = vpop.f32.mrb[29].mxu0  ;;  %v12450_v28 = vpop.f32.mrb[25].mxu1  ;;  %10598 = vmatprep.subr.bf16.mxu1 %v10597_v11  ;;  %v3461_v10 = vld [vmem:[%s14701_s15 + $0x140] sm:$0xff]  ;;  %v3462_v11 = vld [vmem:[%s14701_s15 + $0x148] sm:$0xff]  ;;  %v12537_v20 = vsub.s32 7, %v12381_v49  ;;  %v10701_v49 = vpack.c.bf16 %v3572_v16, %v3571_v13  ;;  %v3467_v13 = vld [vmem:[%s14701_s15 + $0x170] sm:$0xff] }
 0x777   : > { %v3048_v33 = vadd.f32 %v3047_v27, %v2777_v17  ;;  %v3479_v17 = vld [vmem:[%s14701_s15 + $0x1d0] sm:$0xff]  ;;  %v10611_v24 = vpack.c.bf16 %v3462_v11, %v3461_v10  ;;  %v2813_v27 = vrot.slane %v12455_v30, %v12534_v19  ;;  %v3577_v16 = vld [vmem:[%s14701_s15 + $0x4e0] sm:$0xff] }
 0x778   : > { %v3409_v43 = vmax.f32 %v3046_v26, 0.0  ;;  %v3556_v26 = vld [vmem:[%s14701_s15 + $0x438] sm:$0xff]  ;;  %v2817_v34 = vrot.slane %v12455_v30, %v12537_v20 }
 0x779   : > { %v3410_v38 = vmax.f32 %v3048_v33, 0.0  ;;  %10600 = vmatpush3.bf16.msra.mxu1 %v10599_v22  ;;  %v3573_v33 = vld [vmem:[%s14701_s15 + $0x4c0] sm:$0xff]  ;;  %v10703_v41 = vpack.c.bf16 %v3556_v26, %v3555_v25 }
 0x77a   : > { %10602 = vmatprep.subr.bf16.mxu1 %v10601_v29  ;;  %v10613_v29 = vpack.c.bf16 %v3480_v18, %v3479_v17  ;;  %v10705_v48 = vpack.c.bf16 %v3574_v35, %v3573_v33  ;;  %v3578_v17 = vld [vmem:[%s14701_s15 + $0x4e8] sm:$0xff]  ;;  %v3533_v18 = vld [vmem:[%s14701_s15 + $0x380] sm:$0xff] }
 0x77b   : > { %3888 = vmatprep.mubr.f32.mxu0 %v3410_v38  ;;  %v3482_v38 = vld [vmem:[%s14701_s15 + $0x1e8] sm:$0xff]  ;;  %v3561_v26 = vld [vmem:[%s14701_s15 + $0x460] sm:$0xff] }
 0x77c   : > { %3889 = vmatmul.mubr.f32.vlgmr.msra.gmra.mrb[34].mxu0 %v3409_v43  ;;  %v3557_v43 = vld [vmem:[%s14701_s15 + $0x440] sm:$0xff]  ;;  %v10617_v54 = vpack.c.bf16 %v3482_v38, %v3481_v36  ;;  %v3518_v33 = vld [vmem:[%s14701_s15 + $0x308] sm:$0xff]  ;;  %v3535_v36 = vld [vmem:[%s14701_s15 + $0x390] sm:$0xff] }
 0x77d   : > { %10692 = vmatpush3.bf16.msra.mxu0 %v10691_v39  ;;  %v12503_v60 = vpop.f32.mrb[30].mxu0  ;;  %v3258_v61 = vpop.f32.mrb[26].mxu1  ;;  %10604 = vmatpush3.bf16.msra.mxu1 %v10603_v40  ;;  %v3536_v38 = vld [vmem:[%s14701_s15 + $0x398] sm:$0xff] }
 0x77e   : > { %v12511_v5 = vadd.f32 %v3258_v61, %v2797_v44  ;;  %v3189_v6 = vpop.f32.mrb[31].mxu0  ;;  %v12513_v7 = vpop.f32.mrb[27].mxu1  ;;  %10694 = vmatprep.subr.bf16.mxu0 %v10693_v45  ;;  %10606 = vmatprep.subr.bf16.mxu1 %v10605_v46  ;;  %v3558_v44 = vld [vmem:[%s14701_s15 + $0x448] sm:$0xff]  ;;  %v3576_v61 = vld [vmem:[%s14701_s15 + $0x4d8] sm:$0xff] }
 0x77f   : > { %v3190_v14 = vadd.f32 %v3189_v6, %v2793_v55  ;;  %v3465_v55 = vld [vmem:[%s14701_s15 + $0x160] sm:$0xff]  ;;  %v10707_v1 = vpack.c.bf16 %v3558_v44, %v3557_v43  ;;  %v3559_v6 = vld [vmem:[%s14701_s15 + $0x450] sm:$0xff]  ;;  %v10709_v10 = vpack.c.bf16 %v3576_v61, %v3575_v57  ;;  %v2789_v44 = vrot.slane %v12455_v30, %v12384_v50  ;;  %v3630_v61 = vld [vmem:[%s14701_s15 + $0x688] sm:$0xff] }
 0x780   : > { %v10619_v2 = vpack.c.bf16 %v3466_v56, %v3465_v55  ;;  %v3629_v55 = vld [vmem:[%s14701_s15 + $0x680] sm:$0xff]  ;;  %v2809_v56 = vrot.slane %v12455_v30, %v12415_v3  ;;  %v10661_v57 = vpack.c.bf16 %v3536_v38, %v3535_v36  ;;  %v3542_v36 = vld [vmem:[%s14701_s15 + $0x3c8] sm:$0xff] }
 0x781   : > { %v3414_v22 = vmax.f32 %v3190_v14, 0.0  ;;  %10696 = vmatpush3.bf16.msra.mxu0 %v10695_v63  ;;  %10608 = vmatpush3.bf16.msra.mxu1 %v10607_v0  ;;  %v3483_v63 = vld [vmem:[%s14701_s15 + $0x1f0] sm:$0xff]  ;;  %v3484_v0 = vld [vmem:[%s14701_s15 + $0x1f8] sm:$0xff] }
 0x782   : > { %10698 = vmatprep.subr.bf16.mxu0 %v10697_v8  ;;  %10610 = vmatprep.subr.bf16.mxu1 %v10609_v9  ;;  %v3560_v8 = vld [vmem:[%s14701_s15 + $0x458] sm:$0xff]  ;;  %v2765_v9 = vrot.slane %v12389_v51, %v12473_v37  ;;  %v10621_v11 = vpack.c.bf16 %v3484_v0, %v3483_v63  ;;  %v3537_v63 = vld [vmem:[%s14701_s15 + $0x3a0] sm:$0xff]  ;;  %v3538_v0 = vld [vmem:[%s14701_s15 + $0x3a8] sm:$0xff] }
 0x783   : > { %4028 = vmatprep.mubr.f32.mxu0 %v3414_v22  ;;  %v3468_v14 = vld [vmem:[%s14701_s15 + $0x178] sm:$0xff]  ;;  %v3534_v22 = vld [vmem:[%s14701_s15 + $0x388] sm:$0xff] }
 0x784   : > { %v10623_v25 = vpack.c.bf16 %v3468_v14, %v3467_v13  ;;  %v3614_v13 = vld [vmem:[%s14701_s15 + $0x608] sm:$0xff]  ;;  %v3521_v14 = vld [vmem:[%s14701_s15 + $0x320] sm:$0xff] }
 0x785   : > { %10700 = vmatpush3.bf16.msra.mxu0 %v10699_v23  ;;  %v12567_v39 = vpop.f32.mrb[32].mxu0  ;;  %v3400_v40 = vpop.f32.mrb[28].mxu1  ;;  %10612 = vmatpush3.bf16.msra.mxu1 %v10611_v24  ;;  %v2785_v23 = vrot.slane %v12389_v51, %v12537_v20  ;;  %v10711_v24 = vpack.c.bf16 %v3560_v8, %v3559_v6  ;;  %v3188_v8 = vadd.f32 %v12503_v60, %v2789_v44  ;;  %v3522_v60 = vld [vmem:[%s14701_s15 + $0x328] sm:$0xff] }
 0x786   : > { %v12575_v45 = vadd.f32 %v3400_v40, %v2813_v27  ;;  %v12577_v46 = vpop.f32.mrb[33].mxu0  ;;  %v3402_v47 = vpop.f32.mrb[29].mxu1  ;;  %10702 = vmatprep.subr.bf16.mxu0 %v10701_v49  ;;  %10614 = vmatprep.subr.bf16.mxu1 %v10613_v29  ;;  %v2975_v27 = vadd.f32 %v12403_v58, %v2765_v9  ;;  %v10713_v49 = vpack.c.bf16 %v3578_v17, %v3577_v16  ;;  %v3579_v58 = vld [vmem:[%s14701_s15 + $0x4f0] sm:$0xff] }
 0x787   : > { %v12588_v59 = vadd.f32 %v3402_v47, %v2817_v34  ;;  %v10657_v29 = vpack.c.bf16 %v3534_v22, %v3533_v18  ;;  %v3580_v34 = vld [vmem:[%s14701_s15 + $0x4f8] sm:$0xff]  ;;  %v3119_v35 = vadd.f32 %v12450_v28, %v2785_v23  ;;  %v10715_v40 = vpack.c.bf16 %v3562_v31, %v3561_v26  ;;  %v3631_v17 = vld [vmem:[%s14701_s15 + $0x690] sm:$0xff] }
 0x788   : > { %v3564_v28 = vld [vmem:[%s14701_s15 + $0x478] sm:$0xff]  ;;  %v3407_v43 = vmax.f32 %v2975_v27, 0.0  ;;  %v10717_v47 = vpack.c.bf16 %v3580_v34, %v3579_v58  ;;  %v10753_v9 = vpack.c.bf16 %v3630_v61, %v3629_v55  ;;  %v3332_v16 = vadd.f32 %v12577_v46, %v2809_v56  ;;  %v3539_v22 = vld [vmem:[%s14701_s15 + $0x3b0] sm:$0xff]  ;;  %v3633_v58 = vld [vmem:[%s14701_s15 + $0x6a0] sm:$0xff] }
 0x789   : > { %10704 = vmatpush3.bf16.msra.mxu0 %v10703_v41  ;;  %10616 = vmatpush3.bf16.msra.mxu1 %v10615_v42  ;;  %v10659_v41 = vpack.c.bf16 %v3518_v33, %v3517_v32  ;;  %v3563_v42 = vld [vmem:[%s14701_s15 + $0x470] sm:$0xff]  ;;  %v3632_v18 = vld [vmem:[%s14701_s15 + $0x698] sm:$0xff]  ;;  %v3634_v34 = vld [vmem:[%s14701_s15 + $0x6a8] sm:$0xff] }
 0x78a   : > { %10706 = vmatprep.subr.bf16.mxu0 %v10705_v48  ;;  %10618 = vmatprep.subr.bf16.mxu1 %v10617_v54  ;;  %v3519_v48 = vld [vmem:[%s14701_s15 + $0x310] sm:$0xff]  ;;  %v3520_v54 = vld [vmem:[%s14701_s15 + $0x318] sm:$0xff]  ;;  %v10757_v26 = vpack.c.bf16 %v3632_v18, %v3631_v17  ;;  %v3418_v31 = vmax.f32 %v3332_v16, 0.0  ;;  %v3621_v17 = vld [vmem:[%s14701_s15 + $0x640] sm:$0xff] }
 0x78b   : > { %v10663_v6 = vpack.c.bf16 %v3520_v54, %v3519_v48  ;;  %v3540_v46 = vld [vmem:[%s14701_s15 + $0x3b8] sm:$0xff]  ;;  %v3615_v27 = vld [vmem:[%s14701_s15 + $0x610] sm:$0xff]  ;;  %v3622_v18 = vld [vmem:[%s14701_s15 + $0x648] sm:$0xff] }
 0x78c   : > { %v10669_v32 = vpack.c.bf16 %v3540_v46, %v3539_v22  ;;  %v3524_v33 = vld [vmem:[%s14701_s15 + $0x338] sm:$0xff]  ;;  %v3635_v48 = vld [vmem:[%s14701_s15 + $0x6b0] sm:$0xff]  ;;  %v3529_v22 = vld [vmem:[%s14701_s15 + $0x360] sm:$0xff] }
 0x78d   : > { %10708 = vmatpush3.bf16.msra.mxu0 %v10707_v1  ;;  %10620 = vmatpush3.bf16.msra.mxu1 %v10619_v2  ;;  %v3412_v1 = vmax.f32 %v3119_v35, 0.0  ;;  %v10719_v2 = vpack.c.bf16 %v3564_v28, %v3563_v42  ;;  %v3541_v35 = vld [vmem:[%s14701_s15 + $0x3c0] sm:$0xff]  ;;  %v3618_v28 = vld [vmem:[%s14701_s15 + $0x628] sm:$0xff]  ;;  %v3636_v54 = vld [vmem:[%s14701_s15 + $0x6b8] sm:$0xff] }
 0x78e   : > { %10710 = vmatprep.subr.bf16.mxu0 %v10709_v10  ;;  %10622 = vmatprep.subr.bf16.mxu1 %v10621_v11  ;;  %v10665_v10 = vpack.c.bf16 %v3538_v0, %v3537_v63  ;;  %v3613_v11 = vld [vmem:[%s14701_s15 + $0x600] sm:$0xff]  ;;  %v10673_v44 = vpack.c.bf16 %v3542_v36, %v3541_v35  ;;  %v3543_v55 = vld [vmem:[%s14701_s15 + $0x3d0] sm:$0xff]  ;;  %v3544_v56 = vld [vmem:[%s14701_s15 + $0x3d8] sm:$0xff]  ;;  %v10765_v63 = vpack.c.bf16 %v3636_v54, %v3635_v48 }
 0x78f   : > { %v10755_v23 = vpack.c.bf16 %v3614_v13, %v3613_v11  ;;  %v3617_v42 = vld [vmem:[%s14701_s15 + $0x620] sm:$0xff]  ;;  %v3619_v0 = vld [vmem:[%s14701_s15 + $0x630] sm:$0xff]  ;;  %v3546_v13 = vld [vmem:[%s14701_s15 + $0x3e8] sm:$0xff] }
 0x790   : > { %v3545_v11 = vld [vmem:[%s14701_s15 + $0x3e0] sm:$0xff]  ;;  %v3532_v36 = vld [vmem:[%s14701_s15 + $0x378] sm:$0xff]  ;;  %v3626_v48 = vld [vmem:[%s14701_s15 + $0x668] sm:$0xff] }
 0x791   : > { %10712 = vmatpush3.bf16.msra.mxu0 %v10711_v24  ;;  %10624 = vmatpush3.bf16.msra.mxu1 %v10623_v25  ;;  %v3413_v24 = vmax.f32 %v3188_v8, 0.0  ;;  %v10667_v25 = vpack.c.bf16 %v3522_v60, %v3521_v14  ;;  %v3528_v8 = vld [vmem:[%s14701_s15 + $0x358] sm:$0xff]  ;;  %v10681_v46 = vpack.c.bf16 %v3546_v13, %v3545_v11 }
 0x792   : > { %10714 = vmatprep.subr.bf16.mxu0 %v10713_v49  ;;  %10658 = vmatprep.subr.bf16.mxu1 %v10657_v29  ;;  %v3616_v49 = vld [vmem:[%s14701_s15 + $0x618] sm:$0xff]  ;;  %v3523_v29 = vld [vmem:[%s14701_s15 + $0x330] sm:$0xff] }
 0x793   : > { %v10759_v38 = vpack.c.bf16 %v3616_v49, %v3615_v27  ;;  %v3548_v27 = vld [vmem:[%s14701_s15 + $0x3f8] sm:$0xff]  ;;  %v10771_v49 = vpack.c.bf16 %v3622_v18, %v3621_v17  ;;  %v3602_v17 = vld [vmem:[%s14701_s15 + $0x5a8] sm:$0xff] }
 0x794   : > { %3819 = vmatmul.mubr.f32.vlgmr.msra.gmra.mrb[32].mxu1 %v3407_v43  ;;  %v3525_v43 = vld [vmem:[%s14701_s15 + $0x340] sm:$0xff] }
 0x795   : > { %10716 = vmatpush3.bf16.msra.mxu0 %v10715_v40  ;;  %10660 = vmatpush3.bf16.msra.mxu1 %v10659_v41  ;;  %v10671_v40 = vpack.c.bf16 %v3524_v33, %v3523_v29  ;;  %v10761_v41 = vpack.c.bf16 %v3634_v34, %v3633_v58  ;;  %v3624_v33 = vld [vmem:[%s14701_s15 + $0x658] sm:$0xff]  ;;  %v3531_v58 = vld [vmem:[%s14701_s15 + $0x370] sm:$0xff]  ;;  %v2781_v34 = vrot.slane %v12389_v51, %v12534_v19  ;;  %v3597_v51 = vld [vmem:[%s14701_s15 + $0x580] sm:$0xff] }
 0x796   : > { %3958 = vmatprep.mubr.f32.mxu1 %v3412_v1  ;;  %10718 = vmatprep.subr.bf16.mxu0 %v10717_v47  ;;  %v3526_v47 = vld [vmem:[%s14701_s15 + $0x348] sm:$0xff]  ;;  %v3620_v1 = vld [vmem:[%s14701_s15 + $0x638] sm:$0xff] }
 0x797   : > { %10662 = vmatprep.subr.bf16.mxu1 %v10661_v57  ;;  %v10763_v57 = vpack.c.bf16 %v3618_v28, %v3617_v42  ;;  %v10675_v61 = vpack.c.bf16 %v3526_v47, %v3525_v43  ;;  %v10767_v14 = vpack.c.bf16 %v3620_v1, %v3619_v0  ;;  %v3598_v42 = vld [vmem:[%s14701_s15 + $0x588] sm:$0xff]  ;;  %v10687_v43 = vpack.c.bf16 %v3532_v36, %v3531_v58  ;;  %v3625_v47 = vld [vmem:[%s14701_s15 + $0x660] sm:$0xff]  ;;  %v3599_v0 = vld [vmem:[%s14701_s15 + $0x590] sm:$0xff] }
 0x798   : > { %v3117_v54 = vadd.f32 %v12439_v21, %v2781_v34  ;;  %v3644_v21 = vld [vmem:[%s14701_s15 + $0x6f8] sm:$0xff]  ;;  %v3606_v58 = vld [vmem:[%s14701_s15 + $0x5c8] sm:$0xff]  ;;  %v3589_v36 = vld [vmem:[%s14701_s15 + $0x540] sm:$0xff] }
 0x799   : > { %10720 = vmatpush3.bf16.msra.mxu0 %v10719_v2  ;;  %10664 = vmatpush3.bf16.msra.mxu1 %v10663_v6  ;;  %v3527_v2 = vld [vmem:[%s14701_s15 + $0x350] sm:$0xff]  ;;  %v10677_v6 = vpack.c.bf16 %v3544_v56, %v3543_v55  ;;  %v10721_v55 = vpack.c.bf16 %v3598_v42, %v3597_v51  ;;  %v3581_v56 = vld [vmem:[%s14701_s15 + $0x500] sm:$0xff]  ;;  %v3600_v1 = vld [vmem:[%s14701_s15 + $0x598] sm:$0xff] }
 0x79a   : > { %10754 = vmatprep.subr.bf16.mxu0 %v10753_v9  ;;  %10666 = vmatprep.subr.bf16.mxu1 %v10665_v10  ;;  %v3637_v9 = vld [vmem:[%s14701_s15 + $0x6c0] sm:$0xff]  ;;  %v3638_v10 = vld [vmem:[%s14701_s15 + $0x6c8] sm:$0xff]  ;;  %v10679_v16 = vpack.c.bf16 %v3528_v8, %v3527_v2  ;;  %v10779_v2 = vpack.c.bf16 %v3626_v48, %v3625_v47  ;;  %v3627_v8 = vld [vmem:[%s14701_s15 + $0x670] sm:$0xff]  ;;  %v10725_v13 = vpack.c.bf16 %v3600_v1, %v3599_v0 }
 0x79b   : > { %v10769_v60 = vpack.c.bf16 %v3638_v10, %v3637_v9  ;;  %v3628_v9 = vld [vmem:[%s14701_s15 + $0x678] sm:$0xff]  ;;  %v3411_v10 = vmax.f32 %v3117_v54, 0.0  ;;  %v3610_v47 = vld [vmem:[%s14701_s15 + $0x5e8] sm:$0xff]  ;;  %v3595_v0 = vld [vmem:[%s14701_s15 + $0x570] sm:$0xff] }
 0x79c   : > { %4029 = vmatmul.mubr.f32.vlgmr.msra.gmra.mrb[36].mxu0 %v3413_v24  ;;  %v3639_v24 = vld [vmem:[%s14701_s15 + $0x6d0] sm:$0xff]  ;;  %v10783_v18 = vpack.c.bf16 %v3628_v9, %v3627_v8  ;;  %v3596_v1 = vld [vmem:[%s14701_s15 + $0x578] sm:$0xff]  ;;  %v3645_v9 = vld [vmem:[%s14701_s15 + $0x700] sm:$0xff] }
 0x79d   : > { %10756 = vmatpush3.bf16.msra.mxu0 %v10755_v23  ;;  %4168 = vmatprep.mubr.f32.mxu0 %v3418_v31  ;;  %v3530_v23 = vld [vmem:[%s14701_s15 + $0x368] sm:$0xff] }
 0x79e   : > { %10668 = vmatpush3.bf16.msra.mxu1 %v10667_v25  ;;  %10758 = vmatprep.subr.bf16.mxu0 %v10757_v26  ;;  %v3640_v25 = vld [vmem:[%s14701_s15 + $0x6d8] sm:$0xff]  ;;  %v3547_v26 = vld [vmem:[%s14701_s15 + $0x3f0] sm:$0xff]  ;;  %v10683_v29 = vpack.c.bf16 %v3530_v23, %v3529_v22 }
 0x79f   : > { %10670 = vmatprep.subr.bf16.mxu1 %v10669_v32  ;;  %v10773_v31 = vpack.c.bf16 %v3640_v25, %v3639_v24  ;;  %v3623_v32 = vld [vmem:[%s14701_s15 + $0x650] sm:$0xff]  ;;  %v10685_v35 = vpack.c.bf16 %v3548_v27, %v3547_v26  ;;  %v3585_v24 = vld [vmem:[%s14701_s15 + $0x520] sm:$0xff]  ;;  %v3586_v25 = vld [vmem:[%s14701_s15 + $0x528] sm:$0xff] }
 0x7a0   : > { %v10775_v28 = vpack.c.bf16 %v3624_v33, %v3623_v32  ;;  %v3603_v26 = vld [vmem:[%s14701_s15 + $0x5b0] sm:$0xff]  ;;  %v3588_v32 = vld [vmem:[%s14701_s15 + $0x538] sm:$0xff]  ;;  %v3605_v33 = vld [vmem:[%s14701_s15 + $0x5c0] sm:$0xff] }
 0x7a1   : > { %10760 = vmatpush3.bf16.msra.mxu0 %v10759_v38  ;;  %v3641_v38 = vld [vmem:[%s14701_s15 + $0x6e0] sm:$0xff] }
 0x7a2   : > { %10672 = vmatpush3.bf16.msra.mxu1 %v10671_v40  ;;  %10762 = vmatprep.subr.bf16.mxu0 %v10761_v41  ;;  %v3642_v40 = vld [vmem:[%s14701_s15 + $0x6e8] sm:$0xff]  ;;  %v2801_v41 = vrot.slane %v12455_v30, %v12395_v53 }
 0x7a3   : > { %10674 = vmatprep.subr.bf16.mxu1 %v10673_v44  ;;  %v10777_v44 = vpack.c.bf16 %v3642_v40, %v3641_v38  ;;  %v3590_v38 = vld [vmem:[%s14701_s15 + $0x548] sm:$0xff]  ;;  %v3607_v40 = vld [vmem:[%s14701_s15 + $0x5d0] sm:$0xff] }
 0x7a4   : > { %v10739_v51 = vpack.c.bf16 %v3590_v38, %v3589_v36  ;;  %v3671_v36 = vld [vmem:[%s14701_s15 + $0x7d0] sm:$0xff]  ;;  %v3672_v38 = vld [vmem:[%s14701_s15 + $0x7d8] sm:$0xff] }
 0x7a5   : > { %10764 = vmatpush3.bf16.msra.mxu0 %v10763_v57  ;;  %v3582_v57 = vld [vmem:[%s14701_s15 + $0x508] sm:$0xff] }
 0x7a6   : > { %10676 = vmatpush3.bf16.msra.mxu1 %v10675_v61  ;;  %10766 = vmatprep.subr.bf16.mxu0 %v10765_v63  ;;  %v3643_v61 = vld [vmem:[%s14701_s15 + $0x6f0] sm:$0xff]  ;;  %v3261_v63 = vadd.f32 %v12513_v7, %v2801_v41  ;;  %v10723_v7 = vpack.c.bf16 %v3582_v57, %v3581_v56  ;;  %v3608_v41 = vld [vmem:[%s14701_s15 + $0x5d8] sm:$0xff]  ;;  %v3594_v56 = vld [vmem:[%s14701_s15 + $0x568] sm:$0xff] }
 0x7a7   : > { %10678 = vmatprep.subr.bf16.mxu1 %v10677_v6  ;;  %v2805_v6 = vrot.slane %v12455_v30, %v12406_v62  ;;  %v10781_v11 = vpack.c.bf16 %v3644_v21, %v3643_v61  ;;  %v3584_v30 = vld [vmem:[%s14701_s15 + $0x518] sm:$0xff]  ;;  %v10741_v42 = vpack.c.bf16 %v3608_v41, %v3607_v40  ;;  %v3611_v57 = vld [vmem:[%s14701_s15 + $0x5f0] sm:$0xff]  ;;  %v10805_v41 = vpack.c.bf16 %v3672_v38, %v3671_v36 }
 0x7a8   : > { %v3612_v61 = vld [vmem:[%s14701_s15 + $0x5f8] sm:$0xff] }
 0x7a9   : > { %10768 = vmatpush3.bf16.msra.mxu0 %v10767_v14  ;;  %v3583_v14 = vld [vmem:[%s14701_s15 + $0x510] sm:$0xff]  ;;  %v3330_v22 = vadd.f32 %v12567_v39, %v2805_v6  ;;  %v3604_v39 = vld [vmem:[%s14701_s15 + $0x5b8] sm:$0xff]  ;;  %v10749_v21 = vpack.c.bf16 %v3612_v61, %v3611_v57  ;;  %v3662_v6 = vld [vmem:[%s14701_s15 + $0x788] sm:$0xff] }
 0x7aa   : > { %10680 = vmatpush3.bf16.msra.mxu1 %v10679_v16  ;;  %10770 = vmatprep.subr.bf16.mxu0 %v10769_v60  ;;  %v3416_v16 = vmax.f32 %v3261_v63, 0.0  ;;  %v3601_v60 = vld [vmem:[%s14701_s15 + $0x5a0] sm:$0xff] }
 0x7ab   : > { %10682 = vmatprep.subr.bf16.mxu1 %v10681_v46  ;;  %v10727_v46 = vpack.c.bf16 %v3584_v30, %v3583_v14  ;;  %v10729_v23 = vpack.c.bf16 %v3602_v17, %v3601_v60  ;;  %v3417_v27 = vmax.f32 %v3330_v22, 0.0  ;;  %v3415_v30 = vmax.f32 %v12511_v5, 0.0  ;;  %v3647_v60 = vld [vmem:[%s14701_s15 + $0x710] sm:$0xff]  ;;  %v3648_v17 = vld [vmem:[%s14701_s15 + $0x718] sm:$0xff]  ;;  %v3665_v22 = vld [vmem:[%s14701_s15 + $0x7a0] sm:$0xff] }
 0x7ac   : > { %v3666_v5 = vld [vmem:[%s14701_s15 + $0x7a8] sm:$0xff] }
 0x7ad   : > { %10772 = vmatpush3.bf16.msra.mxu0 %v10771_v49  ;;  %v10731_v49 = vpack.c.bf16 %v3586_v25, %v3585_v24  ;;  %v3649_v24 = vld [vmem:[%s14701_s15 + $0x720] sm:$0xff]  ;;  %v3667_v25 = vld [vmem:[%s14701_s15 + $0x7b0] sm:$0xff] }
 0x7ae   : > { %10684 = vmatpush3.bf16.msra.mxu1 %v10683_v29  ;;  %10774 = vmatprep.subr.bf16.mxu0 %v10773_v31  ;;  %v10733_v29 = vpack.c.bf16 %v3604_v39, %v3603_v26  ;;  %v3587_v31 = vld [vmem:[%s14701_s15 + $0x530] sm:$0xff]  ;;  %v3668_v26 = vld [vmem:[%s14701_s15 + $0x7b8] sm:$0xff] }
 0x7af   : > { %10686 = vmatprep.subr.bf16.mxu1 %v10685_v35  ;;  %v10735_v34 = vpack.c.bf16 %v3588_v32, %v3587_v31  ;;  %v10737_v35 = vpack.c.bf16 %v3606_v58, %v3605_v33  ;;  %v3669_v31 = vld [vmem:[%s14701_s15 + $0x7c0] sm:$0xff]  ;;  %v3670_v32 = vld [vmem:[%s14701_s15 + $0x7c8] sm:$0xff] }
 0x7b0   : > { %v10801_v58 = vpack.c.bf16 %v3670_v32, %v3669_v31 }
 0x7b1   : > { %10776 = vmatpush3.bf16.msra.mxu0 %v10775_v28  ;;  %v3591_v28 = vld [vmem:[%s14701_s15 + $0x550] sm:$0xff] }
 0x7b2   : > { %10688 = vmatpush3.bf16.msra.mxu1 %v10687_v43  ;;  %10778 = vmatprep.subr.bf16.mxu0 %v10777_v44  ;;  %v3592_v43 = vld [vmem:[%s14701_s15 + $0x558] sm:$0xff]  ;;  %v3609_v44 = vld [vmem:[%s14701_s15 + $0x5e0] sm:$0xff] }
 0x7b3   : > { %10722 = vmatprep.subr.bf16.mxu1 %v10721_v55  ;;  %v10743_v48 = vpack.c.bf16 %v3592_v43, %v3591_v28  ;;  %v10745_v54 = vpack.c.bf16 %v3610_v47, %v3609_v44  ;;  %v3593_v55 = vld [vmem:[%s14701_s15 + $0x560] sm:$0xff]  ;;  %v3674_v43 = vld [vmem:[%s14701_s15 + $0x7e8] sm:$0xff] }
 0x7b4   : > { %v10747_v63 = vpack.c.bf16 %v3594_v56, %v3593_v55  ;;  %v3673_v28 = vld [vmem:[%s14701_s15 + $0x7e0] sm:$0xff]  ;;  %v3675_v55 = vld [vmem:[%s14701_s15 + $0x7f0] sm:$0xff]  ;;  %v3676_v56 = vld [vmem:[%s14701_s15 + $0x7f8] sm:$0xff] }
 0x7b5   : > { %3959 = vmatmul.mubr.f32.vlgmr.msra.gmra.mrb[34].mxu1 %v3411_v10  ;;  %10780 = vmatpush3.bf16.msra.mxu0 %v10779_v2  ;;  %v3661_v2 = vld [vmem:[%s14701_s15 + $0x780] sm:$0xff]  ;;  %v3646_v10 = vld [vmem:[%s14701_s15 + $0x708] sm:$0xff]  ;;  %v10809_v47 = vpack.c.bf16 %v3674_v43, %v3673_v28  ;;  %v10813_v61 = vpack.c.bf16 %v3676_v56, %v3675_v55  ;;  %v8684_v55 = vld [vmem:[%s14749_s0 + $0x90] sm:$0xff] }
 0x7b6   : > { %10724 = vmatpush3.bf16.msra.mxu1 %v10723_v7  ;;  %4098 = vmatprep.mubr.f32.mxu1 %v3416_v16  ;;  %v10751_v7 = vpack.c.bf16 %v3596_v1, %v3595_v0  ;;  %v10785_v8 = vpack.c.bf16 %v3662_v6, %v3661_v2  ;;  %v10787_v14 = vpack.c.bf16 %v3646_v10, %v3645_v9  ;;  %v3419_v1 = vmax.f32 %v12575_v45, 0.0  ;;  %v8682_v43 = vld [vmem:[%s14749_s0 + $0x80] sm:$0xff]  ;;  %v8685_v56 = vld [vmem:[%s14749_s0 + $0x98] sm:$0xff] }
 0x7b7   : > { %10782 = vmatprep.subr.bf16.mxu0 %v10781_v11  ;;  %10726 = vmatprep.subr.bf16.mxu1 %v10725_v13  ;;  %v3663_v11 = vld [vmem:[%s14701_s15 + $0x790] sm:$0xff]  ;;  %v3664_v13 = vld [vmem:[%s14701_s15 + $0x798] sm:$0xff] }
 0x7b8   : > { %v10789_v16 = vpack.c.bf16 %v3664_v13, %v3663_v11  ;;  %v8679_v11 = vld [vmem:[%s14702_s16] ss:$0 sm:$0xff] }
 0x7b9   : > { %10784 = vmatpush3.bf16.msra.mxu0 %v10783_v18  ;;  %v3420_v18 = vmax.f32 %v12588_v59, 0.0  ;;  %v3650_v59 = vld [vmem:[%s14701_s15 + $0x728] sm:$0xff] }
 0x7ba   : > { %10728 = vmatpush3.bf16.msra.mxu1 %v10727_v46  ;;  %10817 = vmatprep.subr.bf16.mxu0 %v11431_v4  ;;  %v10791_v46 = vpack.c.bf16 %v3648_v17, %v3647_v60  ;;  %v10795_v39 = vpack.c.bf16 %v3650_v59, %v3649_v24 }
 0x7bb   : > { %10730 = vmatprep.subr.bf16.mxu1 %v10729_v23  ;;  %v10793_v23 = vpack.c.bf16 %v3666_v5, %v3665_v22 }
 0x7bc   : > { %4169 = vmatmul.mubr.f32.vlgmr.msra.gmra.mrb[38].mxu0 %v3417_v27  ;;  %v10797_v27 = vpack.c.bf16 %v3668_v26, %v3667_v25 }
 0x7bd   : > { %10142 = vmatprep.mubr.msk.f32.mxu0 %vm11432_vm0, %v11433_v15 }
 0x7be   : > { %10732 = vmatpush3.bf16.msra.mxu1 %v10731_v49  ;;  %v3651_v49 = vld [vmem:[%s14701_s15 + $0x730] sm:$0xff] }
 0x7bf   : > { %10734 = vmatprep.subr.bf16.mxu1 %v10733_v29  ;;  %v3652_v29 = vld [vmem:[%s14701_s15 + $0x738] sm:$0xff] }
 0x7c0   : > { %v10799_v33 = vpack.c.bf16 %v3652_v29, %v3651_v49 }
 0x7c2   : > { %10736 = vmatpush3.bf16.msra.mxu1 %v10735_v34  ;;  %v3653_v34 = vld [vmem:[%s14701_s15 + $0x740] sm:$0xff] }
 0x7c3   : > { %10738 = vmatprep.subr.bf16.mxu1 %v10737_v35  ;;  %v3654_v35 = vld [vmem:[%s14701_s15 + $0x748] sm:$0xff] }
 0x7c4   : > { %v10803_v40 = vpack.c.bf16 %v3654_v35, %v3653_v34 }
 0x7c6   : > { %10740 = vmatpush3.bf16.msra.mxu1 %v10739_v51  ;;  %v3655_v51 = vld [vmem:[%s14701_s15 + $0x750] sm:$0xff] }
 0x7c7   : > { %10742 = vmatprep.subr.bf16.mxu1 %v10741_v42  ;;  %v3656_v42 = vld [vmem:[%s14701_s15 + $0x758] sm:$0xff] }
 0x7c8   : > { %v10807_v44 = vpack.c.bf16 %v3656_v42, %v3655_v51 }
 0x7ca   : > { %10744 = vmatpush3.bf16.msra.mxu1 %v10743_v48  ;;  %v3657_v48 = vld [vmem:[%s14701_s15 + $0x760] sm:$0xff] }
 0x7cb   : > { %10746 = vmatprep.subr.bf16.mxu1 %v10745_v54  ;;  %v3658_v54 = vld [vmem:[%s14701_s15 + $0x768] sm:$0xff] }
 0x7cc   : > { %v10811_v57 = vpack.c.bf16 %v3658_v54, %v3657_v48  ;;  %v8687_v48 = vld [vmem:[%s14749_s0 + $0xa8] sm:$0xff] }
 0x7ce   : > { %10748 = vmatpush3.bf16.msra.mxu1 %v10747_v63  ;;  %v3659_v63 = vld [vmem:[%s14701_s15 + $0x770] sm:$0xff] }
 0x7cf   : > { %10750 = vmatprep.subr.bf16.mxu1 %v10749_v21  ;;  %v3660_v21 = vld [vmem:[%s14701_s15 + $0x778] sm:$0xff] }
 0x7d0   : > { %v10815_v0 = vpack.c.bf16 %v3660_v21, %v3659_v63  ;;  %v8689_v63 = vld [vmem:[%s14749_s0 + $0xb8] sm:$0xff] }
 0x7d2   : > { %10752 = vmatpush3.bf16.msra.mxu1 %v10751_v7 }
 0x7d3   : > { %10786 = vmatprep.subr.bf16.mxu1 %v10785_v8 }
 0x7d5   : > { %4099 = vmatmul.mubr.f32.vlgmr.msra.gmra.mrb[36].mxu1 %v3415_v30 }
 0x7d6   : > { %10788 = vmatpush3.bf16.msra.mxu1 %v10787_v14  ;;  %4238 = vmatprep.mubr.f32.mxu1 %v3420_v18 }
 0x7d7   : > { %10790 = vmatprep.subr.bf16.mxu1 %v10789_v16 }
 0x7da   : > { %10792 = vmatpush3.bf16.msra.mxu1 %v10791_v46 }
 0x7db   : > { %10794 = vmatprep.subr.bf16.mxu1 %v10793_v23 }
 0x7de   : > { %10796 = vmatpush3.bf16.msra.mxu1 %v10795_v39 }
 0x7df   : > { %10798 = vmatprep.subr.bf16.mxu1 %v10797_v27 }
 0x7e2   : > { %10800 = vmatpush3.bf16.msra.mxu1 %v10799_v33 }
 0x7e3   : > { %10802 = vmatprep.subr.bf16.mxu1 %v10801_v58 }
 0x7e6   : > { %10804 = vmatpush3.bf16.msra.mxu1 %v10803_v40 }
 0x7e7   : > { %10806 = vmatprep.subr.bf16.mxu1 %v10805_v41 }
 0x7ea   : > { %10808 = vmatpush3.bf16.msra.mxu1 %v10807_v44  ;;  %v8683_v44 = vld [vmem:[%s14749_s0 + $0x88] sm:$0xff] }
 0x7eb   : > { %10810 = vmatprep.subr.bf16.mxu1 %v10809_v47  ;;  %v10818_v47 = vpack.c.bf16 %v8683_v44, %v8682_v43  ;;  %v8725_v43 = vld [vmem:[%s14753_s26 + $0xf8] sm:$0xff] }
 0x7ed   : > { %10819 = vmatpush3.bf16.msra.mxu0 %v10818_v47  ;;  %v8738_v47 = vld [vmem:[%s14754_s1 + $0x80] sm:$0xff] }
 0x7ee   : > { %10812 = vmatpush3.bf16.msra.mxu1 %v10811_v57  ;;  %10820 = vmatprep.subr.bf16.mxu0 %v11431_v4  ;;  %v8688_v57 = vld [vmem:[%s14749_s0 + $0xb0] sm:$0xff] }
 0x7ef   : > { %10814 = vmatprep.subr.bf16.mxu1 %v10813_v61  ;;  %v10821_v61 = vpack.c.bf16 %v8685_v56, %v8684_v55  ;;  %v10827_v21 = vpack.c.bf16 %v8689_v63, %v8688_v57  ;;  %v8743_v55 = vld [vmem:[%s14754_s1 + $0xa8] sm:$0xff]  ;;  %v8741_v63 = vld [vmem:[%s14754_s1 + $0x98] sm:$0xff] }
 0x7f1   : > { %10822 = vmatpush3.bf16.msra.mxu0 %v10821_v61  ;;  %v8740_v61 = vld [vmem:[%s14754_s1 + $0x90] sm:$0xff] }
 0x7f2   : > { %10816 = vmatpush3.bf16.msra.mxu1 %v10815_v0  ;;  %10829 = vmatprep.subr.bf16.mxu0 %v11431_v4 }
 0x7f3   : > { %10823 = vmatprep.subr.bf16.mxu1 %v11431_v4 }
 0x7f5   : > { %4239 = vmatmul.mubr.f32.vlgmr.msra.gmra.mrb[38].mxu1 %v3419_v1 }
 0x7f6   : > { %10153 = vmatprep.mubr.msk.f32.mxu1 %vm11432_vm0, %v11433_v15 }
 0x847   : > { %v9285_v2 = vpop.f32.mrb[30].mxu1 }
 0x848   : > { %v9286_v6 = vpop.f32.mrb[31].mxu1 }
 0x849   : > { %v9287_v7 = vadd.f32 %v9286_v6, %v9285_v2 }
 0x84b   : > { %v3751_v30 = vadd.f32 %v9287_v7, %v8679_v11  ;;  %v8680_v7 = vld [vmem:[%s14703_s17] ss:$0 sm:$0xff] }
 0x84c   : > { %v8694_v11 = vld [vmem:[%s14749_s0 + $0xe0] sm:$0xff] }
 0x84f   : > { %v9355_v8 = vpop.f32.mrb[34].mxu0 }
 0x850   : > { %v9356_v9 = vpop.f32.mrb[35].mxu0 }
 0x851   : > { %v9357_v10 = vadd.f32 %v9356_v9, %v9355_v8  ;;  %v8690_v8 = vld [vmem:[%s14749_s0 + $0xc0] sm:$0xff] }
 0x867   : > { %v9320_v13 = vpop.f32.mrb[32].mxu1 }
 0x868   : > { %v9321_v14 = vpop.f32.mrb[33].mxu1 }
 0x869   : > { %v9322_v45 = vadd.f32 %v9321_v14, %v9320_v13  ;;  %v8695_v13 = vld [vmem:[%s14749_s0 + $0xe8] sm:$0xff]  ;;  %v8681_v14 = vld [vmem:[%s14704_s18] ss:$0 sm:$0xff] }
 0x86b   : > { %v3821_v16 = vadd.f32 %v9322_v45, %v3751_v30 }
 0x86d   : > { %v3891_v60 = vadd.f32 %v9357_v10, %v3821_v16  ;;  %v8691_v10 = vld [vmem:[%s14749_s0 + $0xc8] sm:$0xff]  ;;  %v10836_v16 = vpack.c.bf16 %v8695_v13, %v8694_v11  ;;  %v8748_v13 = vld [vmem:[%s14754_s1 + $0xd0] sm:$0xff] }
 0x86e   : > { %v10830_v45 = vpack.c.bf16 %v8691_v10, %v8690_v8  ;;  %v8750_v8 = vld [vmem:[%s14754_s1 + $0xe0] sm:$0xff] }
 0x86f   : > { %v9425_v17 = vpop.f32.mrb[36].mxu0 }
 0x870   : > { %v9426_v18 = vpop.f32.mrb[37].mxu0 }
 0x871   : > { %v9427_v22 = vadd.f32 %v9426_v18, %v9425_v17  ;;  %v8693_v18 = vld [vmem:[%s14749_s0 + $0xd8] sm:$0xff] }
 0x888   : > { %v9390_v5 = vpop.f32.mrb[34].mxu1 }
 0x889   : > { %v9391_v46 = vpop.f32.mrb[35].mxu1 }
 0x88a   : > { %v9392_v23 = vadd.f32 %v9391_v46, %v9390_v5  ;;  %v8697_v5 = vld [vmem:[%s14749_s0 + $0xf8] sm:$0xff] }
 0x88c   : > { %v3961_v24 = vadd.f32 %v9392_v23, %v3891_v60  ;;  %v8692_v60 = vld [vmem:[%s14749_s0 + $0xd0] sm:$0xff] }
 0x88d   : > { %v10833_v46 = vpack.c.bf16 %v8693_v18, %v8692_v60 }
 0x88e   : > { %v4031_v59 = vadd.f32 %v9427_v22, %v3961_v24  ;;  %v8696_v22 = vld [vmem:[%s14749_s0 + $0xf0] sm:$0xff]  ;;  %v8710_v24 = vld [vmem:[%s14753_s26 + $0x80] sm:$0xff] }
 0x88f   : > { %v9495_v25 = vpop.f32.mrb[38].mxu0  ;;  %v10839_v23 = vpack.c.bf16 %v8697_v5, %v8696_v22 }
 0x890   : > { %v9496_v26 = vpop.f32.mrb[39].mxu0 }
 0x891   : > { %v9497_v39 = vadd.f32 %v9496_v26, %v9495_v25  ;;  %v8714_v25 = vld [vmem:[%s14753_s26 + $0xa0] sm:$0xff]  ;;  %v8715_v26 = vld [vmem:[%s14753_s26 + $0xa8] sm:$0xff] }
 0x8a8   : > { %v9460_v27 = vpop.f32.mrb[36].mxu1 }
 0x8a9   : > { %v9461_v49 = vpop.f32.mrb[37].mxu1 }
 0x8aa   : > { %v9462_v29 = vadd.f32 %v9461_v49, %v9460_v27  ;;  %v10848_v27 = vpack.c.bf16 %v8715_v26, %v8714_v25  ;;  %v8712_v49 = vld [vmem:[%s14753_s26 + $0x90] sm:$0xff]  ;;  %v8730_v26 = vld [vmem:[%s14755_s27 + $0x4] ss:$0 sm:$0xff] }
 0x8ac   : > { %v4101_v31 = vadd.f32 %v9462_v29, %v4031_v59  ;;  %v8711_v59 = vld [vmem:[%s14753_s26 + $0x88] sm:$0xff]  ;;  %v8713_v29 = vld [vmem:[%s14753_s26 + $0x98] sm:$0xff] }
 0x8ae   : > { %v4171_v32 = vadd.f32 %v9497_v39, %v4101_v31  ;;  %v10842_v39 = vpack.c.bf16 %v8711_v59, %v8710_v24  ;;  %v8716_v31 = vld [vmem:[%s14753_s26 + $0xb0] sm:$0xff] }
 0x8c8   : > { %v9530_v33 = vpop.f32.mrb[38].mxu1 }
 0x8c9   : > { %v9531_v58 = vpop.f32.mrb[39].mxu1 }
 0x8ca   : > { %v9532_v34 = vadd.f32 %v9531_v58, %v9530_v33  ;;  %v10845_v33 = vpack.c.bf16 %v8713_v29, %v8712_v49  ;;  %v8702_v29 = vld [vmem:[%s14757_s29 + $0x4] ss:$0 sm:$0xff] }
 0x8cc   : > { %v4241_v35 = vadd.f32 %v9532_v34, %v4171_v32  ;;  %v8717_v32 = vld [vmem:[%s14753_s26 + $0xb8] sm:$0xff]  ;;  %v8718_v34 = vld [vmem:[%s14753_s26 + $0xc0] sm:$0xff] }
 0x8cd   : > { %v10851_v58 = vpack.c.bf16 %v8717_v32, %v8716_v31  ;;  %v8703_v31 = vld [vmem:[%s14757_s29 + $0x5] ss:$0 sm:$0xff] }
 0x8ce   : > { %v4244_v36 = vadd.f32 %v4241_v35, %v12051_v12  ;;  %v8686_v12 = vld [vmem:[%s14749_s0 + $0xa0] sm:$0xff]  ;;  %v8719_v35 = vld [vmem:[%s14753_s26 + $0xc8] sm:$0xff]  ;;  %s14762_s0 = sld [smem:[#allocation23_spill]] }
 0x8cf   : > { %v10824_v54 = vpack.c.bf16 %v8687_v48, %v8686_v12  ;;  %v8739_v48 = vld [vmem:[%s14754_s1 + $0x88] sm:$0xff] }
 0x8d0   : > { %v4247_v38 = vsel %vm771_vm1, %v4244_v36, 0.0  ;;  %v10866_v56 = vpack.c.bf16 %v8739_v48, %v8738_v47 }
 0x8d1   : > { %4248 = vadd.xlane.f32.xlu0 %v4247_v38  ;;  %10825 = vmatpush3.bf16.msra.mxu1 %v10824_v54  ;;  %v8723_v38 = vld [vmem:[%s14753_s26 + $0xe8] sm:$0xff]  ;;  %v8742_v54 = vld [vmem:[%s14754_s1 + $0xa0] sm:$0xff] }
 0x8d2   : > { %10826 = vmatprep.subr.bf16.mxu1 %v11431_v4  ;;  %v10872_v57 = vpack.c.bf16 %v8743_v55, %v8742_v54  ;;  %v8758_v55 = vld [vmem:[%s14694_s8 + $0x4] ss:$0 sm:$0xff] }
 0x8d5   : > { %10828 = vmatpush3.bf16.msra.mxu1 %v10827_v21  ;;  %v8744_v21 = vld [vmem:[%s14754_s1 + $0xb0] sm:$0xff] }
 0x8d6   : > { %10835 = vmatprep.subr.bf16.mxu1 %v11431_v4 }
 0x95e   : > { %v4249_v40 = vpop.xlane.xlu0 %4248 }
 0x95f   : > { %v4250_v41 = vmul.f32 0.03125, %v4249_v40  ;;  %v10854_v40 = vpack.c.bf16 %v8719_v35, %v8718_v34 }
 0x961   : > { %v4251_v51 = vsub.f32 %v4244_v36, %v4250_v41  ;;  %v8722_v36 = vld [vmem:[%s14753_s26 + $0xe0] sm:$0xff] }
 0x962   : > { %v10860_v41 = vpack.c.bf16 %v8723_v38, %v8722_v36  ;;  %v8732_v38 = vld [vmem:[%s14755_s27 + $0x6] ss:$0 sm:$0xff] }
 0x963   : > { %v4252_v42 = vmul.f32 %v4251_v51, %v4251_v51 }
 0x965   : > { %v4253_v28 = vsel %vm771_vm1, %v4252_v42, 0.0  ;;  %v8721_v42 = vld [vmem:[%s14753_s26 + $0xd8] sm:$0xff] }
 0x966   : > { %4254 = vadd.xlane.f32.xlu1 %v4253_v28  ;;  %v8724_v28 = vld [vmem:[%s14753_s26 + $0xf0] sm:$0xff] }
 0x967   : > { %v10863_v12 = vpack.c.bf16 %v8725_v43, %v8724_v28  ;;  %v8705_v28 = vld [vmem:[%s14757_s29 + $0x7] ss:$0 sm:$0xff] }
 0x9f3   : > { %v4255_v0 = vpop.xlane.xlu1 %4254 }
 0x9f4   : > { %v4256_v1 = vmul.f32 0.03125, %v4255_v0  ;;  %v8745_v0 = vld [vmem:[%s14754_s1 + $0xb8] sm:$0xff] }
 0x9f6   : > { %v4257_v2 = vadd.f32 1e-05, %v4256_v1  ;;  %v10869_v1 = vpack.c.bf16 %v8741_v63, %v8740_v61 }
 0x9f8   : > { %11340 = vrsqrt.f32 %v4257_v2  ;;  %v10875_v2 = vpack.c.bf16 %v8745_v0, %v8744_v21 }
 0xa02   : > { %v11341_v6 = vpop.eup %11340 }
 0xa03   : > { %v4259_v9 = vmul.f32 %v11341_v6, %v4251_v51  ;;  %v8720_v51 = vld [vmem:[%s14753_s26 + $0xd0] sm:$0xff]  ;;  %v8746_v6 = vld [vmem:[%s14754_s1 + $0xc0] sm:$0xff] }
 0xa04   : > { %v10857_v44 = vpack.c.bf16 %v8721_v42, %v8720_v51  ;;  %v8704_v42 = vld [vmem:[%s14757_s29 + $0x6] ss:$0 sm:$0xff] }
 0xa05   : > { %v4266_v30 = vmul.f32 %v8680_v7, %v4259_v9  ;;  %v8747_v7 = vld [vmem:[%s14754_s1 + $0xc8] sm:$0xff] }
 0xa06   : > { %v8751_v9 = vld [vmem:[%s14754_s1 + $0xe8] sm:$0xff]  ;;  %v10878_v10 = vpack.c.bf16 %v8747_v7, %v8746_v6 }
 0xa07   : > { %v13104_v17 = vadd.f32 %v8681_v14, %v4266_v30  ;;  %v10884_v11 = vpack.c.bf16 %v8751_v9, %v8750_v8  ;;  %v8749_v14 = vld [vmem:[%s14754_s1 + $0xd8] sm:$0xff]  ;;  %v8752_v30 = vld [vmem:[%s14754_s1 + $0xf0] sm:$0xff] }
 0xa09   : > { %10143 = vmatmul.mubr.msk.f32.vlgmr.msra.gmra.mrb[40].mxu0 %vm771_vm1, %v13104_v17  ;;  %10154 = vmatmul.mubr.msk.f32.vlgmr.msra.gmra.mrb[40].mxu1 %vm771_vm1, %v13104_v17 }
 0xa0a   : > { %10831 = vmatpush3.bf16.msra.mxu0 %v10830_v45  ;;  %10837 = vmatpush3.bf16.msra.mxu1 %v10836_v16  ;;  %v8753_v45 = vld [vmem:[%s14754_s1 + $0xf8] sm:$0xff]  ;;  %v10881_v16 = vpack.c.bf16 %v8749_v14, %v8748_v13  ;;  %s14644_s1 = scalar_lea.hbm %s14762_s0, %s9166_s7 }
 0xa0b   : > { %10832 = vmatprep.subr.bf16.mxu0 %v11431_v4  ;;  %10838 = vmatprep.subr.bf16.mxu1 %v11431_v4  ;;  %v10887_v60 = vpack.c.bf16 %v8753_v45, %v8752_v30 }
 0xa0c   : > { %10164 = vmatprep.mubr.msk.f32.mxu0 %vm11432_vm0, %v11433_v15  ;;  %10175 = vmatprep.mubr.msk.f32.mxu1 %vm11432_vm0, %v11433_v15 }
 0xa0e   : > { %10834 = vmatpush3.bf16.msra.mxu0 %v10833_v46  ;;  %10840 = vmatpush3.bf16.msra.mxu1 %v10839_v23 }
 0xa0f   : > { %10841 = vmatprep.subr.bf16.mxu0 %v11431_v4  ;;  %10847 = vmatprep.subr.bf16.mxu1 %v11431_v4 }
 0xa11   : > { %10165 = vmatmul.mubr.msk.f32.vlgmr.msra.gmra.mrb[42].mxu0 %vm771_vm1, %v13104_v17  ;;  %10176 = vmatmul.mubr.msk.f32.vlgmr.msra.gmra.mrb[42].mxu1 %vm771_vm1, %v13104_v17 }
 0xa12   : > { %10843 = vmatpush3.bf16.msra.mxu0 %v10842_v39  ;;  %10849 = vmatpush3.bf16.msra.mxu1 %v10848_v27  ;;  %v8731_v39 = vld [vmem:[%s14755_s27 + $0x5] ss:$0 sm:$0xff] }
 0xa13   : > { %10844 = vmatprep.subr.bf16.mxu0 %v11431_v4  ;;  %10850 = vmatprep.subr.bf16.mxu1 %v11431_v4 }
 0xa14   : > { %10186 = vmatprep.mubr.msk.f32.mxu0 %vm11432_vm0, %v11433_v15  ;;  %10197 = vmatprep.mubr.msk.f32.mxu1 %vm11432_vm0, %v11433_v15 }
 0xa16   : > { %10846 = vmatpush3.bf16.msra.mxu0 %v10845_v33  ;;  %10852 = vmatpush3.bf16.msra.mxu1 %v10851_v58 }
 0xa17   : > { %10853 = vmatprep.subr.bf16.mxu0 %v11431_v4  ;;  %10859 = vmatprep.subr.bf16.mxu1 %v11431_v4 }
 0xa19   : > { %10187 = vmatmul.mubr.msk.f32.vlgmr.msra.gmra.mrb[44].mxu0 %vm771_vm1, %v13104_v17  ;;  %10198 = vmatmul.mubr.msk.f32.vlgmr.msra.gmra.mrb[44].mxu1 %vm771_vm1, %v13104_v17 }
 0xa1a   : > { %10855 = vmatpush3.bf16.msra.mxu0 %v10854_v40  ;;  %10861 = vmatpush3.bf16.msra.mxu1 %v10860_v41  ;;  %v8733_v40 = vld [vmem:[%s14755_s27 + $0x7] ss:$0 sm:$0xff] }
 0xa1b   : > { %10856 = vmatprep.subr.bf16.mxu0 %v11431_v4  ;;  %10862 = vmatprep.subr.bf16.mxu1 %v11431_v4 }
 0xa1c   : > { %10208 = vmatprep.mubr.msk.f32.mxu0 %vm11432_vm0, %v11433_v15  ;;  %10219 = vmatprep.mubr.msk.f32.mxu1 %vm11432_vm0, %v11433_v15 }
 0xa1e   : > { %10858 = vmatpush3.bf16.msra.mxu0 %v10857_v44  ;;  %10864 = vmatpush3.bf16.msra.mxu1 %v10863_v12 }
 0xa1f   : > { %10865 = vmatprep.subr.bf16.mxu0 %v11431_v4  ;;  %10871 = vmatprep.subr.bf16.mxu1 %v11431_v4 }
 0xa21   : > { %10209 = vmatmul.mubr.msk.f32.vlgmr.msra.gmra.mrb[46].mxu0 %vm771_vm1, %v13104_v17  ;;  %10220 = vmatmul.mubr.msk.f32.vlgmr.msra.gmra.mrb[46].mxu1 %vm771_vm1, %v13104_v17 }
 0xa22   : > { %10867 = vmatpush3.bf16.msra.mxu0 %v10866_v56  ;;  %10873 = vmatpush3.bf16.msra.mxu1 %v10872_v57  ;;  %v8759_v56 = vld [vmem:[%s14694_s8 + $0x5] ss:$0 sm:$0xff] }
 0xa23   : > { %10868 = vmatprep.subr.bf16.mxu0 %v11431_v4  ;;  %10874 = vmatprep.subr.bf16.mxu1 %v11431_v4 }
 0xa24   : > { %10230 = vmatprep.mubr.msk.f32.mxu0 %vm11432_vm0, %v11433_v15  ;;  %10241 = vmatprep.mubr.msk.f32.mxu1 %vm11432_vm0, %v11433_v15 }
 0xa26   : > { %10870 = vmatpush3.bf16.msra.mxu0 %v10869_v1  ;;  %10876 = vmatpush3.bf16.msra.mxu1 %v10875_v2 }
 0xa27   : > { %10877 = vmatprep.subr.bf16.mxu0 %v11431_v4  ;;  %10883 = vmatprep.subr.bf16.mxu1 %v11431_v4 }
 0xa29   : > { %10231 = vmatmul.mubr.msk.f32.vlgmr.msra.gmra.mrb[48].mxu0 %vm771_vm1, %v13104_v17  ;;  %10242 = vmatmul.mubr.msk.f32.vlgmr.msra.gmra.mrb[48].mxu1 %vm771_vm1, %v13104_v17 }
 0xa2a   : > { %10879 = vmatpush3.bf16.msra.mxu0 %v10878_v10  ;;  %10885 = vmatpush3.bf16.msra.mxu1 %v10884_v11 }
 0xa2b   : > { %10880 = vmatprep.subr.bf16.mxu0 %v11431_v4  ;;  %10886 = vmatprep.subr.bf16.mxu1 %v11431_v4 }
 0xa2c   : > { %10252 = vmatprep.mubr.msk.f32.mxu0 %vm11432_vm0, %v11433_v15  ;;  %10263 = vmatprep.mubr.msk.f32.mxu1 %vm11432_vm0, %v11433_v15 }
 0xa2e   : > { %10882 = vmatpush3.bf16.msra.mxu0 %v10881_v16  ;;  %10888 = vmatpush3.bf16.msra.mxu1 %v10887_v60 }
 0xa2f   : > { %10266 = vmatprep.subr.mxu0 %v11433_v15  ;;  %10271 = vmatprep.subr.mxu1 %v11433_v15 }
 0xa31   : > { %10253 = vmatmul.mubr.msk.f32.vlgmr.msra.gmra.mrb[50].mxu0 %vm771_vm1, %v13104_v17  ;;  %10264 = vmatmul.mubr.msk.f32.vlgmr.msra.gmra.mrb[50].mxu1 %vm771_vm1, %v13104_v17 }
 0xa32   : > { %10268 = vmatprep.mubr.msk.f32.mxu0 %vm11432_vm0, %v11433_v15  ;;  %10273 = vmatprep.mubr.msk.f32.mxu1 %vm11432_vm0, %v11433_v15 }
 0xadc   : > { %v4389_v18 = vpop.f32.mrb[40].mxu0  ;;  %v4459_v22 = vpop.f32.mrb[40].mxu1 }
 0xadd   : > { %v10144_v5 = vpop.f32.mrb[41].mxu0  ;;  %v10155_v46 = vpop.f32.mrb[41].mxu1  ;;  %v4390_v35 = vadd.f32 %v8702_v29, %v4389_v18  ;;  %v4460_v36 = vadd.f32 %v8703_v31, %v4459_v22 }
 0xae4   : > { %v4529_v23 = vpop.f32.mrb[42].mxu0  ;;  %v4599_v24 = vpop.f32.mrb[42].mxu1 }
 0xae5   : > { %v10166_v59 = vpop.f32.mrb[43].mxu0  ;;  %v10177_v25 = vpop.f32.mrb[43].mxu1  ;;  %v4530_v48 = vadd.f32 %v8704_v42, %v4529_v23  ;;  %v4600_v54 = vadd.f32 %v8705_v28, %v4599_v24 }
 0xaec   : > { %v4715_v27 = vpop.f32.mrb[44].mxu0  ;;  %v4785_v49 = vpop.f32.mrb[44].mxu1 }
 0xaed   : > { %v4716_v32 = vadd.f32 %v8730_v26, %v4715_v27  ;;  %v4786_v33 = vadd.f32 %v8731_v39, %v4785_v49  ;;  %v10188_v58 = vpop.f32.mrb[45].mxu0  ;;  %v10199_v34 = vpop.f32.mrb[45].mxu1 }
 0xaef   : > { %10267 = vmatpush3.xpose.msk.msra.mxu0 %vm1703_vm2, %v4716_v32  ;;  %10272 = vmatpush3.xpose.msk.msra.mxu1 %vm1703_vm2, %v4786_v33 }
 0xaf0   : > { %10276 = vmatprep.subr.mxu0 %v11433_v15  ;;  %10281 = vmatprep.subr.mxu1 %v11433_v15 }
 0xaf2   : > { %10269 = vmatmul.mubr.msk.f32.vlgmr.msra.gmra.mrb[52].mxu0 %vm1703_vm2, %v4390_v35  ;;  %10274 = vmatmul.mubr.msk.f32.vlgmr.msra.gmra.mrb[52].mxu1 %vm1703_vm2, %v4460_v36 }
 0xaf3   : > { %10278 = vmatprep.mubr.msk.f32.mxu0 %vm11432_vm0, %v11433_v15  ;;  %10283 = vmatprep.mubr.msk.f32.mxu1 %vm11432_vm0, %v11433_v15 }
 0xaf4   : > { %v4855_v41 = vpop.f32.mrb[46].mxu0  ;;  %v4925_v51 = vpop.f32.mrb[46].mxu1 }
 0xaf5   : > { %v4856_v43 = vadd.f32 %v8732_v38, %v4855_v41  ;;  %v4926_v44 = vadd.f32 %v8733_v40, %v4925_v51  ;;  %v10210_v12 = vpop.f32.mrb[47].mxu0  ;;  %v10221_v47 = vpop.f32.mrb[47].mxu1 }
 0xaf6   : > { %v8760_v47 = vld [vmem:[%s14694_s8 + $0x6] ss:$0 sm:$0xff] }
 0xaf7   : > { %10277 = vmatpush3.xpose.msk.msra.mxu0 %vm1703_vm2, %v4856_v43  ;;  %10282 = vmatpush3.xpose.msk.msra.mxu1 %vm1703_vm2, %v4926_v44  ;;  %v8761_v44 = vld [vmem:[%s14694_s8 + $0x7] ss:$0 sm:$0xff] }
 0xaf8   : > { %10286 = vmatprep.subr.mxu0 %v11433_v15  ;;  %10291 = vmatprep.subr.mxu1 %v11433_v15 }
 0xafa   : > { %10279 = vmatmul.mubr.msk.f32.vlgmr.msra.gmra.mrb[54].mxu0 %vm1703_vm2, %v4530_v48  ;;  %10284 = vmatmul.mubr.msk.f32.vlgmr.msra.gmra.mrb[54].mxu1 %vm1703_vm2, %v4600_v54 }
 0xafb   : > { %10288 = vmatprep.mubr.msk.f32.mxu0 %vm11432_vm0, %v11433_v15  ;;  %10293 = vmatprep.mubr.msk.f32.mxu1 %vm11432_vm0, %v11433_v15 }
 0xafc   : > { %v5041_v57 = vpop.f32.mrb[48].mxu0  ;;  %v5111_v61 = vpop.f32.mrb[48].mxu1 }
 0xafd   : > { %v5042_v63 = vadd.f32 %v8758_v55, %v5041_v57  ;;  %v5112_v21 = vadd.f32 %v8759_v56, %v5111_v61  ;;  %v10232_v0 = vpop.f32.mrb[49].mxu0  ;;  %v10243_v1 = vpop.f32.mrb[49].mxu1 }
 0xafe   : > { %v8778_v1 = vld [vmem:[%s14695_s9 + $0x20] sm:$0xff] }
 0xaff   : > { %10287 = vmatpush3.msra.mxu0 %v5042_v63  ;;  %10292 = vmatpush3.msra.mxu1 %v5112_v21 }
 0xb00   : > { %10296 = vmatprep.subr.mxu0 %v11433_v15  ;;  %10301 = vmatprep.subr.mxu1 %v11433_v15 }
 0xb04   : > { %v13331_v2 = vpop.f32.mrb[50].mxu0  ;;  %v5251_v6 = vpop.f32.mrb[50].mxu1 }
 0xb05   : > { %v10254_v7 = vpop.f32.mrb[51].mxu0  ;;  %v10265_v8 = vpop.f32.mrb[51].mxu1  ;;  %v5252_v55 = vadd.f32 %v8761_v44, %v5251_v6  ;;  %v5182_v57 = vadd.f32 %v8760_v47, %v13331_v2  ;;  %v8779_v2 = vld [vmem:[%s14695_s9 + $0x28] sm:$0xff]  ;;  %v8781_v6 = vld [vmem:[%s14695_s9 + $0x38] sm:$0xff]  ;;  %v8808_v44 = vld [vmem:[%s14699_s13 + $0x280] sm:$0xff] }
 0xb06   : > { %v8780_v8 = vld [vmem:[%s14695_s9 + $0x30] sm:$0xff] }
 0xbc5   : > { %v5327_v9 = vpop.f32.mrb[52].mxu0  ;;  %v5403_v10 = vpop.f32.mrb[52].mxu1 }
 0xbc6   : > { %v10270_v11 = vpop.f32.mrb[53].mxu0  ;;  %v10275_v13 = vpop.f32.mrb[53].mxu1  ;;  %v5562_v14 = vsel %vm1703_vm2, %v5403_v10, -inf  ;;  %v5559_v30 = vsel %vm1703_vm2, %v5327_v9, -inf }
 0xbc7   : > { %5563 = vmax.xlane.f32.xlu1 %v5562_v14  ;;  %5560 = vmax.xlane.f32.xlu0 %v5559_v30 }
 0xbcd   : > { %v5479_v45 = vpop.f32.mrb[54].mxu0  ;;  %v5555_v16 = vpop.f32.mrb[54].mxu1 }
 0xbce   : > { %v10280_v60 = vpop.f32.mrb[55].mxu0  ;;  %v10285_v18 = vpop.f32.mrb[55].mxu1  ;;  %v5568_v22 = vsel %vm1703_vm2, %v5555_v16, -inf  ;;  %v5565_v5 = vsel %vm1703_vm2, %v5479_v45, -inf }
 0xbcf   : > { %5569 = vmax.xlane.f32.xlu1 %v5568_v22  ;;  %5566 = vmax.xlane.f32.xlu0 %v5565_v5 }
 0xc54   : > { %v5564_v46 = vpop.xlane.xlu1 %5563  ;;  %v5561_v23 = vpop.xlane.xlu0 %5560 }
 0xc55   : > { %v5572_v24 = vsub.f32 %v5403_v10, %v5564_v46  ;;  %v5571_v59 = vsub.f32 %v5327_v9, %v5561_v23 }
 0xc57   : > { %v5577_v25 = vmul.f32 1.442695, %v5572_v24  ;;  %v5575_v26 = vmul.f32 1.442695, %v5571_v59 }
 0xc59   : > { %11342 = vpow2.f32 %v5577_v25 }
 0xc5a   : > { %11344 = vpow2.f32 %v5575_v26 }
 0xc5c   : > { %v5570_v39 = vpop.xlane.xlu1 %5569  ;;  %v5567_v27 = vpop.xlane.xlu0 %5566 }
 0xc5d   : > { %v5574_v49 = vsub.f32 %v5555_v16, %v5570_v39  ;;  %v5573_v29 = vsub.f32 %v5479_v45, %v5567_v27 }
 0xc5f   : > { %v5581_v31 = vmul.f32 1.442695, %v5574_v49  ;;  %v5579_v32 = vmul.f32 1.442695, %v5573_v29  ;;  %v8787_v29 = vld [vmem:[%s14696_s10 + $0x1] ss:$0 sm:$0xff] }
 0xc61   : > { %11346 = vpow2.f32 %v5581_v31 }
 0xc62   : > { %11348 = vpow2.f32 %v5579_v32 }
 0xc63   : > { %v11343_v33 = vpop.eup %11342 }
 0xc64   : > { %v11345_v58 = vpop.eup %11344  ;;  %v5586_v34 = vsel %vm1703_vm2, %v11343_v33, 0.0 }
 0xc65   : > { %5587 = vadd.xlane.f32.xlu1 %v5586_v34  ;;  %v5583_v35 = vsel %vm1703_vm2, %v11345_v58, 0.0 }
 0xc66   : > { %5584 = vadd.xlane.f32.xlu0 %v5583_v35 }
 0xc6b   : > { %v11347_v36 = vpop.eup %11346 }
 0xc6c   : > { %v11349_v38 = vpop.eup %11348  ;;  %v5592_v40 = vsel %vm1703_vm2, %v11347_v36, 0.0 }
 0xc6d   : > { %5593 = vadd.xlane.f32.xlu1 %v5592_v40  ;;  %v5589_v41 = vsel %vm1703_vm2, %v11349_v38, 0.0 }
 0xc6e   : > { %5590 = vadd.xlane.f32.xlu0 %v5589_v41  ;;  %v8793_v41 = vld [vmem:[%s14699_s13 + $0x208] sm:$0xff] }
 0xcf2   : > { %v5588_v51 = vpop.xlane.xlu1 %5587 }
 0xcf3   : > { %11350 = vrcp.f32 %v5588_v51  ;;  %v5585_v42 = vpop.xlane.xlu0 %5584  ;;  %v8809_v51 = vld [vmem:[%s14699_s13 + $0x288] sm:$0xff] }
 0xcf4   : > { %11352 = vrcp.f32 %v5585_v42  ;;  %v10889_v42 = vpack.c.bf16 %v8809_v51, %v8793_v41  ;;  %v8846_v41 = vld [vmem:[%s14699_s13 + $0x3b0] sm:$0xff]  ;;  %v8801_v51 = vld [vmem:[%s14699_s13 + $0x248] sm:$0xff] }
 0xcfa   : > { %v5594_v28 = vpop.xlane.xlu1 %5593 }
 0xcfb   : > { %11354 = vrcp.f32 %v5594_v28  ;;  %v5591_v43 = vpop.xlane.xlu0 %5590  ;;  %v8811_v28 = vld [vmem:[%s14699_s13 + $0x298] sm:$0xff] }
 0xcfc   : > { %11356 = vrcp.f32 %v5591_v43  ;;  %v8792_v43 = vld [vmem:[%s14699_s13 + $0x200] sm:$0xff] }
 0xcfd   : > { %v11351_v12 = vpop.eup %11350  ;;  %v10891_v47 = vpack.c.bf16 %v8808_v44, %v8792_v43 }
 0xcfe   : > { %v11353_v48 = vpop.eup %11352  ;;  %v5598_v54 = vmul.f32 %v11351_v12, %v11343_v33 }
 0xcff   : > { %v5596_v56 = vmul.f32 %v11353_v48, %v11345_v58  ;;  %v8794_v48 = vld [vmem:[%s14699_s13 + $0x210] sm:$0xff] }
 0xd00   : > { %10294 = vmatmul.mubr.msk.f32.vlgmr.msra.gmra.mrb[56].mxu1 %vm1703_vm2, %v5598_v54  ;;  %v8810_v54 = vld [vmem:[%s14699_s13 + $0x290] sm:$0xff] }
 0xd01   : > { %10289 = vmatmul.mubr.msk.f32.vlgmr.msra.gmra.mrb[56].mxu0 %vm1703_vm2, %v5596_v56  ;;  %10302 = vmatpush3.msra.mxu1 %v5252_v55  ;;  %v10899_v55 = vpack.c.bf16 %v8810_v54, %v8794_v48  ;;  %v8825_v56 = vld [vmem:[%s14699_s13 + $0x308] sm:$0xff] }
 0xd02   : > { %10297 = vmatpush3.msra.mxu0 %v5182_v57  ;;  %10298 = vmatprep.mubr.msk.f32.mxu0 %vm11432_vm0, %v11433_v15  ;;  %v8841_v57 = vld [vmem:[%s14699_s13 + $0x388] sm:$0xff] }
 0xd03   : > { %10303 = vmatprep.mubr.msk.f32.mxu1 %vm11432_vm0, %v11433_v15  ;;  %10306 = vmatprep.subr.mxu0 %v11433_v15 }
 0xd04   : > { %10311 = vmatprep.subr.mxu1 %v11433_v15 }
 0xd05   : > { %v11355_v61 = vpop.eup %11354 }
 0xd06   : > { %v11357_v63 = vpop.eup %11356  ;;  %v5602_v21 = vmul.f32 %v11355_v61, %v11347_v36  ;;  %v8827_v61 = vld [vmem:[%s14699_s13 + $0x318] sm:$0xff] }
 0xd07   : > { %v5600_v0 = vmul.f32 %v11357_v63, %v11349_v38  ;;  %v10893_v63 = vpack.c.bf16 %v8841_v57, %v8825_v56  ;;  %v8818_v56 = vld [vmem:[%s14699_s13 + $0x2d0] sm:$0xff]  ;;  %v8833_v57 = vld [vmem:[%s14699_s13 + $0x348] sm:$0xff] }
 0xd08   : > { %10304 = vmatmul.mubr.msk.f32.vlgmr.msra.gmra.mrb[58].mxu1 %vm1703_vm2, %v5602_v21  ;;  %v8843_v21 = vld [vmem:[%s14699_s13 + $0x398] sm:$0xff] }
 0xd09   : > { %10299 = vmatmul.mubr.msk.f32.vlgmr.msra.gmra.mrb[58].mxu0 %vm1703_vm2, %v5600_v0  ;;  %10313 = vmatprep.mubr.msk.f32.mxu1 %vm11432_vm0, %v11433_v15  ;;  %v8824_v0 = vld [vmem:[%s14699_s13 + $0x300] sm:$0xff] }
 0xd0a   : > { %10308 = vmatprep.mubr.msk.f32.mxu0 %vm11432_vm0, %v11433_v15  ;;  %10307 = vmatpush3.msra.mxu0 %v8778_v1  ;;  %v8840_v1 = vld [vmem:[%s14699_s13 + $0x380] sm:$0xff] }
 0xd0b   : > { %10312 = vmatpush3.msra.mxu1 %v8779_v2  ;;  %10316 = vmatprep.subr.mxu0 %v11433_v15  ;;  %v10901_v2 = vpack.c.bf16 %v8843_v21, %v8827_v61  ;;  %v8849_v61 = vld [vmem:[%s14699_s13 + $0x3c8] sm:$0xff]  ;;  %v8851_v21 = vld [vmem:[%s14699_s13 + $0x3d8] sm:$0xff] }
 0xd0c   : > { %10321 = vmatprep.subr.mxu1 %v11433_v15 }
 0xdd3   : > { %v5745_v7 = vpop.f32.mrb[56].mxu1 }
 0xdd4   : > { %v5672_v9 = vpop.f32.mrb[56].mxu0  ;;  %v10295_v10 = vpop.f32.mrb[57].mxu1  ;;  %10314 = vmatmul.mubr.msk.f32.vlgmr.msra.gmra.mrb[60].mxu1 %vm1703_vm2, %v5745_v7  ;;  %v8826_v7 = vld [vmem:[%s14699_s13 + $0x310] sm:$0xff] }
 0xdd5   : > { %v10290_v11 = vpop.f32.mrb[57].mxu0  ;;  %10309 = vmatmul.mubr.msk.f32.vlgmr.msra.gmra.mrb[60].mxu0 %vm1703_vm2, %v5672_v9  ;;  %10322 = vmatpush3.msra.mxu1 %v8781_v6  ;;  %v10895_v6 = vpack.c.bf16 %v8840_v1, %v8824_v0  ;;  %v8797_v10 = vld [vmem:[%s14699_s13 + $0x228] sm:$0xff] }
 0xdd6   : > { %10317 = vmatpush3.msra.mxu0 %v8780_v8  ;;  %10318 = vmatprep.mubr.msk.f32.mxu0 %vm11432_vm0, %v11433_v15  ;;  %v8842_v8 = vld [vmem:[%s14699_s13 + $0x390] sm:$0xff]  ;;  %v8813_v11 = vld [vmem:[%s14699_s13 + $0x2a8] sm:$0xff] }
 0xdd7   : > { %10323 = vmatprep.mubr.msk.f32.mxu1 %vm11432_vm0, %v11433_v15  ;;  %10890 = vmatprep.subr.bf16.mxu0 %v10889_v42  ;;  %v10903_v9 = vpack.c.bf16 %v8842_v8, %v8826_v7  ;;  %v8803_v42 = vld [vmem:[%s14699_s13 + $0x258] sm:$0xff]  ;;  %v10925_v7 = vpack.c.bf16 %v8849_v61, %v8833_v57  ;;  %v8868_v61 = vld [vmem:[%s14701_s15 + $0x810] sm:$0xff] }
 0xddb   : > { %v5891_v13 = vpop.f32.mrb[58].mxu1 }
 0xddc   : > { %v5818_v14 = vpop.f32.mrb[58].mxu0  ;;  %v10305_v30 = vpop.f32.mrb[59].mxu1  ;;  %10324 = vmatmul.mubr.msk.f32.vlgmr.msra.gmra.mrb[62].mxu1 %vm1703_vm2, %v5891_v13  ;;  %v8799_v13 = vld [vmem:[%s14699_s13 + $0x238] sm:$0xff] }
 0xddd   : > { %v10300_v45 = vpop.f32.mrb[59].mxu0  ;;  %10319 = vmatmul.mubr.msk.f32.vlgmr.msra.gmra.mrb[62].mxu0 %vm1703_vm2, %v5818_v14  ;;  %6528 = vmatprep.mubr.f32.mxu1 %v11433_v15  ;;  %v10905_v14 = vpack.c.bf16 %v8813_v11, %v8797_v10  ;;  %v8815_v30 = vld [vmem:[%s14699_s13 + $0x2b8] sm:$0xff]  ;;  %v8850_v10 = vld [vmem:[%s14699_s13 + $0x3d0] sm:$0xff]  ;;  %v8805_v11 = vld [vmem:[%s14699_s13 + $0x268] sm:$0xff] }
 0xdde   : > { %6457 = vmatprep.mubr.f32.mxu0 %v11433_v15  ;;  %10892 = vmatpush1.bf16.msra.mxu0 %v10891_v47  ;;  %v10913_v45 = vpack.c.bf16 %v8815_v30, %v8799_v13  ;;  %v8816_v47 = vld [vmem:[%s14699_s13 + $0x2c0] sm:$0xff]  ;;  %v8821_v13 = vld [vmem:[%s14699_s13 + $0x2e8] sm:$0xff]  ;;  %v8823_v30 = vld [vmem:[%s14699_s13 + $0x2f8] sm:$0xff] }
 0xddf   : > { %10894 = vmatprep.subr.bf16.mxu0 %v10893_v63  ;;  %v8835_v63 = vld [vmem:[%s14699_s13 + $0x358] sm:$0xff] }
 0xde0   : > { %v10933_v8 = vpack.c.bf16 %v8851_v21, %v8835_v63  ;;  %v8869_v63 = vld [vmem:[%s14701_s15 + $0x818] sm:$0xff] }
 0xde2   : > { %10896 = vmatpush1.bf16.msra.mxu0 %v10895_v6  ;;  %v8848_v6 = vld [vmem:[%s14699_s13 + $0x3c0] sm:$0xff] }
 0xde3   : > { %10906 = vmatprep.subr.bf16.mxu0 %v10905_v14  ;;  %v8807_v14 = vld [vmem:[%s14699_s13 + $0x278] sm:$0xff] }
 0xea7   : > { %v6042_v16 = vpop.f32.mrb[60].mxu1 }
 0xea8   : > { %v5969_v60 = vpop.f32.mrb[60].mxu0  ;;  %v6193_v18 = vsel %vm771_vm1, %v6042_v16, 0.0  ;;  %v10315_v22 = vpop.f32.mrb[61].mxu1 }
 0xea9   : > { %v6192_v5 = vsel %vm771_vm1, %v5969_v60, 0.0  ;;  %v10310_v46 = vpop.f32.mrb[61].mxu0  ;;  %v8790_v22 = vld [vmem:[%s14697_s11 + $0x1] ss:$0 sm:$0xff] }
 0xeaa   : > { %v6194_v23 = vadd.f32 %v6193_v18, %v6192_v5  ;;  %v8791_v46 = vld [vmem:[%s14698_s12 + $0x1] ss:$0 sm:$0xff] }
 0xeaf   : > { %v6188_v24 = vpop.f32.mrb[62].mxu1 }
 0xeb0   : > { %v6115_v59 = vpop.f32.mrb[62].mxu0  ;;  %v10325_v25 = vpop.f32.mrb[63].mxu1  ;;  %v6197_v49 = vsel %vm771_vm1, %v6188_v24, 0.0  ;;  %v8812_v24 = vld [vmem:[%s14699_s13 + $0x2a0] sm:$0xff] }
 0xeb1   : > { %v6195_v26 = vsel %vm771_vm1, %v6115_v59, 0.0  ;;  %v10320_v39 = vpop.f32.mrb[63].mxu0  ;;  %v8798_v25 = vld [vmem:[%s14699_s13 + $0x230] sm:$0xff] }
 0xeb2   : > { %v6196_v27 = vadd.f32 %v6195_v26, %v6194_v23  ;;  %v8796_v23 = vld [vmem:[%s14699_s13 + $0x220] sm:$0xff]  ;;  %v8814_v26 = vld [vmem:[%s14699_s13 + $0x2b0] sm:$0xff]  ;;  %v8829_v39 = vld [vmem:[%s14699_s13 + $0x328] sm:$0xff] }
 0xeb4   : > { %v6198_v31 = vadd.f32 %v6197_v49, %v6196_v27  ;;  %v8845_v27 = vld [vmem:[%s14699_s13 + $0x3a8] sm:$0xff]  ;;  %v8831_v49 = vld [vmem:[%s14699_s13 + $0x338] sm:$0xff] }
 0xeb6   : > { %v6207_v32 = vadd.f32 %v8787_v29, %v6198_v31  ;;  %v8847_v29 = vld [vmem:[%s14699_s13 + $0x3b8] sm:$0xff] }
 0xeb8   : > { %v6208_v33 = vadd.f32 %v6207_v32, %v13104_v17  ;;  %v8795_v17 = vld [vmem:[%s14699_s13 + $0x218] sm:$0xff]  ;;  %v10907_v32 = vpack.c.bf16 %v8812_v24, %v8796_v23  ;;  %v8822_v23 = vld [vmem:[%s14699_s13 + $0x2f0] sm:$0xff]  ;;  %v8837_v24 = vld [vmem:[%s14699_s13 + $0x368] sm:$0xff] }
 0xeb9   : > { %v10897_v12 = vpack.c.bf16 %v8811_v28, %v8795_v17  ;;  %v8817_v17 = vld [vmem:[%s14699_s13 + $0x2c8] sm:$0xff]  ;;  %v8819_v28 = vld [vmem:[%s14699_s13 + $0x2d8] sm:$0xff] }
 0xeba   : > { %v6213_v58 = vsel %vm771_vm1, %v6208_v33, 0.0  ;;  %v10921_v48 = vpack.c.bf16 %v8817_v17, %v8801_v51  ;;  %v10929_v54 = vpack.c.bf16 %v8819_v28, %v8803_v42  ;;  %v8866_v17 = vld [vmem:[%s14701_s15 + $0x800] sm:$0xff]  ;;  %v8867_v42 = vld [vmem:[%s14701_s15 + $0x808] sm:$0xff] }
 0xebb   : > { %6214 = vadd.xlane.f32.xlu0 %v6213_v58  ;;  %10898 = vmatprep.subr.bf16.mxu1 %v10897_v12  ;;  %v8828_v58 = vld [vmem:[%s14699_s13 + $0x320] sm:$0xff] }
 0xebc   : > { %10900 = vmatpush1.bf16.msra.mxu1 %v10899_v55  ;;  %v8800_v12 = vld [vmem:[%s14699_s13 + $0x240] sm:$0xff]  ;;  %v8802_v55 = vld [vmem:[%s14699_s13 + $0x250] sm:$0xff] }
 0xebd   : > { %10902 = vmatprep.subr.bf16.mxu1 %v10901_v2  ;;  %v10923_v0 = vpack.c.bf16 %v8816_v47, %v8800_v12  ;;  %v10931_v1 = vpack.c.bf16 %v8818_v56, %v8802_v55  ;;  %v8832_v2 = vld [vmem:[%s14699_s13 + $0x340] sm:$0xff]  ;;  %v8899_v12 = vld [vmem:[%s14701_s15 + $0x908] sm:$0xff]  ;;  %v8884_v47 = vld [vmem:[%s14701_s15 + $0x890] sm:$0xff]  ;;  %v10955_v56 = vpack.c.bf16 %v8867_v42, %v8866_v17 }
 0xebe   : > { %v8917_v55 = vld [vmem:[%s14701_s15 + $0x998] sm:$0xff]  ;;  %v8907_v17 = vld [vmem:[%s14701_s15 + $0x948] sm:$0xff]  ;;  %v8892_v42 = vld [vmem:[%s14701_s15 + $0x8d0] sm:$0xff] }
 0xec0   : > { %10904 = vmatpush1.bf16.msra.mxu1 %v10903_v9  ;;  %v8834_v9 = vld [vmem:[%s14699_s13 + $0x350] sm:$0xff] }
 0xec1   : > { %10914 = vmatprep.subr.bf16.mxu1 %v10913_v45  ;;  %v10927_v45 = vpack.c.bf16 %v8848_v6, %v8832_v2  ;;  %v8901_v2 = vld [vmem:[%s14701_s15 + $0x918] sm:$0xff]  ;;  %v8886_v6 = vld [vmem:[%s14701_s15 + $0x8a0] sm:$0xff] }
 0xf48   : > { %v6215_v34 = vpop.xlane.xlu0 %6214 }
 0xf49   : > { %v6216_v35 = vmul.f32 0.03125, %v6215_v34  ;;  %v8844_v34 = vld [vmem:[%s14699_s13 + $0x3a0] sm:$0xff] }
 0xf4a   : > { %v10911_v43 = vpack.c.bf16 %v8844_v34, %v8828_v58  ;;  %v8854_v58 = vld [vmem:[%s14699_s13 + $0x3f0] sm:$0xff]  ;;  %v8882_v34 = vld [vmem:[%s14701_s15 + $0x880] sm:$0xff] }
 0xf4b   : > { %v6217_v36 = vsub.f32 %v6208_v33, %v6216_v35  ;;  %v10915_v33 = vpack.c.bf16 %v8814_v26, %v8798_v25  ;;  %v8839_v25 = vld [vmem:[%s14699_s13 + $0x378] sm:$0xff] }
 0xf4c   : > { %v8855_v26 = vld [vmem:[%s14699_s13 + $0x3f8] sm:$0xff] }
 0xf4d   : > { %v6218_v38 = vmul.f32 %v6217_v36, %v6217_v36 }
 0xf4f   : > { %v6219_v40 = vsel %vm771_vm1, %v6218_v38, 0.0  ;;  %v10917_v38 = vpack.c.bf16 %v8847_v29, %v8831_v49  ;;  %v8836_v49 = vld [vmem:[%s14699_s13 + $0x360] sm:$0xff] }
 0xf50   : > { %6220 = vadd.xlane.f32.xlu1 %v6219_v40  ;;  %v8830_v40 = vld [vmem:[%s14699_s13 + $0x330] sm:$0xff]  ;;  %v8852_v29 = vld [vmem:[%s14699_s13 + $0x3e0] sm:$0xff] }
 0xf51   : > { %v10919_v44 = vpack.c.bf16 %v8846_v41, %v8830_v40  ;;  %v8915_v40 = vld [vmem:[%s14701_s15 + $0x988] sm:$0xff]  ;;  %v10943_v41 = vpack.c.bf16 %v8852_v29, %v8836_v49  ;;  %v8905_v49 = vld [vmem:[%s14701_s15 + $0x938] sm:$0xff]  ;;  %v8890_v29 = vld [vmem:[%s14701_s15 + $0x8c0] sm:$0xff] }
 0xfdd   : > { %v6221_v16 = vpop.xlane.xlu1 %6220 }
 0xfde   : > { %v6222_v60 = vmul.f32 0.03125, %v6221_v16  ;;  %v10935_v16 = vpack.c.bf16 %v8850_v10, %v8834_v9  ;;  %v8919_v9 = vld [vmem:[%s14701_s15 + $0x9a8] sm:$0xff]  ;;  %v10959_v10 = vpack.c.bf16 %v8869_v63, %v8868_v61  ;;  %v8909_v61 = vld [vmem:[%s14701_s15 + $0x958] sm:$0xff]  ;;  %v8894_v63 = vld [vmem:[%s14701_s15 + $0x8e0] sm:$0xff] }
 0xfe0   : > { %v6223_v18 = vadd.f32 1e-05, %v6222_v60  ;;  %v8804_v60 = vld [vmem:[%s14699_s13 + $0x260] sm:$0xff] }
 0xfe2   : > { %11358 = vrsqrt.f32 %v6223_v18  ;;  %v8820_v18 = vld [vmem:[%s14699_s13 + $0x2e0] sm:$0xff] }
 0xfec   : > { %v11359_v5 = vpop.eup %11358 }
 0xfed   : > { %v6225_v59 = vmul.f32 %v11359_v5, %v6217_v36  ;;  %v10909_v36 = vpack.c.bf16 %v8845_v27, %v8829_v39  ;;  %v10945_v5 = vpack.c.bf16 %v8823_v30, %v8807_v14  ;;  %v10939_v39 = vpack.c.bf16 %v8820_v18, %v8804_v60  ;;  %v8871_v14 = vld [vmem:[%s14701_s15 + $0x828] sm:$0xff]  ;;  %v8888_v18 = vld [vmem:[%s14701_s15 + $0x8b0] sm:$0xff] }
 0xfee   : > { %v8903_v60 = vld [vmem:[%s14701_s15 + $0x928] sm:$0xff] }
 0xfef   : > { %v6232_v31 = vmul.f32 %v8790_v22, %v6225_v59  ;;  %v10937_v22 = vpack.c.bf16 %v8821_v13, %v8805_v11  ;;  %v8853_v59 = vld [vmem:[%s14699_s13 + $0x3e8] sm:$0xff]  ;;  %v8870_v13 = vld [vmem:[%s14701_s15 + $0x820] sm:$0xff] }
 0xff1   : > { %v13492_v35 = vadd.f32 %v8791_v46, %v6232_v31  ;;  %v8806_v46 = vld [vmem:[%s14699_s13 + $0x270] sm:$0xff]  ;;  %v10941_v31 = vpack.c.bf16 %v8853_v59, %v8837_v24 }
 0xff2   : > { %v10947_v27 = vpack.c.bf16 %v8822_v23, %v8806_v46  ;;  %v8921_v46 = vld [vmem:[%s14701_s15 + $0x9b8] sm:$0xff]  ;;  %v10963_v23 = vpack.c.bf16 %v8871_v14, %v8870_v13  ;;  %v8872_v59 = vld [vmem:[%s14701_s15 + $0x830] sm:$0xff]  ;;  %v8911_v13 = vld [vmem:[%s14701_s15 + $0x968] sm:$0xff] }
 0xff3   : > { %8858 = vmatmul.mubr.msk.f32.vlgmr.msra.gmra.mrb[64].mxu0 %vm771_vm1, %v13492_v35  ;;  %8859 = vmatmul.mubr.msk.f32.vlgmr.msra.gmra.mrb[64].mxu1 %vm771_vm1, %v13492_v35 }
 0xff4   : > { %10908 = vmatpush1.bf16.msra.mxu0 %v10907_v32  ;;  %10916 = vmatpush1.bf16.msra.mxu1 %v10915_v33  ;;  %v10949_v32 = vpack.c.bf16 %v8855_v26, %v8839_v25  ;;  %v8838_v33 = vld [vmem:[%s14699_s13 + $0x370] sm:$0xff]  ;;  %v8873_v25 = vld [vmem:[%s14701_s15 + $0x838] sm:$0xff] }
 0xff5   : > { %10910 = vmatprep.subr.bf16.mxu0 %v10909_v36  ;;  %10918 = vmatprep.subr.bf16.mxu1 %v10917_v38  ;;  %v8883_v36 = vld [vmem:[%s14701_s15 + $0x888] sm:$0xff]  ;;  %v8914_v38 = vld [vmem:[%s14701_s15 + $0x980] sm:$0xff]  ;;  %v10951_v51 = vpack.c.bf16 %v8854_v58, %v8838_v33  ;;  %v10967_v58 = vpack.c.bf16 %v8873_v25, %v8872_v59  ;;  %v8912_v59 = vld [vmem:[%s14701_s15 + $0x970] sm:$0xff] }
 0xff6   : > { %6599 = vmatprep.mubr.f32.mxu0 %v11433_v15  ;;  %6670 = vmatprep.mubr.f32.mxu1 %v11433_v15  ;;  %v10953_v28 = vpack.c.bf16 %v8883_v36, %v8882_v34  ;;  %v8923_v33 = vld [vmem:[%s14701_s15 + $0x9c8] sm:$0xff]  ;;  %v8874_v36 = vld [vmem:[%s14701_s15 + $0x840] sm:$0xff]  ;;  %v8913_v25 = vld [vmem:[%s14701_s15 + $0x978] sm:$0xff] }
 0xff8   : > { %10912 = vmatpush1.bf16.msra.mxu0 %v10911_v43  ;;  %10920 = vmatpush1.bf16.msra.mxu1 %v10919_v44  ;;  %v10985_v43 = vpack.c.bf16 %v8915_v40, %v8914_v38  ;;  %v8898_v44 = vld [vmem:[%s14701_s15 + $0x900] sm:$0xff]  ;;  %v8875_v38 = vld [vmem:[%s14701_s15 + $0x848] sm:$0xff] }
 0xff9   : > { %10922 = vmatprep.subr.bf16.mxu0 %v10921_v48  ;;  %10930 = vmatprep.subr.bf16.mxu1 %v10929_v54  ;;  %v8885_v48 = vld [vmem:[%s14701_s15 + $0x898] sm:$0xff]  ;;  %v8916_v54 = vld [vmem:[%s14701_s15 + $0x990] sm:$0xff]  ;;  %v10987_v57 = vpack.c.bf16 %v8899_v12, %v8898_v44  ;;  %v10971_v12 = vpack.c.bf16 %v8875_v38, %v8874_v36 }
 0xffa   : > { %v10957_v21 = vpack.c.bf16 %v8885_v48, %v8884_v47  ;;  %v8925_v44 = vld [vmem:[%s14701_s15 + $0x9d8] sm:$0xff]  ;;  %v8876_v48 = vld [vmem:[%s14701_s15 + $0x850] sm:$0xff] }
 0xffb   : > { %8860 = vmatmul.mubr.msk.f32.vlgmr.msra.gmra.mrb[66].mxu0 %vm771_vm1, %v13492_v35  ;;  %8861 = vmatmul.mubr.msk.f32.vlgmr.msra.gmra.mrb[66].mxu1 %vm771_vm1, %v13492_v35 }
 0xffc   : > { %10924 = vmatpush1.bf16.msra.mxu0 %v10923_v0  ;;  %10932 = vmatpush1.bf16.msra.mxu1 %v10931_v1  ;;  %v10989_v0 = vpack.c.bf16 %v8917_v55, %v8916_v54  ;;  %v8900_v1 = vld [vmem:[%s14701_s15 + $0x910] sm:$0xff]  ;;  %v8877_v54 = vld [vmem:[%s14701_s15 + $0x858] sm:$0xff] }
 0xffd   : > { %10926 = vmatprep.subr.bf16.mxu0 %v10925_v7  ;;  %10934 = vmatprep.subr.bf16.mxu1 %v10933_v8  ;;  %v8887_v7 = vld [vmem:[%s14701_s15 + $0x8a8] sm:$0xff]  ;;  %v8918_v8 = vld [vmem:[%s14701_s15 + $0x9a0] sm:$0xff]  ;;  %v10991_v11 = vpack.c.bf16 %v8901_v2, %v8900_v1  ;;  %v10975_v2 = vpack.c.bf16 %v8877_v54, %v8876_v48  ;;  %v8948_v48 = vld [vmem:[%s14701_s15 + $0xa90] sm:$0xff] }
 0xffe   : > { %6741 = vmatprep.mubr.f32.mxu0 %v11433_v15  ;;  %6812 = vmatprep.mubr.f32.mxu1 %v11433_v15  ;;  %v10961_v30 = vpack.c.bf16 %v8887_v7, %v8886_v6  ;;  %v8927_v1 = vld [vmem:[%s14701_s15 + $0x9e8] sm:$0xff]  ;;  %v8878_v7 = vld [vmem:[%s14701_s15 + $0x860] sm:$0xff] }
0x1000   : > { %10928 = vmatpush1.bf16.msra.mxu0 %v10927_v45  ;;  %10936 = vmatpush1.bf16.msra.mxu1 %v10935_v16  ;;  %v10993_v45 = vpack.c.bf16 %v8919_v9, %v8918_v8  ;;  %v8902_v16 = vld [vmem:[%s14701_s15 + $0x920] sm:$0xff] }
0x1001   : > { %10938 = vmatprep.subr.bf16.mxu0 %v10937_v22  ;;  %10946 = vmatprep.subr.bf16.mxu1 %v10945_v5  ;;  %v8889_v22 = vld [vmem:[%s14701_s15 + $0x8b8] sm:$0xff]  ;;  %v8920_v5 = vld [vmem:[%s14701_s15 + $0x9b0] sm:$0xff]  ;;  %v10995_v24 = vpack.c.bf16 %v8903_v60, %v8902_v16 }
0x1002   : > { %v10965_v26 = vpack.c.bf16 %v8889_v22, %v8888_v18  ;;  %v8897_v16 = vld [vmem:[%s14701_s15 + $0x8f8] sm:$0xff]  ;;  %v8928_v60 = vld [vmem:[%s14701_s15 + $0x9f0] sm:$0xff] }
0x1003   : > { %8862 = vmatmul.mubr.msk.f32.vlgmr.msra.gmra.mrb[68].mxu0 %vm771_vm1, %v13492_v35  ;;  %8863 = vmatmul.mubr.msk.f32.vlgmr.msra.gmra.mrb[68].mxu1 %vm771_vm1, %v13492_v35  ;;  %v8929_v22 = vld [vmem:[%s14701_s15 + $0x9f8] sm:$0xff] }
0x1004   : > { %10940 = vmatpush1.bf16.msra.mxu0 %v10939_v39  ;;  %10948 = vmatpush1.bf16.msra.mxu1 %v10947_v27  ;;  %v10997_v39 = vpack.c.bf16 %v8921_v46, %v8920_v5  ;;  %v8904_v27 = vld [vmem:[%s14701_s15 + $0x930] sm:$0xff]  ;;  %v8881_v46 = vld [vmem:[%s14701_s15 + $0x878] sm:$0xff] }
0x1005   : > { %10942 = vmatprep.subr.bf16.mxu0 %v10941_v31  ;;  %10950 = vmatprep.subr.bf16.mxu1 %v10949_v32  ;;  %v8891_v31 = vld [vmem:[%s14701_s15 + $0x8c8] sm:$0xff]  ;;  %v8922_v32 = vld [vmem:[%s14701_s15 + $0x9c0] sm:$0xff]  ;;  %v10999_v34 = vpack.c.bf16 %v8905_v49, %v8904_v27  ;;  %v8880_v5 = vld [vmem:[%s14701_s15 + $0x870] sm:$0xff] }
0x1006   : > { %6883 = vmatprep.mubr.f32.mxu0 %v11433_v15  ;;  %6954 = vmatprep.mubr.f32.mxu1 %v11433_v15  ;;  %v10969_v40 = vpack.c.bf16 %v8891_v31, %v8890_v29  ;;  %v8947_v27 = vld [vmem:[%s14701_s15 + $0xa88] sm:$0xff]  ;;  %v8978_v49 = vld [vmem:[%s14701_s15 + $0xb80] sm:$0xff] }
0x1007   : > { %v8979_v31 = vld [vmem:[%s14701_s15 + $0xb88] sm:$0xff] }
0x1008   : > { %10944 = vmatpush1.bf16.msra.mxu0 %v10943_v41  ;;  %10952 = vmatpush1.bf16.msra.mxu1 %v10951_v51  ;;  %v11001_v41 = vpack.c.bf16 %v8923_v33, %v8922_v32  ;;  %v8906_v51 = vld [vmem:[%s14701_s15 + $0x940] sm:$0xff]  ;;  %v11049_v32 = vpack.c.bf16 %v8979_v31, %v8978_v49  ;;  %v13825_v33 = vld [vmem:[%s14700_s14 + $0x10] sm:$0xff] }
0x1009   : > { %10954 = vmatprep.subr.bf16.mxu0 %v10953_v28  ;;  %10986 = vmatprep.subr.bf16.mxu1 %v10985_v43  ;;  %v8893_v28 = vld [vmem:[%s14701_s15 + $0x8d8] sm:$0xff]  ;;  %v8924_v43 = vld [vmem:[%s14701_s15 + $0x9d0] sm:$0xff]  ;;  %v11003_v47 = vpack.c.bf16 %v8907_v17, %v8906_v51  ;;  %v6317_v36 = vrot.slane %v13825_v33, %v12392_v52  ;;  %v6325_v38 = vrot.slane %v13825_v33, %v12395_v53  ;;  %v8930_v51 = vld [vmem:[%s14701_s15 + $0xa00] sm:$0xff] }
0x100a   : > { %v10973_v55 = vpack.c.bf16 %v8893_v28, %v8892_v42  ;;  %v8931_v17 = vld [vmem:[%s14701_s15 + $0xa08] sm:$0xff]  ;;  %v8966_v49 = vld [vmem:[%s14701_s15 + $0xb20] sm:$0xff]  ;;  %v8952_v31 = vld [vmem:[%s14701_s15 + $0xab0] sm:$0xff] }
0x100b   : > { %8864 = vmatmul.mubr.msk.f32.vlgmr.msra.gmra.mrb[70].mxu0 %vm771_vm1, %v13492_v35  ;;  %8865 = vmatmul.mubr.msk.f32.vlgmr.msra.gmra.mrb[70].mxu1 %vm771_vm1, %v13492_v35 }
0x100c   : > { %10956 = vmatpush3.bf16.msra.mxu0 %v10955_v56  ;;  %10988 = vmatpush3.bf16.msra.mxu1 %v10987_v57  ;;  %v11005_v56 = vpack.c.bf16 %v8925_v44, %v8924_v43  ;;  %v8908_v57 = vld [vmem:[%s14701_s15 + $0x950] sm:$0xff] }
0x100d   : > { %10958 = vmatprep.subr.bf16.mxu0 %v10957_v21  ;;  %10990 = vmatprep.subr.bf16.mxu1 %v10989_v0  ;;  %v8895_v21 = vld [vmem:[%s14701_s15 + $0x8e8] sm:$0xff]  ;;  %v8926_v0 = vld [vmem:[%s14701_s15 + $0x9e0] sm:$0xff]  ;;  %v11007_v6 = vpack.c.bf16 %v8909_v61, %v8908_v57  ;;  %v8980_v57 = vld [vmem:[%s14701_s15 + $0xb90] sm:$0xff] }
0x100e   : > { %v10977_v8 = vpack.c.bf16 %v8895_v21, %v8894_v63  ;;  %v11009_v9 = vpack.c.bf16 %v8927_v1, %v8926_v0  ;;  %v8981_v61 = vld [vmem:[%s14701_s15 + $0xb98] sm:$0xff]  ;;  %v11019_v0 = vpack.c.bf16 %v8931_v17, %v8930_v51 }
0x1010   : > { %10960 = vmatpush3.bf16.msra.mxu0 %v10959_v10  ;;  %10992 = vmatpush3.bf16.msra.mxu1 %v10991_v11  ;;  %v8879_v10 = vld [vmem:[%s14701_s15 + $0x868] sm:$0xff]  ;;  %v8910_v11 = vld [vmem:[%s14701_s15 + $0x960] sm:$0xff] }
0x1011   : > { %10962 = vmatprep.subr.bf16.mxu0 %v10961_v30  ;;  %10994 = vmatprep.subr.bf16.mxu1 %v10993_v45  ;;  %v10979_v14 = vpack.c.bf16 %v8879_v10, %v8878_v7  ;;  %v11011_v30 = vpack.c.bf16 %v8911_v13, %v8910_v11  ;;  %v8896_v45 = vld [vmem:[%s14701_s15 + $0x8f0] sm:$0xff]  ;;  %v11053_v10 = vpack.c.bf16 %v8981_v61, %v8980_v57  ;;  %v8965_v13 = vld [vmem:[%s14701_s15 + $0xb18] sm:$0xff] }
0x1012   : > { %v10981_v18 = vpack.c.bf16 %v8897_v16, %v8896_v45  ;;  %v8964_v11 = vld [vmem:[%s14701_s15 + $0xb10] sm:$0xff]  ;;  %v6341_v45 = vrot.slane %v13825_v33, %v12537_v20  ;;  %v8951_v16 = vld [vmem:[%s14701_s15 + $0xaa8] sm:$0xff] }
0x1014   : > { %10964 = vmatpush3.bf16.msra.mxu0 %v10963_v23  ;;  %10996 = vmatpush3.bf16.msra.mxu1 %v10995_v24  ;;  %v11013_v23 = vpack.c.bf16 %v8929_v22, %v8928_v60  ;;  %v10983_v24 = vpack.c.bf16 %v8881_v46, %v8880_v5  ;;  %v8982_v60 = vld [vmem:[%s14701_s15 + $0xba0] sm:$0xff] }
0x1015   : > { %10966 = vmatprep.subr.bf16.mxu0 %v10965_v26  ;;  %10998 = vmatprep.subr.bf16.mxu1 %v10997_v39  ;;  %v11015_v26 = vpack.c.bf16 %v8913_v25, %v8912_v59  ;;  %v8946_v39 = vld [vmem:[%s14701_s15 + $0xa80] sm:$0xff]  ;;  %v8935_v59 = vld [vmem:[%s14701_s15 + $0xa28] sm:$0xff] }
0x1016   : > { %v11017_v29 = vpack.c.bf16 %v8947_v27, %v8946_v39 }
0x1018   : > { %10968 = vmatpush3.bf16.msra.mxu0 %v10967_v58  ;;  %11000 = vmatpush3.bf16.msra.mxu1 %v10999_v34  ;;  %v6313_v58 = vrot.slane %v13825_v33, %v12384_v50  ;;  %v6321_v34 = vrot.slane %v13825_v33, %v12473_v37 }
0x1019   : > { %10970 = vmatprep.subr.bf16.mxu0 %v10969_v40  ;;  %11002 = vmatprep.subr.bf16.mxu1 %v11001_v41 }
0x101c   : > { %10972 = vmatpush3.bf16.msra.mxu0 %v10971_v12  ;;  %11004 = vmatpush3.bf16.msra.mxu1 %v11003_v47  ;;  %v8962_v12 = vld [vmem:[%s14701_s15 + $0xb00] sm:$0xff]  ;;  %v8963_v47 = vld [vmem:[%s14701_s15 + $0xb08] sm:$0xff] }
0x101d   : > { %10974 = vmatprep.subr.bf16.mxu0 %v10973_v55  ;;  %11006 = vmatprep.subr.bf16.mxu1 %v11005_v56  ;;  %v8949_v56 = vld [vmem:[%s14701_s15 + $0xa98] sm:$0xff]  ;;  %v11051_v1 = vpack.c.bf16 %v8963_v47, %v8962_v12  ;;  %v8968_v12 = vld [vmem:[%s14701_s15 + $0xb30] sm:$0xff] }
0x101e   : > { %v8969_v47 = vld [vmem:[%s14701_s15 + $0xb38] sm:$0xff] }
0x1020   : > { %10976 = vmatpush3.bf16.msra.mxu0 %v10975_v2  ;;  %11008 = vmatpush3.bf16.msra.mxu1 %v11007_v6  ;;  %v8932_v2 = vld [vmem:[%s14701_s15 + $0xa10] sm:$0xff]  ;;  %v8933_v6 = vld [vmem:[%s14701_s15 + $0xa18] sm:$0xff] }
0x1021   : > { %10978 = vmatprep.subr.bf16.mxu0 %v10977_v8  ;;  %11010 = vmatprep.subr.bf16.mxu1 %v11009_v9  ;;  %v11021_v9 = vpack.c.bf16 %v8949_v56, %v8948_v48  ;;  %v11023_v46 = vpack.c.bf16 %v8933_v6, %v8932_v2  ;;  %v8954_v48 = vld [vmem:[%s14701_s15 + $0xac0] sm:$0xff]  ;;  %v8987_v56 = vld [vmem:[%s14701_s15 + $0xbc8] sm:$0xff] }
0x1024   : > { %10980 = vmatpush3.bf16.msra.mxu0 %v10979_v14  ;;  %11012 = vmatpush3.bf16.msra.mxu1 %v11011_v30  ;;  %v8950_v14 = vld [vmem:[%s14701_s15 + $0xaa0] sm:$0xff]  ;;  %v6333_v30 = vrot.slane %v13825_v33, %v12415_v3 }
0x1025   : > { %10982 = vmatprep.subr.bf16.mxu0 %v10981_v18  ;;  %11014 = vmatprep.subr.bf16.mxu1 %v11013_v23  ;;  %v8983_v18 = vld [vmem:[%s14701_s15 + $0xba8] sm:$0xff]  ;;  %v11055_v23 = vpack.c.bf16 %v8965_v13, %v8964_v11  ;;  %v11025_v39 = vpack.c.bf16 %v8951_v16, %v8950_v14  ;;  %v8956_v11 = vld [vmem:[%s14701_s15 + $0xad0] sm:$0xff]  ;;  %v8957_v13 = vld [vmem:[%s14701_s15 + $0xad8] sm:$0xff] }
0x1026   : > { %v11057_v27 = vpack.c.bf16 %v8983_v18, %v8982_v60  ;;  %v8988_v14 = vld [vmem:[%s14701_s15 + $0xbd0] sm:$0xff] }
0x1027   : > { %v8940_v18 = vld [vmem:[%s14701_s15 + $0xa50] sm:$0xff] }
0x1028   : > { %10984 = vmatpush3.bf16.msra.mxu0 %v10983_v24  ;;  %11016 = vmatpush3.bf16.msra.mxu1 %v11015_v26  ;;  %v8934_v24 = vld [vmem:[%s14701_s15 + $0xa20] sm:$0xff] }
0x1029   : > { %11018 = vmatprep.subr.bf16.mxu0 %v11017_v29  ;;  %11050 = vmatprep.subr.bf16.mxu1 %v11049_v32  ;;  %v8967_v29 = vld [vmem:[%s14701_s15 + $0xb28] sm:$0xff]  ;;  %v11027_v51 = vpack.c.bf16 %v8935_v59, %v8934_v24  ;;  %v11037_v24 = vpack.c.bf16 %v8957_v13, %v8956_v11 }
0x102a   : > { %v11059_v17 = vpack.c.bf16 %v8967_v29, %v8966_v49  ;;  %v8990_v49 = vld [vmem:[%s14701_s15 + $0xbe0] sm:$0xff]  ;;  %v8991_v29 = vld [vmem:[%s14701_s15 + $0xbe8] sm:$0xff] }
0x102b   : > { %v9011_v11 = vld [vmem:[%s14701_s15 + $0xc88] sm:$0xff] }
0x10c6   : > { %v6459_v40 = vpop.f32.mrb[64].mxu0  ;;  %v6530_v41 = vpop.f32.mrb[64].mxu1 }
0x10c7   : > { %v6460_v42 = vadd.f32 %v6459_v40, %v6313_v58  ;;  %v6531_v28 = vadd.f32 %v6530_v41, %v6321_v34  ;;  %v6461_v43 = vpop.f32.mrb[65].mxu0  ;;  %v6532_v44 = vpop.f32.mrb[65].mxu1  ;;  %v8953_v34 = vld [vmem:[%s14701_s15 + $0xab8] sm:$0xff] }
0x10c8   : > { %v6462_v54 = vadd.f32 %v6461_v43, %v6317_v36  ;;  %v6533_v55 = vadd.f32 %v6532_v44, %v6325_v38  ;;  %v8984_v36 = vld [vmem:[%s14701_s15 + $0xbb0] sm:$0xff]  ;;  %v8985_v38 = vld [vmem:[%s14701_s15 + $0xbb8] sm:$0xff]  ;;  %v11029_v43 = vpack.c.bf16 %v8953_v34, %v8952_v31 }
0x10c9   : > { %v6961_v7 = vmax.f32 %v6460_v42, 0.0  ;;  %v6963_v8 = vmax.f32 %v6531_v28, 0.0  ;;  %v8936_v42 = vld [vmem:[%s14701_s15 + $0xa30] sm:$0xff]  ;;  %v8937_v28 = vld [vmem:[%s14701_s15 + $0xa38] sm:$0xff]  ;;  %v11061_v44 = vpack.c.bf16 %v8985_v38, %v8984_v36  ;;  %v8942_v36 = vld [vmem:[%s14701_s15 + $0xa60] sm:$0xff] }
0x10ca   : > { %v6962_v63 = vmax.f32 %v6462_v54, 0.0  ;;  %v6964_v21 = vmax.f32 %v6533_v55, 0.0  ;;  %v8955_v54 = vld [vmem:[%s14701_s15 + $0xac8] sm:$0xff]  ;;  %v8986_v55 = vld [vmem:[%s14701_s15 + $0xbc0] sm:$0xff] }
0x10cb   : > { %v8943_v38 = vld [vmem:[%s14701_s15 + $0xa68] sm:$0xff] }
0x10cc   : > { %7306 = vmatprep.mubr.f32.mxu0 %v6962_v63  ;;  %7376 = vmatprep.mubr.f32.mxu1 %v6964_v21  ;;  %v11031_v63 = vpack.c.bf16 %v8937_v28, %v8936_v42  ;;  %v11063_v21 = vpack.c.bf16 %v8969_v47, %v8968_v12  ;;  %v11073_v42 = vpack.c.bf16 %v8991_v29, %v8990_v49  ;;  %v8974_v28 = vld [vmem:[%s14701_s15 + $0xb60] sm:$0xff]  ;;  %v8961_v12 = vld [vmem:[%s14701_s15 + $0xaf8] sm:$0xff]  ;;  %v8992_v47 = vld [vmem:[%s14701_s15 + $0xbf0] sm:$0xff] }
0x10cd   : > { %7307 = vmatmul.mubr.f32.vlgmr.msra.gmra.mrb[72].mxu0 %v6961_v7  ;;  %7377 = vmatmul.mubr.f32.vlgmr.msra.gmra.mrb[72].mxu1 %v6963_v8  ;;  %v11033_v7 = vpack.c.bf16 %v8955_v54, %v8954_v48  ;;  %v11065_v8 = vpack.c.bf16 %v8987_v56, %v8986_v55  ;;  %v8993_v48 = vld [vmem:[%s14701_s15 + $0xbf8] sm:$0xff]  ;;  %v6329_v54 = vrot.slane %v13825_v33, %v12406_v62 }
0x10ce   : > { %v13887_v22 = vpop.f32.mrb[66].mxu0  ;;  %v13889_v5 = vpop.f32.mrb[66].mxu1  ;;  %11020 = vmatpush3.bf16.msra.mxu0 %v11019_v0  ;;  %11052 = vmatpush3.bf16.msra.mxu1 %v11051_v1  ;;  %v8938_v0 = vld [vmem:[%s14701_s15 + $0xa40] sm:$0xff]  ;;  %v8939_v1 = vld [vmem:[%s14701_s15 + $0xa48] sm:$0xff]  ;;  %v11043_v55 = vpack.c.bf16 %v8943_v38, %v8942_v36 }
0x10cf   : > { %v6603_v25 = vpop.f32.mrb[67].mxu0  ;;  %v6674_v26 = vpop.f32.mrb[67].mxu1  ;;  %11022 = vmatprep.subr.bf16.mxu0 %v11021_v9  ;;  %11054 = vmatprep.subr.bf16.mxu1 %v11053_v10  ;;  %v8970_v9 = vld [vmem:[%s14701_s15 + $0xb40] sm:$0xff]  ;;  %v8971_v10 = vld [vmem:[%s14701_s15 + $0xb48] sm:$0xff]  ;;  %v11035_v16 = vpack.c.bf16 %v8939_v1, %v8938_v0  ;;  %v8976_v0 = vld [vmem:[%s14701_s15 + $0xb70] sm:$0xff]  ;;  %v6337_v1 = vrot.slane %v13825_v33, %v12534_v19 }
0x10d0   : > { %v6604_v32 = vadd.f32 %v6603_v25, %v6333_v30  ;;  %v6675_v58 = vadd.f32 %v6674_v26, %v6341_v45  ;;  %v8989_v30 = vld [vmem:[%s14701_s15 + $0xbd8] sm:$0xff]  ;;  %v11067_v60 = vpack.c.bf16 %v8971_v10, %v8970_v9  ;;  %v8972_v25 = vld [vmem:[%s14701_s15 + $0xb50] sm:$0xff]  ;;  %v9010_v10 = vld [vmem:[%s14701_s15 + $0xc80] sm:$0xff] }
0x10d1   : > { %v13974_v45 = vld [vmem:[%s14700_s14 + $0x18] sm:$0xff]  ;;  %v11069_v59 = vpack.c.bf16 %v8989_v30, %v8988_v14  ;;  %v9043_v33 = vld [vmem:[%s14701_s15 + $0xd88] sm:$0xff] }
0x10d2   : > { %v6966_v40 = vmax.f32 %v6604_v32, 0.0  ;;  %v6968_v41 = vmax.f32 %v6675_v58, 0.0  ;;  %11024 = vmatpush3.bf16.msra.mxu0 %v11023_v46  ;;  %11056 = vmatpush3.bf16.msra.mxu1 %v11055_v23  ;;  %v8941_v46 = vld [vmem:[%s14701_s15 + $0xa58] sm:$0xff]  ;;  %v6369_v23 = vrot.slane %v13974_v45, %v12534_v19  ;;  %v6349_v13 = vrot.slane %v13974_v45, %v12392_v52  ;;  %v9042_v19 = vld [vmem:[%s14701_s15 + $0xd80] sm:$0xff] }
0x10d3   : > { %11026 = vmatprep.subr.bf16.mxu0 %v11025_v39  ;;  %11058 = vmatprep.subr.bf16.mxu1 %v11057_v27  ;;  %v8973_v26 = vld [vmem:[%s14701_s15 + $0xb58] sm:$0xff]  ;;  %v8958_v39 = vld [vmem:[%s14701_s15 + $0xae0] sm:$0xff]  ;;  %v8959_v27 = vld [vmem:[%s14701_s15 + $0xae8] sm:$0xff]  ;;  %v11039_v58 = vpack.c.bf16 %v8941_v46, %v8940_v18  ;;  %v6357_v14 = vrot.slane %v13974_v45, %v12395_v53  ;;  %v6602_v18 = vadd.f32 %v13887_v22, %v6329_v54 }
0x10d4   : > { %7446 = vmatprep.mubr.f32.mxu0 %v6966_v40  ;;  %7516 = vmatprep.mubr.f32.mxu1 %v6968_v41  ;;  %v11071_v34 = vpack.c.bf16 %v8973_v26, %v8972_v25  ;;  %v8977_v9 = vld [vmem:[%s14701_s15 + $0xb78] sm:$0xff]  ;;  %v6673_v52 = vadd.f32 %v13889_v5, %v6337_v1  ;;  %v11113_v46 = vpack.c.bf16 %v9043_v33, %v9042_v19  ;;  %v8995_v53 = vld [vmem:[%s14701_s15 + $0xc08] sm:$0xff]  ;;  %v9012_v5 = vld [vmem:[%s14701_s15 + $0xc90] sm:$0xff] }
0x10d5   : > { %v9027_v22 = vld [vmem:[%s14701_s15 + $0xd08] sm:$0xff]  ;;  %v9013_v26 = vld [vmem:[%s14701_s15 + $0xc98] sm:$0xff]  ;;  %v6965_v49 = vmax.f32 %v6602_v18, 0.0  ;;  %v9000_v33 = vld [vmem:[%s14701_s15 + $0xc30] sm:$0xff] }
0x10d6   : > { %v13939_v57 = vpop.f32.mrb[68].mxu0  ;;  %v13941_v61 = vpop.f32.mrb[68].mxu1  ;;  %11028 = vmatpush3.bf16.msra.mxu0 %v11027_v51  ;;  %11060 = vmatpush3.bf16.msra.mxu1 %v11059_v17  ;;  %v11041_v17 = vpack.c.bf16 %v8959_v27, %v8958_v39  ;;  %v9045_v39 = vld [vmem:[%s14701_s15 + $0xd98] sm:$0xff]  ;;  %v6967_v29 = vmax.f32 %v6673_v52, 0.0  ;;  %v11085_v38 = vpack.c.bf16 %v9013_v26, %v9012_v5  ;;  %v9031_v1 = vld [vmem:[%s14701_s15 + $0xd28] sm:$0xff]  ;;  %v9018_v18 = vld [vmem:[%s14701_s15 + $0xcc0] sm:$0xff] }
0x10d7   : > { %v13949_v2 = vpop.f32.mrb[69].mxu0  ;;  %v13951_v6 = vpop.f32.mrb[69].mxu1  ;;  %11030 = vmatprep.subr.bf16.mxu0 %v11029_v43  ;;  %11062 = vmatprep.subr.bf16.mxu1 %v11061_v44  ;;  %v8975_v43 = vld [vmem:[%s14701_s15 + $0xb68] sm:$0xff]  ;;  %v8960_v44 = vld [vmem:[%s14701_s15 + $0xaf0] sm:$0xff] }
0x10d8   : > { %v11075_v56 = vpack.c.bf16 %v8975_v43, %v8974_v28  ;;  %v6817_v25 = vadd.f32 %v13951_v6, %v6357_v14  ;;  %v9014_v28 = vld [vmem:[%s14701_s15 + $0xca0] sm:$0xff]  ;;  %v9015_v43 = vld [vmem:[%s14701_s15 + $0xca8] sm:$0xff]  ;;  %v9001_v14 = vld [vmem:[%s14701_s15 + $0xc38] sm:$0xff] }
0x10d9   : > { %v9019_v52 = vld [vmem:[%s14701_s15 + $0xcc8] sm:$0xff] }
0x10da   : > { %11032 = vmatpush3.bf16.msra.mxu0 %v11031_v63  ;;  %11064 = vmatpush3.bf16.msra.mxu1 %v11063_v21  ;;  %v8944_v63 = vld [vmem:[%s14701_s15 + $0xa70] sm:$0xff]  ;;  %v8945_v21 = vld [vmem:[%s14701_s15 + $0xa78] sm:$0xff]  ;;  %v9003_v5 = vld [vmem:[%s14701_s15 + $0xc48] sm:$0xff] }
0x10db   : > { %11034 = vmatprep.subr.bf16.mxu0 %v11033_v7  ;;  %11066 = vmatprep.subr.bf16.mxu1 %v11065_v8  ;;  %v11045_v7 = vpack.c.bf16 %v8961_v12, %v8960_v44  ;;  %v11077_v8 = vpack.c.bf16 %v8993_v48, %v8992_v47  ;;  %v11047_v30 = vpack.c.bf16 %v8945_v21, %v8944_v63  ;;  %v6972_v44 = vmax.f32 %v6817_v25, 0.0  ;;  %v9046_v12 = vld [vmem:[%s14701_s15 + $0xda0] sm:$0xff]  ;;  %v9047_v47 = vld [vmem:[%s14701_s15 + $0xda8] sm:$0xff] }
0x10dc   : > { %v8999_v63 = vld [vmem:[%s14701_s15 + $0xc28] sm:$0xff]  ;;  %v9030_v21 = vld [vmem:[%s14701_s15 + $0xd20] sm:$0xff] }
0x10dd   : > { %v9034_v25 = vld [vmem:[%s14701_s15 + $0xd40] sm:$0xff] }
0x10de   : > { %v14002_v31 = vpop.f32.mrb[70].mxu0  ;;  %v6956_v32 = vpop.f32.mrb[70].mxu1  ;;  %11036 = vmatpush3.bf16.msra.mxu0 %v11035_v16  ;;  %11068 = vmatpush3.bf16.msra.mxu1 %v11067_v60  ;;  %v11079_v16 = vpack.c.bf16 %v8977_v9, %v8976_v0  ;;  %v11081_v60 = vpack.c.bf16 %v9011_v11, %v9010_v10  ;;  %v11121_v0 = vpack.c.bf16 %v9047_v47, %v9046_v12  ;;  %v9048_v9 = vld [vmem:[%s14701_s15 + $0xdb0] sm:$0xff]  ;;  %v9049_v10 = vld [vmem:[%s14701_s15 + $0xdb8] sm:$0xff]  ;;  %v9055_v12 = vld [vmem:[%s14701_s15 + $0xde8] sm:$0xff] }
0x10df   : > { %v14010_v40 = vadd.f32 %v6956_v32, %v6369_v23  ;;  %v14012_v41 = vpop.f32.mrb[71].mxu0  ;;  %v14014_v51 = vpop.f32.mrb[71].mxu1  ;;  %11038 = vmatprep.subr.bf16.mxu0 %v11037_v24  ;;  %11070 = vmatprep.subr.bf16.mxu1 %v11069_v59  ;;  %v8994_v23 = vld [vmem:[%s14701_s15 + $0xc00] sm:$0xff]  ;;  %v6746_v24 = vadd.f32 %v13949_v2, %v6349_v13  ;;  %v9044_v2 = vld [vmem:[%s14701_s15 + $0xd90] sm:$0xff]  ;;  %v11123_v13 = vpack.c.bf16 %v9031_v1, %v9030_v21 }
0x10e0   : > { %v9026_v59 = vld [vmem:[%s14701_s15 + $0xd00] sm:$0xff]  ;;  %v11083_v27 = vpack.c.bf16 %v8995_v53, %v8994_v23  ;;  %v8996_v32 = vld [vmem:[%s14701_s15 + $0xc10] sm:$0xff]  ;;  %v9051_v23 = vld [vmem:[%s14701_s15 + $0xdc8] sm:$0xff]  ;;  %v11095_v53 = vpack.c.bf16 %v9001_v14, %v9000_v33 }
0x10e1   : > { %v11115_v6 = vpack.c.bf16 %v9027_v22, %v9026_v59  ;;  %v6970_v36 = vmax.f32 %v6746_v24, 0.0  ;;  %v11097_v59 = vpack.c.bf16 %v9019_v52, %v9018_v18  ;;  %v9002_v22 = vld [vmem:[%s14701_s15 + $0xc40] sm:$0xff]  ;;  %v9024_v1 = vld [vmem:[%s14701_s15 + $0xcf0] sm:$0xff]  ;;  %v9009_v14 = vld [vmem:[%s14701_s15 + $0xc78] sm:$0xff] }
0x10e2   : > { %11040 = vmatpush3.bf16.msra.mxu0 %v11039_v58  ;;  %11072 = vmatpush3.bf16.msra.mxu1 %v11071_v34  ;;  %v8997_v58 = vld [vmem:[%s14701_s15 + $0xc18] sm:$0xff]  ;;  %v9028_v34 = vld [vmem:[%s14701_s15 + $0xd10] sm:$0xff]  ;;  %v9074_v18 = vld [vmem:[%s14701_s15 + $0xe80] sm:$0xff] }
0x10e3   : > { %11042 = vmatprep.subr.bf16.mxu0 %v11041_v17  ;;  %11074 = vmatprep.subr.bf16.mxu1 %v11073_v42  ;;  %v11117_v17 = vpack.c.bf16 %v9045_v39, %v9044_v2  ;;  %v9029_v42 = vld [vmem:[%s14701_s15 + $0xd18] sm:$0xff]  ;;  %v11087_v48 = vpack.c.bf16 %v8997_v58, %v8996_v32  ;;  %v9035_v2 = vld [vmem:[%s14701_s15 + $0xd48] sm:$0xff]  ;;  %v9020_v39 = vld [vmem:[%s14701_s15 + $0xcd0] sm:$0xff] }
0x10e4   : > { %v11119_v54 = vpack.c.bf16 %v9029_v42, %v9028_v34  ;;  %v11131_v32 = vpack.c.bf16 %v9035_v2, %v9034_v25  ;;  %v9004_v34 = vld [vmem:[%s14701_s15 + $0xc50] sm:$0xff]  ;;  %v9037_v42 = vld [vmem:[%s14701_s15 + $0xd58] sm:$0xff]  ;;  %v9075_v52 = vld [vmem:[%s14701_s15 + $0xe88] sm:$0xff] }
0x10e5   : > { %v9008_v33 = vld [vmem:[%s14701_s15 + $0xc70] sm:$0xff]  ;;  %v9059_v25 = vld [vmem:[%s14701_s15 + $0xe08] sm:$0xff] }
0x10e6   : > { %11044 = vmatpush3.bf16.msra.mxu0 %v11043_v55  ;;  %11076 = vmatpush3.bf16.msra.mxu1 %v11075_v56  ;;  %v11089_v55 = vpack.c.bf16 %v9015_v43, %v9014_v28  ;;  %v8998_v56 = vld [vmem:[%s14701_s15 + $0xc20] sm:$0xff]  ;;  %v9023_v43 = vld [vmem:[%s14701_s15 + $0xce8] sm:$0xff] }
0x10e7   : > { %11046 = vmatprep.subr.bf16.mxu0 %v11045_v7  ;;  %11078 = vmatprep.subr.bf16.mxu1 %v11077_v8  ;;  %v9016_v7 = vld [vmem:[%s14701_s15 + $0xcb0] sm:$0xff]  ;;  %v9017_v8 = vld [vmem:[%s14701_s15 + $0xcb8] sm:$0xff]  ;;  %v11091_v11 = vpack.c.bf16 %v8999_v63, %v8998_v56  ;;  %v9022_v28 = vld [vmem:[%s14701_s15 + $0xce0] sm:$0xff] }
0x10e8   : > { %v11093_v19 = vpack.c.bf16 %v9017_v8, %v9016_v7  ;;  %v9007_v56 = vld [vmem:[%s14701_s15 + $0xc68] sm:$0xff]  ;;  %v9038_v63 = vld [vmem:[%s14701_s15 + $0xd60] sm:$0xff]  ;;  %v9025_v7 = vld [vmem:[%s14701_s15 + $0xcf8] sm:$0xff] }
0x10e9   : > { %v9056_v8 = vld [vmem:[%s14701_s15 + $0xdf0] sm:$0xff]  ;;  %v9091_v2 = vld [vmem:[%s14701_s15 + $0xf08] sm:$0xff] }
0x10ea   : > { %11048 = vmatpush3.bf16.msra.mxu0 %v11047_v30  ;;  %11080 = vmatpush3.bf16.msra.mxu1 %v11079_v16  ;;  %v9032_v30 = vld [vmem:[%s14701_s15 + $0xd30] sm:$0xff]  ;;  %v11125_v16 = vpack.c.bf16 %v9049_v10, %v9048_v9  ;;  %v9057_v9 = vld [vmem:[%s14701_s15 + $0xdf8] sm:$0xff] }
0x10eb   : > { %11082 = vmatprep.subr.bf16.mxu0 %v11081_v60  ;;  %11114 = vmatprep.subr.bf16.mxu1 %v11113_v46  ;;  %v9033_v60 = vld [vmem:[%s14701_s15 + $0xd38] sm:$0xff]  ;;  %v9050_v46 = vld [vmem:[%s14701_s15 + $0xdc0] sm:$0xff] }
0x10ec   : > { %v11127_v24 = vpack.c.bf16 %v9033_v60, %v9032_v30  ;;  %v11129_v26 = vpack.c.bf16 %v9051_v23, %v9050_v46  ;;  %v9040_v30 = vld [vmem:[%s14701_s15 + $0xd70] sm:$0xff]  ;;  %v9041_v60 = vld [vmem:[%s14701_s15 + $0xd78] sm:$0xff]  ;;  %v6365_v46 = vrot.slane %v13974_v45, %v12415_v3  ;;  %v9107_v23 = vld [vmem:[%s14701_s15 + $0xf88] sm:$0xff] }
0x10ed   : > { %7447 = vmatmul.mubr.f32.vlgmr.msra.gmra.mrb[74].mxu0 %v6965_v49  ;;  %7517 = vmatmul.mubr.f32.vlgmr.msra.gmra.mrb[74].mxu1 %v6967_v29  ;;  %v9052_v49 = vld [vmem:[%s14701_s15 + $0xdd0] sm:$0xff]  ;;  %v9053_v29 = vld [vmem:[%s14701_s15 + $0xdd8] sm:$0xff]  ;;  %v9058_v3 = vld [vmem:[%s14701_s15 + $0xe00] sm:$0xff] }
0x10ee   : > { %11084 = vmatpush3.bf16.msra.mxu0 %v11083_v27  ;;  %7586 = vmatprep.mubr.f32.mxu0 %v6970_v36  ;;  %v9021_v27 = vld [vmem:[%s14701_s15 + $0xcd8] sm:$0xff] }
0x10ef   : > { %11116 = vmatpush3.bf16.msra.mxu1 %v11115_v6  ;;  %7656 = vmatprep.mubr.f32.mxu1 %v6972_v44  ;;  %v11099_v6 = vpack.c.bf16 %v9003_v5, %v9002_v22  ;;  %v11101_v58 = vpack.c.bf16 %v9021_v27, %v9020_v39  ;;  %v9005_v36 = vld [vmem:[%s14701_s15 + $0xc58] sm:$0xff]  ;;  %v9054_v44 = vld [vmem:[%s14701_s15 + $0xde0] sm:$0xff]  ;;  %v11143_v22 = vpack.c.bf16 %v9041_v60, %v9040_v30  ;;  %v9076_v27 = vld [vmem:[%s14701_s15 + $0xe90] sm:$0xff] }
0x10f0   : > { %11086 = vmatprep.subr.bf16.mxu0 %v11085_v38  ;;  %11118 = vmatprep.subr.bf16.mxu1 %v11117_v17  ;;  %v9036_v38 = vld [vmem:[%s14701_s15 + $0xd50] sm:$0xff]  ;;  %v11133_v17 = vpack.c.bf16 %v9053_v29, %v9052_v49  ;;  %v11103_v47 = vpack.c.bf16 %v9005_v36, %v9004_v34  ;;  %v11137_v21 = vpack.c.bf16 %v9055_v12, %v9054_v44 }
0x10f1   : > { %v11145_v5 = vpack.c.bf16 %v9075_v52, %v9074_v18  ;;  %v6888_v39 = vadd.f32 %v14012_v41, %v6365_v46  ;;  %v11147_v29 = vpack.c.bf16 %v9059_v25, %v9058_v3  ;;  %v9109_v41 = vld [vmem:[%s14701_s15 + $0xf98] sm:$0xff]  ;;  %v9060_v34 = vld [vmem:[%s14701_s15 + $0xe10] sm:$0xff]  ;;  %v9082_v52 = vld [vmem:[%s14701_s15 + $0xec0] sm:$0xff] }
0x10f2   : > { %11088 = vmatpush3.bf16.msra.mxu0 %v11087_v48  ;;  %v11135_v48 = vpack.c.bf16 %v9037_v42, %v9036_v38  ;;  %v9092_v36 = vld [vmem:[%s14701_s15 + $0xf10] sm:$0xff]  ;;  %v9093_v42 = vld [vmem:[%s14701_s15 + $0xf18] sm:$0xff]  ;;  %v9083_v46 = vld [vmem:[%s14701_s15 + $0xec8] sm:$0xff] }
0x10f3   : > { %11120 = vmatpush3.bf16.msra.mxu1 %v11119_v54  ;;  %11090 = vmatprep.subr.bf16.mxu0 %v11089_v55  ;;  %v11105_v54 = vpack.c.bf16 %v9023_v43, %v9022_v28  ;;  %v9006_v55 = vld [vmem:[%s14701_s15 + $0xc60] sm:$0xff]  ;;  %v9079_v43 = vld [vmem:[%s14701_s15 + $0xea8] sm:$0xff]  ;;  %v6974_v44 = vmax.f32 %v6888_v39, 0.0  ;;  %v9064_v30 = vld [vmem:[%s14701_s15 + $0xe30] sm:$0xff] }
0x10f4   : > { %11122 = vmatprep.subr.bf16.mxu1 %v11121_v0  ;;  %v9039_v0 = vld [vmem:[%s14701_s15 + $0xd68] sm:$0xff]  ;;  %v11107_v10 = vpack.c.bf16 %v9007_v56, %v9006_v55  ;;  %v9078_v28 = vld [vmem:[%s14701_s15 + $0xea0] sm:$0xff]  ;;  %v11183_v56 = vpack.c.bf16 %v9093_v42, %v9092_v36  ;;  %v9097_v18 = vld [vmem:[%s14701_s15 + $0xf38] sm:$0xff] }
0x10f5   : > { %v9098_v3 = vld [vmem:[%s14701_s15 + $0xf40] sm:$0xff]  ;;  %v9117_v39 = vld [vmem:[%s14701_s15 + $0xfd8] sm:$0xff] }
0x10f6   : > { %11092 = vmatpush3.bf16.msra.mxu0 %v11091_v11  ;;  %v6345_v11 = vrot.slane %v13974_v45, %v12384_v50  ;;  %v11141_v50 = vpack.c.bf16 %v9057_v9, %v9056_v8  ;;  %v9095_v8 = vld [vmem:[%s14701_s15 + $0xf28] sm:$0xff]  ;;  %v9080_v9 = vld [vmem:[%s14701_s15 + $0xeb0] sm:$0xff]  ;;  %v9118_v36 = vld [vmem:[%s14701_s15 + $0xfe0] sm:$0xff] }
0x10f7   : > { %11124 = vmatpush3.bf16.msra.mxu1 %v11123_v13  ;;  %11094 = vmatprep.subr.bf16.mxu0 %v11093_v19  ;;  %v11139_v13 = vpack.c.bf16 %v9039_v0, %v9038_v63  ;;  %v11109_v19 = vpack.c.bf16 %v9025_v7, %v9024_v1  ;;  %v11153_v63 = vpack.c.bf16 %v9079_v43, %v9078_v28  ;;  %v9063_v0 = vld [vmem:[%s14701_s15 + $0xe28] sm:$0xff]  ;;  %v9094_v1 = vld [vmem:[%s14701_s15 + $0xf20] sm:$0xff] }
0x10f8   : > { %11126 = vmatprep.subr.bf16.mxu1 %v11125_v16  ;;  %v6353_v16 = vrot.slane %v13974_v45, %v12473_v37  ;;  %v9106_v37 = vld [vmem:[%s14701_s15 + $0xf80] sm:$0xff] }
0x10f9   : > { %v9070_v43 = vld [vmem:[%s14701_s15 + $0xe60] sm:$0xff] }
0x10fa   : > { %11096 = vmatpush3.bf16.msra.mxu0 %v11095_v53  ;;  %v6373_v53 = vrot.slane %v13974_v45, %v12537_v20  ;;  %v11177_v20 = vpack.c.bf16 %v9107_v23, %v9106_v37  ;;  %v9114_v37 = vld [vmem:[%s14701_s15 + $0xfc0] sm:$0xff]  ;;  %v9115_v23 = vld [vmem:[%s14701_s15 + $0xfc8] sm:$0xff] }
0x10fb   : > { %11128 = vmatpush3.bf16.msra.mxu1 %v11127_v24  ;;  %11098 = vmatprep.subr.bf16.mxu0 %v11097_v59  ;;  %v11111_v24 = vpack.c.bf16 %v9009_v14, %v9008_v33  ;;  %v6744_v59 = vadd.f32 %v13939_v57, %v6345_v11  ;;  %v9090_v57 = vld [vmem:[%s14701_s15 + $0xf00] sm:$0xff]  ;;  %v9112_v11 = vld [vmem:[%s14701_s15 + $0xfb0] sm:$0xff]  ;;  %v11187_v33 = vpack.c.bf16 %v9095_v8, %v9094_v1 }
0x10fc   : > { %11130 = vmatprep.subr.bf16.mxu1 %v11129_v26  ;;  %v6815_v26 = vadd.f32 %v13941_v61, %v6353_v16  ;;  %v9077_v61 = vld [vmem:[%s14701_s15 + $0xe98] sm:$0xff]  ;;  %v6959_v49 = vadd.f32 %v14014_v51, %v6373_v53  ;;  %v11193_v25 = vpack.c.bf16 %v9115_v23, %v9114_v37  ;;  %v9072_v8 = vld [vmem:[%s14701_s15 + $0xe70] sm:$0xff] }
0x10fd   : > { %v9061_v51 = vld [vmem:[%s14701_s15 + $0xe18] sm:$0xff] }
0x10fe   : > { %11100 = vmatpush3.bf16.msra.mxu0 %v11099_v6  ;;  %v9108_v6 = vld [vmem:[%s14701_s15 + $0xf90] sm:$0xff]  ;;  %v6971_v38 = vmax.f32 %v6815_v26, 0.0  ;;  %v11151_v55 = vpack.c.bf16 %v9061_v51, %v9060_v34  ;;  %v9065_v16 = vld [vmem:[%s14701_s15 + $0xe38] sm:$0xff]  ;;  %v9099_v26 = vld [vmem:[%s14701_s15 + $0xf48] sm:$0xff] }
0x10ff   : > { %11132 = vmatpush3.bf16.msra.mxu1 %v11131_v32  ;;  %11102 = vmatprep.subr.bf16.mxu0 %v11101_v58  ;;  %v6969_v32 = vmax.f32 %v6744_v59, 0.0  ;;  %v11179_v58 = vpack.c.bf16 %v9091_v2, %v9090_v57  ;;  %v11181_v12 = vpack.c.bf16 %v9109_v41, %v9108_v6  ;;  %v11159_v53 = vpack.c.bf16 %v9065_v16, %v9064_v30  ;;  %v9085_v57 = vld [vmem:[%s14701_s15 + $0xed8] sm:$0xff]  ;;  %v9116_v2 = vld [vmem:[%s14701_s15 + $0xfd0] sm:$0xff]  ;;  %v9086_v34 = vld [vmem:[%s14701_s15 + $0xee0] sm:$0xff] }
0x1100   : > { %11134 = vmatprep.subr.bf16.mxu1 %v11133_v17  ;;  %v11149_v17 = vpack.c.bf16 %v9077_v61, %v9076_v27  ;;  %v11161_v59 = vpack.c.bf16 %v9083_v46, %v9082_v52  ;;  %v11195_v61 = vpack.c.bf16 %v9099_v26, %v9098_v3  ;;  %v9069_v6 = vld [vmem:[%s14701_s15 + $0xe58] sm:$0xff]  ;;  %v9100_v41 = vld [vmem:[%s14701_s15 + $0xf50] sm:$0xff]  ;;  %v9087_v51 = vld [vmem:[%s14701_s15 + $0xee8] sm:$0xff] }
0x1101   : > { %v11169_v28 = vpack.c.bf16 %v9087_v51, %v9086_v34  ;;  %v9123_v16 = vld [vmem:[%s14702_s16 + $0x1] ss:$0 sm:$0xff] }
0x1102   : > { %11104 = vmatpush3.bf16.msra.mxu0 %v11103_v47  ;;  %v9110_v47 = vld [vmem:[%s14701_s15 + $0xfa0] sm:$0xff] }
0x1103   : > { %11136 = vmatpush3.bf16.msra.mxu1 %v11135_v48  ;;  %11106 = vmatprep.subr.bf16.mxu0 %v11105_v54  ;;  %v9111_v48 = vld [vmem:[%s14701_s15 + $0xfa8] sm:$0xff]  ;;  %v6976_v54 = vmax.f32 %v6959_v49, 0.0 }
0x1104   : > { %11138 = vmatprep.subr.bf16.mxu1 %v11137_v21  ;;  %v9062_v21 = vld [vmem:[%s14701_s15 + $0xe20] sm:$0xff]  ;;  %v11185_v7 = vpack.c.bf16 %v9111_v48, %v9110_v47  ;;  %v9103_v48 = vld [vmem:[%s14701_s15 + $0xf68] sm:$0xff] }
0x1106   : > { %11108 = vmatpush3.bf16.msra.mxu0 %v11107_v10  ;;  %v9081_v10 = vld [vmem:[%s14701_s15 + $0xeb8] sm:$0xff] }
0x1107   : > { %11140 = vmatpush3.bf16.msra.mxu1 %v11139_v13  ;;  %11110 = vmatprep.subr.bf16.mxu0 %v11109_v19  ;;  %v9113_v13 = vld [vmem:[%s14701_s15 + $0xfb8] sm:$0xff]  ;;  %v11155_v19 = vpack.c.bf16 %v9063_v0, %v9062_v21  ;;  %v11157_v14 = vpack.c.bf16 %v9081_v10, %v9080_v9  ;;  %v6361_v0 = vrot.slane %v13974_v45, %v12406_v62 }
0x1108   : > { %11142 = vmatprep.subr.bf16.mxu1 %v11141_v50  ;;  %v9096_v50 = vld [vmem:[%s14701_s15 + $0xf30] sm:$0xff]  ;;  %v11189_v60 = vpack.c.bf16 %v9113_v13, %v9112_v11  ;;  %v9073_v9 = vld [vmem:[%s14701_s15 + $0xe78] sm:$0xff] }
0x1109   : > { %v9104_v11 = vld [vmem:[%s14701_s15 + $0xf70] sm:$0xff]  ;;  %v9105_v62 = vld [vmem:[%s14701_s15 + $0xf78] sm:$0xff]  ;;  %v11175_v45 = vpack.c.bf16 %v9073_v9, %v9072_v8  ;;  %v6886_v13 = vadd.f32 %v14002_v31, %v6361_v0  ;;  %v9126_v9 = vld [vmem:[%s14703_s17 + $0x1] ss:$0 sm:$0xff] }
0x110a   : > { %11112 = vmatpush3.bf16.msra.mxu0 %v11111_v24  ;;  %v11191_v24 = vpack.c.bf16 %v9097_v18, %v9096_v50 }
0x110b   : > { %11144 = vmatpush3.bf16.msra.mxu1 %v11143_v22  ;;  %11146 = vmatprep.subr.bf16.mxu0 %v11145_v5  ;;  %v9066_v22 = vld [vmem:[%s14701_s15 + $0xe40] sm:$0xff]  ;;  %v9067_v5 = vld [vmem:[%s14701_s15 + $0xe48] sm:$0xff] }
0x110c   : > { %11178 = vmatprep.subr.bf16.mxu1 %v11177_v20  ;;  %v9084_v20 = vld [vmem:[%s14701_s15 + $0xed0] sm:$0xff]  ;;  %v11163_v27 = vpack.c.bf16 %v9067_v5, %v9066_v22 }
0x110d   : > { %7587 = vmatmul.mubr.f32.vlgmr.msra.gmra.mrb[76].mxu0 %v6969_v32  ;;  %v11165_v49 = vpack.c.bf16 %v9085_v57, %v9084_v20  ;;  %v11197_v32 = vpack.c.bf16 %v9117_v39, %v9116_v2 }
0x110e   : > { %7657 = vmatmul.mubr.f32.vlgmr.msra.gmra.mrb[76].mxu1 %v6971_v38  ;;  %11148 = vmatpush3.bf16.msra.mxu0 %v11147_v29  ;;  %v9068_v29 = vld [vmem:[%s14701_s15 + $0xe50] sm:$0xff]  ;;  %v9119_v38 = vld [vmem:[%s14701_s15 + $0xfe8] sm:$0xff] }
0x110f   : > { %7726 = vmatprep.mubr.f32.mxu0 %v6974_v44  ;;  %11180 = vmatpush3.bf16.msra.mxu1 %v11179_v58  ;;  %v9101_v58 = vld [vmem:[%s14701_s15 + $0xf58] sm:$0xff]  ;;  %v9071_v44 = vld [vmem:[%s14701_s15 + $0xe68] sm:$0xff]  ;;  %v11201_v47 = vpack.c.bf16 %v9119_v38, %v9118_v36 }
0x1110   : > { %7796 = vmatprep.mubr.f32.mxu1 %v6976_v54  ;;  %11150 = vmatprep.subr.bf16.mxu0 %v11149_v17  ;;  %v11167_v17 = vpack.c.bf16 %v9069_v6, %v9068_v29  ;;  %v11199_v42 = vpack.c.bf16 %v9101_v58, %v9100_v41  ;;  %v9088_v54 = vld [vmem:[%s14701_s15 + $0xef0] sm:$0xff]  ;;  %v11171_v21 = vpack.c.bf16 %v9071_v44, %v9070_v43 }
0x1111   : > { %11182 = vmatprep.subr.bf16.mxu1 %v11181_v12  ;;  %v9102_v12 = vld [vmem:[%s14701_s15 + $0xf60] sm:$0xff] }
0x1112   : > { %11152 = vmatpush3.bf16.msra.mxu0 %v11151_v55  ;;  %v9089_v55 = vld [vmem:[%s14701_s15 + $0xef8] sm:$0xff]  ;;  %v11203_v1 = vpack.c.bf16 %v9103_v48, %v9102_v12  ;;  %v7835_v12 = vld [vmem:[%s14705_s19] sm:$0xff] }
0x1113   : > { %11184 = vmatpush3.bf16.msra.mxu1 %v11183_v56  ;;  %11154 = vmatprep.subr.bf16.mxu0 %v11153_v63  ;;  %v9120_v56 = vld [vmem:[%s14701_s15 + $0xff0] sm:$0xff]  ;;  %v9121_v63 = vld [vmem:[%s14701_s15 + $0xff8] sm:$0xff] }
0x1114   : > { %11186 = vmatprep.subr.bf16.mxu1 %v11185_v7  ;;  %v11173_v7 = vpack.c.bf16 %v9089_v55, %v9088_v54  ;;  %v11205_v10 = vpack.c.bf16 %v9121_v63, %v9120_v56  ;;  %v7838_v54 = vld [vmem:[%s14705_s19 + $0x18] sm:$0xff]  ;;  %v8467_v56 = vld [vmem:[%s14707_s21] sm:$0xff]  ;;  %v8468_v63 = vld [vmem:[%s14707_s21 + $0x8] sm:$0xff] }
0x1116   : > { %11156 = vmatpush3.bf16.msra.mxu0 %v11155_v19  ;;  %v11207_v19 = vpack.c.bf16 %v9105_v62, %v9104_v11  ;;  %v9129_v11 = vld [vmem:[%s14705_s19 + $0x20] sm:$0xff]  ;;  %v9130_v62 = vld [vmem:[%s14705_s19 + $0x28] sm:$0xff] }
0x1117   : > { %11188 = vmatpush3.bf16.msra.mxu1 %v11187_v33  ;;  %11158 = vmatprep.subr.bf16.mxu0 %v11157_v14  ;;  %v6973_v33 = vmax.f32 %v6886_v13, 0.0  ;;  %v6975_v14 = vmax.f32 %v14010_v40, 0.0 }
0x1118   : > { %11190 = vmatprep.subr.bf16.mxu1 %v11189_v60 }
0x111a   : > { %11160 = vmatpush3.bf16.msra.mxu0 %v11159_v53 }
0x111b   : > { %11192 = vmatpush3.bf16.msra.mxu1 %v11191_v24  ;;  %11162 = vmatprep.subr.bf16.mxu0 %v11161_v59 }
0x111c   : > { %11194 = vmatprep.subr.bf16.mxu1 %v11193_v25 }
0x111e   : > { %11164 = vmatpush3.bf16.msra.mxu0 %v11163_v27 }
0x111f   : > { %11196 = vmatpush3.bf16.msra.mxu1 %v11195_v61  ;;  %11166 = vmatprep.subr.bf16.mxu0 %v11165_v49 }
0x1120   : > { %11198 = vmatprep.subr.bf16.mxu1 %v11197_v32 }
0x1122   : > { %11168 = vmatpush3.bf16.msra.mxu0 %v11167_v17 }
0x1123   : > { %11200 = vmatpush3.bf16.msra.mxu1 %v11199_v42  ;;  %11170 = vmatprep.subr.bf16.mxu0 %v11169_v28 }
0x1124   : > { %11202 = vmatprep.subr.bf16.mxu1 %v11201_v47  ;;  %v7836_v47 = vld [vmem:[%s14705_s19 + $0x8] sm:$0xff] }
0x1125   : > { %v11210_v48 = vpack.c.bf16 %v7836_v47, %v7835_v12  ;;  %v9161_v47 = vld [vmem:[%s14705_s19 + $0xf0] sm:$0xff] }
0x1126   : > { %11172 = vmatpush3.bf16.msra.mxu0 %v11171_v21  ;;  %v11258_v21 = vpack.c.bf16 %v8468_v63, %v8467_v56  ;;  %v8470_v56 = vld [vmem:[%s14707_s21 + $0x18] sm:$0xff] }
0x1127   : > { %11204 = vmatpush3.bf16.msra.mxu1 %v11203_v1  ;;  %11174 = vmatprep.subr.bf16.mxu0 %v11173_v7 }
0x1128   : > { %11206 = vmatprep.subr.bf16.mxu1 %v11205_v10 }
0x112a   : > { %11176 = vmatpush3.bf16.msra.mxu0 %v11175_v45  ;;  %v9127_v45 = vld [vmem:[%s14704_s18 + $0x1] ss:$0 sm:$0xff] }
0x112b   : > { %11208 = vmatpush3.bf16.msra.mxu1 %v11207_v19  ;;  %11209 = vmatprep.subr.bf16.mxu0 %v11431_v4  ;;  %v11216_v19 = vpack.c.bf16 %v9130_v62, %v9129_v11 }
0x112c   : > { %11257 = vmatprep.subr.bf16.mxu1 %v11431_v4 }
0x112d   : > { %7727 = vmatmul.mubr.f32.vlgmr.msra.gmra.mrb[78].mxu0 %v6973_v33 }
0x112e   : > { %7797 = vmatmul.mubr.f32.vlgmr.msra.gmra.mrb[78].mxu1 %v6975_v14  ;;  %10334 = vmatprep.mubr.msk.f32.mxu0 %vm11432_vm0, %v11433_v15  ;;  %v9131_v14 = vld [vmem:[%s14705_s19 + $0x30] sm:$0xff] }
0x112f   : > { %10422 = vmatprep.mubr.msk.f32.mxu1 %vm11432_vm0, %v11433_v15  ;;  %11211 = vmatpush3.bf16.msra.mxu0 %v11210_v48  ;;  %v9162_v48 = vld [vmem:[%s14705_s19 + $0xf8] sm:$0xff] }
0x1130   : > { %11212 = vmatprep.subr.bf16.mxu0 %v11431_v4  ;;  %11259 = vmatpush3.bf16.msra.mxu1 %v11258_v21 }
0x1131   : > { %11260 = vmatprep.subr.bf16.mxu1 %v11431_v4 }
0x11a0   : > { %v9649_v31 = vpop.f32.mrb[72].mxu0  ;;  %v9684_v30 = vpop.f32.mrb[72].mxu1 }
0x11a1   : > { %v9650_v50 = vpop.f32.mrb[73].mxu0  ;;  %v9685_v60 = vpop.f32.mrb[73].mxu1 }
0x11a2   : > { %v9651_v18 = vadd.f32 %v9650_v50, %v9649_v31  ;;  %v9686_v40 = vadd.f32 %v9685_v60, %v9684_v30  ;;  %v9132_v31 = vld [vmem:[%s14705_s19 + $0x38] sm:$0xff]  ;;  %v9135_v50 = vld [vmem:[%s14705_s19 + $0x48] sm:$0xff] }
0x11a3   : > { %v11219_v30 = vpack.c.bf16 %v9132_v31, %v9131_v14 }
0x11a4   : > { %v7309_v52 = vadd.f32 %v9651_v18, %v9123_v16  ;;  %v9134_v16 = vld [vmem:[%s14705_s19 + $0x40] sm:$0xff] }
0x11a5   : > { %v11222_v60 = vpack.c.bf16 %v9135_v50, %v9134_v16 }
0x11a6   : > { %v7379_v46 = vadd.f32 %v9686_v40, %v7309_v52  ;;  %v9136_v40 = vld [vmem:[%s14705_s19 + $0x50] sm:$0xff]  ;;  %v9137_v52 = vld [vmem:[%s14705_s19 + $0x58] sm:$0xff] }
0x11c0   : > { %v9719_v37 = vpop.f32.mrb[74].mxu0  ;;  %v9754_v23 = vpop.f32.mrb[74].mxu1 }
0x11c1   : > { %v9720_v53 = vpop.f32.mrb[75].mxu0  ;;  %v9755_v24 = vpop.f32.mrb[75].mxu1 }
0x11c2   : > { %v9721_v59 = vadd.f32 %v9720_v53, %v9719_v37  ;;  %v9756_v22 = vadd.f32 %v9755_v24, %v9754_v23  ;;  %v9139_v37 = vld [vmem:[%s14705_s19 + $0x60] sm:$0xff]  ;;  %v9140_v23 = vld [vmem:[%s14705_s19 + $0x68] sm:$0xff] }
0x11c3   : > { %v11228_v53 = vpack.c.bf16 %v9140_v23, %v9139_v37 }
0x11c4   : > { %v7449_v5 = vadd.f32 %v9721_v59, %v7379_v46  ;;  %v11225_v46 = vpack.c.bf16 %v9137_v52, %v9136_v40  ;;  %v9141_v59 = vld [vmem:[%s14705_s19 + $0x70] sm:$0xff] }
0x11c6   : > { %v7519_v3 = vadd.f32 %v9756_v22, %v7449_v5  ;;  %v9142_v22 = vld [vmem:[%s14705_s19 + $0x78] sm:$0xff] }
0x11c7   : > { %v11231_v5 = vpack.c.bf16 %v9142_v22, %v9141_v59 }
0x11e0   : > { %v9789_v25 = vpop.f32.mrb[76].mxu0 }
0x11e1   : > { %v9824_v26 = vpop.f32.mrb[76].mxu1  ;;  %v9790_v20 = vpop.f32.mrb[77].mxu0 }
0x11e2   : > { %v9791_v57 = vadd.f32 %v9790_v20, %v9789_v25  ;;  %v9825_v2 = vpop.f32.mrb[77].mxu1  ;;  %v9145_v25 = vld [vmem:[%s14705_s19 + $0x88] sm:$0xff] }
0x11e3   : > { %v9826_v39 = vadd.f32 %v9825_v2, %v9824_v26  ;;  %v9147_v2 = vld [vmem:[%s14705_s19 + $0x98] sm:$0xff] }
0x11e4   : > { %v7589_v27 = vadd.f32 %v9791_v57, %v7519_v3  ;;  %v9144_v3 = vld [vmem:[%s14705_s19 + $0x80] sm:$0xff]  ;;  %v9146_v57 = vld [vmem:[%s14705_s19 + $0x90] sm:$0xff] }
0x11e5   : > { %v11234_v26 = vpack.c.bf16 %v9145_v25, %v9144_v3 }
0x11e6   : > { %v7659_v61 = vadd.f32 %v9826_v39, %v7589_v27  ;;  %v11237_v39 = vpack.c.bf16 %v9147_v2, %v9146_v57  ;;  %v9149_v27 = vld [vmem:[%s14705_s19 + $0xa0] sm:$0xff] }
0x1200   : > { %v9859_v49 = vpop.f32.mrb[78].mxu0 }
0x1201   : > { %v9894_v29 = vpop.f32.mrb[78].mxu1  ;;  %v9860_v6 = vpop.f32.mrb[79].mxu0 }
0x1202   : > { %v9861_v41 = vadd.f32 %v9860_v6, %v9859_v49  ;;  %v9895_v32 = vpop.f32.mrb[79].mxu1  ;;  %v9151_v6 = vld [vmem:[%s14705_s19 + $0xb0] sm:$0xff] }
0x1203   : > { %v9896_v58 = vadd.f32 %v9895_v32, %v9894_v29 }
0x1204   : > { %v7729_v34 = vadd.f32 %v9861_v41, %v7659_v61  ;;  %v9150_v61 = vld [vmem:[%s14705_s19 + $0xa8] sm:$0xff]  ;;  %v9152_v41 = vld [vmem:[%s14705_s19 + $0xb8] sm:$0xff] }
0x1205   : > { %v11240_v49 = vpack.c.bf16 %v9150_v61, %v9149_v27  ;;  %v11243_v32 = vpack.c.bf16 %v9152_v41, %v9151_v6 }
0x1206   : > { %v7799_v51 = vadd.f32 %v9896_v58, %v7729_v34  ;;  %v9154_v58 = vld [vmem:[%s14705_s19 + $0xc0] sm:$0xff]  ;;  %v9155_v34 = vld [vmem:[%s14705_s19 + $0xc8] sm:$0xff] }
0x1208   : > { %v7802_v36 = vadd.f32 %v7799_v51, %v13492_v35  ;;  %v7837_v35 = vld [vmem:[%s14705_s19 + $0x10] sm:$0xff]  ;;  %v11246_v51 = vpack.c.bf16 %v9155_v34, %v9154_v58 }
0x1209   : > { %v11213_v55 = vpack.c.bf16 %v7838_v54, %v7837_v35  ;;  %v11255_v35 = vpack.c.bf16 %v9162_v48, %v9161_v47 }
0x120a   : > { %v7807_v38 = vsel %vm771_vm1, %v7802_v36, 0.0 }
0x120b   : > { %7808 = vadd.xlane.f32.xlu0 %v7807_v38  ;;  %11214 = vmatpush3.bf16.msra.mxu0 %v11213_v55  ;;  %v9156_v38 = vld [vmem:[%s14705_s19 + $0xd0] sm:$0xff] }
0x120c   : > { %11215 = vmatprep.subr.bf16.mxu0 %v11431_v4  ;;  %v8469_v55 = vld [vmem:[%s14707_s21 + $0x10] sm:$0xff] }
0x120d   : > { %v11261_v63 = vpack.c.bf16 %v8470_v56, %v8469_v55 }
0x120f   : > { %11262 = vmatpush3.bf16.msra.mxu1 %v11261_v63 }
0x1298   : > { %v7809_v17 = vpop.xlane.xlu0 %7808 }
0x1299   : > { %v7810_v42 = vmul.f32 0.03125, %v7809_v17  ;;  %v9157_v17 = vld [vmem:[%s14705_s19 + $0xd8] sm:$0xff] }
0x129b   : > { %v7811_v28 = vsub.f32 %v7802_v36, %v7810_v42  ;;  %v11249_v42 = vpack.c.bf16 %v9157_v17, %v9156_v38 }
0x129d   : > { %v7812_v43 = vmul.f32 %v7811_v28, %v7811_v28 }
0x129f   : > { %v7813_v44 = vsel %vm771_vm1, %v7812_v43, 0.0  ;;  %v9160_v43 = vld [vmem:[%s14705_s19 + $0xe8] sm:$0xff] }
0x12a0   : > { %7814 = vadd.xlane.f32.xlu1 %v7813_v44 }
0x132d   : > { %v7815_v0 = vpop.xlane.xlu1 %7814 }
0x132e   : > { %v7816_v1 = vmul.f32 0.03125, %v7815_v0 }
0x1330   : > { %v7817_v7 = vadd.f32 1e-05, %v7816_v1 }
0x1332   : > { %11360 = vrsqrt.f32 %v7817_v7  ;;  %v8471_v7 = vld [vmem:[%s14760_s4] sm:$0x1]  ;;  %s11372_s4 = scalar_lea.vmem %s11371_s22, 32 }
0x1333   : > { %p11374_p1 = scmp.lt.s32.totalorder %s11372_s4, %s11366_s5 }
0x1335   : > { %p11375_p2 = por %p11374_p1, %p11373_p0 }
0x1337   : > { %p11376_p3 = pnand %p11375_p2, %p11369_p13 }
0x133c   : > { %v11361_v8 = vpop.eup %11360 }
0x133d   : > { %v7819_v10 = vmul.f32 %v11361_v8, %v7811_v28  ;;  %v9159_v28 = vld [vmem:[%s14705_s19 + $0xe0] sm:$0xff] }
0x133e   : > { %v11252_v44 = vpack.c.bf16 %v9160_v43, %v9159_v28 }
0x133f   : > { %v7826_v13 = vmul.f32 %v9126_v9, %v7819_v10 }
0x1341   : > { %v14503_v33 = vadd.f32 %v9127_v45, %v7826_v13 }
0x1343   : > { %10335 = vmatmul.mubr.msk.f32.vlgmr.msra.gmra.mrb[80].mxu0 %vm771_vm1, %v14503_v33  ;;  %v7918_v18 = vrot.slane %v14503_v33, 1  ;;  %v7997_v24 = vrot.slane %v14503_v33, 2  ;;  %v8076_v20 = vrot.slane %v14503_v33, 3  ;;  %v8155_v29 = vrot.slane %v14503_v33, 4 }
0x1344   : > { %11217 = vmatpush3.bf16.msra.mxu0 %v11216_v19  ;;  %10345 = vmatprep.mubr.msk.f32.mxu0 %vm11432_vm0, %v11433_v15  ;;  %v8234_v36 = vrot.slane %v14503_v33, 5  ;;  %v8313_v12 = vrot.slane %v14503_v33, 6  ;;  %v8392_v54 = vrot.slane %v14503_v33, 7 }
0x1345   : > { %11218 = vmatprep.subr.bf16.mxu0 %v11431_v4 }
0x1348   : > { %11220 = vmatpush3.bf16.msra.mxu0 %v11219_v30 }
0x1349   : > { %11221 = vmatprep.subr.bf16.mxu0 %v11431_v4 }
0x134b   : > { %10346 = vmatmul.mubr.msk.f32.vlgmr.msra.gmra.mrb[80].mxu0 %vm771_vm1, %v7918_v18 }
0x134c   : > { %11223 = vmatpush3.bf16.msra.mxu0 %v11222_v60  ;;  %10356 = vmatprep.mubr.msk.f32.mxu0 %vm11432_vm0, %v11433_v15 }
0x134d   : > { %11224 = vmatprep.subr.bf16.mxu0 %v11431_v4 }
0x1350   : > { %11226 = vmatpush3.bf16.msra.mxu0 %v11225_v46 }
0x1351   : > { %11227 = vmatprep.subr.bf16.mxu0 %v11431_v4 }
0x1353   : > { %10357 = vmatmul.mubr.msk.f32.vlgmr.msra.gmra.mrb[80].mxu0 %vm771_vm1, %v7997_v24 }
0x1354   : > { %11229 = vmatpush3.bf16.msra.mxu0 %v11228_v53  ;;  %10367 = vmatprep.mubr.msk.f32.mxu0 %vm11432_vm0, %v11433_v15 }
0x1355   : > { %11230 = vmatprep.subr.bf16.mxu0 %v11431_v4 }
0x1358   : > { %11232 = vmatpush3.bf16.msra.mxu0 %v11231_v5 }
0x1359   : > { %11233 = vmatprep.subr.bf16.mxu0 %v11431_v4 }
0x135b   : > { %10368 = vmatmul.mubr.msk.f32.vlgmr.msra.gmra.mrb[80].mxu0 %vm771_vm1, %v8076_v20 }
0x135c   : > { %11235 = vmatpush3.bf16.msra.mxu0 %v11234_v26  ;;  %10378 = vmatprep.mubr.msk.f32.mxu0 %vm11432_vm0, %v11433_v15 }
0x135d   : > { %11236 = vmatprep.subr.bf16.mxu0 %v11431_v4 }
0x1360   : > { %11238 = vmatpush3.bf16.msra.mxu0 %v11237_v39 }
0x1361   : > { %11239 = vmatprep.subr.bf16.mxu0 %v11431_v4 }
0x1363   : > { %10379 = vmatmul.mubr.msk.f32.vlgmr.msra.gmra.mrb[80].mxu0 %vm771_vm1, %v8155_v29 }
0x1364   : > { %11241 = vmatpush3.bf16.msra.mxu0 %v11240_v49  ;;  %10389 = vmatprep.mubr.msk.f32.mxu0 %vm11432_vm0, %v11433_v15 }
0x1365   : > { %11242 = vmatprep.subr.bf16.mxu0 %v11431_v4 }
0x1368   : > { %11244 = vmatpush3.bf16.msra.mxu0 %v11243_v32 }
0x1369   : > { %11245 = vmatprep.subr.bf16.mxu0 %v11431_v4 }
0x136b   : > { %10390 = vmatmul.mubr.msk.f32.vlgmr.msra.gmra.mrb[80].mxu0 %vm771_vm1, %v8234_v36 }
0x136c   : > { %11247 = vmatpush3.bf16.msra.mxu0 %v11246_v51  ;;  %10400 = vmatprep.mubr.msk.f32.mxu0 %vm11432_vm0, %v11433_v15 }
0x136d   : > { %11248 = vmatprep.subr.bf16.mxu0 %v11431_v4 }
0x1370   : > { %11250 = vmatpush3.bf16.msra.mxu0 %v11249_v42 }
0x1371   : > { %11251 = vmatprep.subr.bf16.mxu0 %v11431_v4 }
0x1373   : > { %10401 = vmatmul.mubr.msk.f32.vlgmr.msra.gmra.mrb[80].mxu0 %vm771_vm1, %v8313_v12 }
0x1374   : > { %11253 = vmatpush3.bf16.msra.mxu0 %v11252_v44  ;;  %10411 = vmatprep.mubr.msk.f32.mxu0 %vm11432_vm0, %v11433_v15 }
0x1375   : > { %11254 = vmatprep.subr.bf16.mxu0 %v11431_v4  ;;  %v7834_v4 = vld [vmem:[%s14706_s20] sm:$0x1] }
0x1378   : > { %11256 = vmatpush3.bf16.msra.mxu0 %v11255_v35 }
0x137b   : > { %10412 = vmatmul.mubr.msk.f32.vlgmr.msra.gmra.mrb[80].mxu0 %vm771_vm1, %v8392_v54 }
0x144e   : > { %v8461_v15 = vpop.f32.mrb[80].mxu0 }
0x144f   : > { %v11263_v21 = vadd.f32 %v8461_v15, %v7834_v4  ;;  %v10413_v0 = vpop.f32.mrb[81].mxu0 }
0x1451   : > { %v8466_v1 = vmax.f32 %v11263_v21, 0.0 }
0x1453   : > { %10423 = vmatmul.mubr.msk.f32.vlgmr.msra.gmra.mrb[80].mxu1 %vm771_vm1, %v8466_v1 }
0x1526   : > { %v8541_v8 = vpop.f32.mrb[80].mxu1 }
0x1527   : > { %v8542_v9 = vadd.f32 %v8541_v8, %v8471_v7  ;;  %v10424_v10 = vpop.f32.mrb[81].mxu1 }
0x1529   : > { %v9165_v11 = vmul.f32 -1.442695, %v8542_v9 }
0x152b   : > { %11362 = vpow2.f32 %v9165_v11 }
0x1535   : > { %v11363_v62 = vpop.eup %11362 }
0x1536   : > { %v8548_v45 = vadd.f32 1.0, %v11363_v62 }
0x1538   : > { %11364 = vrcp.f32 %v8548_v45 }
0x1542   : > { %v11365_v13 = vpop.eup %11364 }
0x1543   : > { %8552 = vst.msk [vmem:[%s700_s23] sm:$0x1] %vm8551_vm3, %v11365_v13 }
0x1544   : > { %11379 = shalt.err (!%p11376_p3)
}
0x1545   : > { %s11380_s30 = scalar_lea.hbm %s14644_s1, 16  ;;  %s11384_s3 = scalar_lea.hbm %s14762_s0, 32 }
0x1546   : > { %p11381_p4 = scmp.ne.s32.totalorder %s14644_s1, %s11380_s30  ;;  %p11385_p9 = scmp.lt.u32.totalorder %s14644_s1, %s14762_s0 }
0x1547   : > { %p11386_p10 = scmp.lt.u32.totalorder %s11384_s3, %s11380_s30  ;;  %p11388_p12 = scmp.lt.u32.totalorder %s11380_s30, %s14644_s1 }
0x1548   : > { %p11382_p7 = pnand %p11381_p4, %p11593_p5 }
0x1549   : > { %p11387_p11 = por %p11386_p10, %p11385_p9 }
0x154a   : > { %p11383_p8 = pneg %p11382_p7 }
0x154b   : > { %p11389_p13 = por %p11388_p12, %p11387_p11 }
0x154d   : > { %p11390_p0 = pnand %p11389_p13, %p11383_p8 }
0x154f   : > { %11393 = shalt.err (!%p11390_p0)
}
0x1550   : > { %11278 = dma.vmem_to_hbm [thread:$0]  (%p11593_p5), %s14646_s28, 16, %s14644_s1, %s8554_s24  }
0x1551 PF: > { %s14763_s5 = sld [smem:[#allocation8_spill]]  ;;  %s14764_s22 = sld [smem:[#allocation5_spill]] }
0x1557   : > { %p11284_p1 = scmp.ge.s32.totalorder %s14763_s5, 2  ;;  %s8578_s7 = sand.u32 1, %s14764_s22  }
0x1558   : > { %s8579_s23 = scalar_lea.sflag [#allocation3], %s8578_s7 }
0x1559   : > { %p11281_p2 = pnand %p11284_p1, %p11597_p6 }
0x155b   : > { %11411 = dma.done.wait (!%p11281_p2), %s8579_s23, 16  }
0x155c   : > { %11413 = vsyncadd (!%p11281_p2), %s8579_s23, 4294967280  ;;  %s14766_s25 = sld [smem:[#allocation10_spill]]  ;;  %s14767_s4 = sld [smem:[#allocation6_spill]] }
0x155d   : > { %s14768_s30 = sld [smem:[#allocation7_spill]]  ;;  %s14769_s24 = sld [smem:[#allocation11_spill]] }
0x1562   : > { %p33_p3 = scmp.ge.s32.totalorder %s14766_s25, 4  }
0x1564   :  { %35 = sbr.rel (!%p33_p3) target bundleno = 14 (0xe), region = 170 }
0x156b   :  { %8583 = vsyncpa [#allocation3], 1 }
0x156c   :  { %8585 = vsyncpa [#allocation3 + $0x1], 1 }

</bundles_post_ra>
